<compile_context>
chip_gen: v5e
topology: v5e:2x2
jax: 0.10.0
libtpu: 0.0.40
codegen_flags: <defaults>
</compile_context>

<pallas_src>
import functools

import numpy as np
import jax
import jax.numpy as jnp
from jax.experimental import pallas as pl
from jax.experimental.pallas import tpu as pltpu


def _erf_approx(x):
    # Abramowitz & Stegun 7.1.26, |error| < 1.5e-7 -- only exp/mul/add/div.
    a1, a2, a3, a4, a5 = 0.254829592, -0.284496736, 1.421413741, -1.453152027, 1.061405429
    p = 0.3275911
    s = jnp.where(x >= 0.0, 1.0, -1.0)
    ax = jnp.abs(x)
    t = 1.0 / (1.0 + p * ax)
    y = 1.0 - (((((a5 * t + a4) * t + a3) * t + a2) * t + a1) * t) * jnp.exp(-ax * ax)
    return s * y


def _gelu_exact(x):
    return 0.5 * x * (1.0 + _erf_approx(x * 0.7071067811865476))


def mixffn_kernel(x_ref, yx_ref, w1_ref, b1_ref, wp1_ref, bp1_ref,
                  wdw_ref, bdw_ref, wp2_ref, bp2_ref, w2_ref, b2_ref,
                  o_ref, *, H, W):
    f32 = jnp.float32
    bf16 = jnp.bfloat16
    M = x_ref.shape[1]            # B * H * W tokens, on the lane axis

    # ---------- fc1: (c2, c1) @ (c1, M) -> (c2, M) --------------------------
    h = jnp.dot(w1_ref[...], x_ref[...], preferred_element_type=f32) + b1_ref[...]

    # ---------- pwconv1 (+ folded eval-mode BatchNorm) -----------------------
    h = jnp.dot(wp1_ref[...], h.astype(bf16), preferred_element_type=f32) + bp1_ref[...]

    # ---------- residual + dwconv3 + dwconv5 + dwconv7 (fused 7x7 depthwise) -
    # Evaluated with lane rolls along the token axis + boundary masks.
    # Separable: first 7 row shifts (dy * W), then 7 column shifts (dx).
    yx = yx_ref[...]              # (2, M) f32: row 0 = y(token), row 1 = x(token)
    yc = yx[0:1, :]               # (1, M)
    xc = yx[1:2, :]               # (1, M)
    wdw = wdw_ref[...]            # (c2, 49) f32, tap = (dy+3)*7 + (dx+3)

    R = 3
    K = 2 * R + 1
    col_part = [None] * K         # per-dx partial sums over dy
    for dy in range(-R, R + 1):
        s = (-(dy * W)) % M       # want rolled[:, m] == h[:, m + dy*W]
        rolled = pltpu.roll(h, s, axis=1) if s else h
        if dy != 0:
            valid = (yc >= float(-dy)) & (yc <= float((H - 1) - dy))
            rolled = rolled * jnp.where(valid, 1.0, 0.0)
        for dx in range(-R, R + 1):
            tap = (dy + R) * K + (dx + R)
            contrib = rolled * wdw[:, tap:tap + 1]
            j = dx + R
            col_part[j] = contrib if col_part[j] is None else col_part[j] + contrib

    conv = None
    for dx in range(-R, R + 1):
        s = (-dx) % M             # want rolled[:, m] == part[:, m + dx]
        part = col_part[dx + R]
        rolled = pltpu.roll(part, s, axis=1) if s else part
        if dx != 0:
            valid = (xc >= float(-dx)) & (xc <= float((W - 1) - dx))
            rolled = rolled * jnp.where(valid, 1.0, 0.0)
        conv = rolled if conv is None else conv + rolled
    conv = conv + bdw_ref[...]    # combined dwconv biases

    # ---------- pwconv2 (+ folded BN) -> GELU(exact) -> fc2 ------------------
    z = jnp.dot(wp2_ref[...], conv.astype(bf16), preferred_element_type=f32) + bp2_ref[...]
    g = _gelu_exact(z)
    out = jnp.dot(w2_ref[...], g.astype(bf16), preferred_element_type=f32) + b2_ref[...]
    o_ref[...] = out.astype(o_ref.dtype)


def mixffn(x, params, H, W):
    """x: (B, N=H*W, c1) float32 -> (B, N, c1) float32."""
    B, N, c1 = x.shape
    c2 = params['w_fc1'].shape[1]
    M = B * N
    eps = 1e-5

    # ---- fold eval-mode BatchNorm into the pointwise convs (host side) ----
    def fold_bn(w, b, gamma, beta, mean, var):
        s = gamma * jax.lax.rsqrt(var + eps)
        w_t = (w * s[None, :]).T                      # (c2_out, c2_in) left-mult form
        b_col = ((b - mean) * s + beta).reshape(c2, 1)
        return w_t, b_col

    wp1_t, bp1 = fold_bn(params['w_pw1'], params['b_pw1'], params['bn1_g'],
                         params['bn1_b'], params['bn1_m'], params['bn1_v'])
    wp2_t, bp2 = fold_bn(params['w_pw2'], params['b_pw2'], params['bn2_g'],
                         params['bn2_b'], params['bn2_m'], params['bn2_v'])

    # ---- fuse identity + 3x3 + 5x5 + 7x7 depthwise taps into (c2, 49) ------
    w_eff = jnp.zeros((7, 7, c2), jnp.float32)
    w_eff = w_eff.at[2:5, 2:5, :].add(params['w_dw3'])
    w_eff = w_eff.at[1:6, 1:6, :].add(params['w_dw5'])
    w_eff = w_eff + params['w_dw7']
    w_eff = w_eff.at[3, 3, :].add(1.0)                # the residual "+ x" term
    wdw = w_eff.reshape(49, c2).T                     # (c2, 49), tap = (dy+3)*7+(dx+3)
    bdw = (params['b_dw3'] + params['b_dw5'] + params['b_dw7']).reshape(c2, 1)

    # ---- per-token (row, col) coordinates for the conv boundary masks ------
    yy, xx = jnp.meshgrid(jnp.arange(H, dtype=jnp.float32),
                          jnp.arange(W, dtype=jnp.float32), indexing='ij')
    coords = jnp.stack([yy.reshape(-1), xx.reshape(-1)], axis=0)   # (2, N)
    coords = jnp.tile(coords, (1, B))                              # (2, M)

    # ---- bf16 MXU operands, transposed (channels x tokens) layout ----------
    x_t = x.reshape(M, c1).T.astype(jnp.bfloat16)      # (c1, M) lane-dense tokens
    w1_t = params['w_fc1'].T.astype(jnp.bfloat16)      # (c2, c1)
    b1 = params['b_fc1'].reshape(c2, 1)
    wp1_t = wp1_t.astype(jnp.bfloat16)
    wp2_t = wp2_t.astype(jnp.bfloat16)
    w2_t = params['w_fc2'].T.astype(jnp.bfloat16)      # (c1, c2)
    b2 = params['b_fc2'].reshape(c1, 1)

    kernel = functools.partial(mixffn_kernel, H=H, W=W)

    def full(shape):
        nd = len(shape)
        return pl.BlockSpec(shape, lambda i, _nd=nd: (0,) * _nd)

    out_t = pl.pallas_call(
        kernel,
        out_shape=jax.ShapeDtypeStruct((c1, M), jnp.float32),
        grid_spec=pltpu.PrefetchScalarGridSpec(
            num_scalar_prefetch=0,
            grid=(1,),
            in_specs=[
                full((c1, M)),    # x (transposed, bf16)
                full((2, M)),     # token (y, x) coordinates
                full((c2, c1)),   # fc1 weight
                full((c2, 1)),    # fc1 bias
                full((c2, c2)),   # pwconv1 (BN-folded) weight
                full((c2, 1)),    # pwconv1 (BN-folded) bias
                full((c2, 49)),   # fused depthwise tap table
                full((c2, 1)),    # fused depthwise bias
                full((c2, c2)),   # pwconv2 (BN-folded) weight
                full((c2, 1)),    # pwconv2 (BN-folded) bias
                full((c1, c2)),   # fc2 weight
                full((c1, 1)),    # fc2 bias
            ],
            out_specs=full((c1, M)),
        ),
        compiler_params=pltpu.CompilerParams(dimension_semantics=("arbitrary",)),
    )(x_t, coords, w1_t, b1, wp1_t, bp1, wdw, bdw, wp2_t, bp2, w2_t, b2)

    return out_t.T.reshape(B, N, c1)


def make_params(key, c1, c2):
    ks = jax.random.split(key, 22)
    s = 0.1

    def nrm(k, shape, scale=s):
        return jax.random.normal(k, shape, jnp.float32) * scale

    return dict(
        w_fc1=nrm(ks[0], (c1, c2)),   b_fc1=nrm(ks[1], (c2,)),
        w_pw1=nrm(ks[2], (c2, c2)),   b_pw1=nrm(ks[3], (c2,)),
        bn1_g=1.0 + nrm(ks[4], (c2,)), bn1_b=nrm(ks[5], (c2,)),
        bn1_m=nrm(ks[6], (c2,)),      bn1_v=jnp.abs(1.0 + nrm(ks[7], (c2,))),
        w_dw3=nrm(ks[8], (3, 3, c2)), b_dw3=nrm(ks[9], (c2,)),
        w_dw5=nrm(ks[10], (5, 5, c2)), b_dw5=nrm(ks[11], (c2,)),
        w_dw7=nrm(ks[12], (7, 7, c2)), b_dw7=nrm(ks[13], (c2,)),
        w_pw2=nrm(ks[14], (c2, c2)),  b_pw2=nrm(ks[15], (c2,)),
        bn2_g=1.0 + nrm(ks[16], (c2,)), bn2_b=nrm(ks[17], (c2,)),
        bn2_m=nrm(ks[18], (c2,)),     bn2_v=jnp.abs(1.0 + nrm(ks[19], (c2,))),
        w_fc2=nrm(ks[20], (c2, c1)),  b_fc2=nrm(ks[21], (c1,)),
    )


def reference(x, p, H, W):
    """Pure-JAX f32 reference mirroring the PyTorch MixFFN forward (BN eval)."""
    B, N, c1 = x.shape
    c2 = p['w_fc1'].shape[1]
    eps = 1e-5

    def pw_bn(z, w, b, gamma, beta, mean, var):
        z = z @ w + b
        return (z - mean) * jax.lax.rsqrt(var + eps) * gamma + beta

    def dwconv(img, w, b):
        k = w.shape[0]
        out = jax.lax.conv_general_dilated(
            img, w.reshape(k, k, 1, c2), (1, 1),
            padding=((k // 2, k // 2), (k // 2, k // 2)),
            dimension_numbers=('NHWC', 'HWIO', 'NHWC'),
            feature_group_count=c2)
        return out + b

    h = x @ p['w_fc1'] + p['b_fc1']
    h = pw_bn(h, p['w_pw1'], p['b_pw1'], p['bn1_g'], p['bn1_b'], p['bn1_m'], p['bn1_v'])
    img = h.reshape(B, H, W, c2)
    ssum = (img + dwconv(img, p['w_dw3'], p['b_dw3'])
                + dwconv(img, p['w_dw5'], p['b_dw5'])
                + dwconv(img, p['w_dw7'], p['b_dw7'])).reshape(B, N, c2)
    z = pw_bn(ssum, p['w_pw2'], p['b_pw2'], p['bn2_g'], p['bn2_b'], p['bn2_m'], p['bn2_v'])
    g = jax.nn.gelu(z, approximate=False)
    return g @ p['w_fc2'] + p['b_fc2']


if __name__ == "__main__":
    # MixFFN(c1=32, c2=64), image 8x8 -> N=64 tokens, batch 2 (B*N = 128 lanes)
    B, H, W = 2, 8, 8
    c1, c2 = 32, 64
    N = H * W

    key = jax.random.PRNGKey(0)
    kx, kp = jax.random.split(key)
    x = jax.random.normal(kx, (B, N, c1), jnp.float32)
    params = make_params(kp, c1, c2)

    out = jax.block_until_ready(mixffn(x, params, H, W))
    ref = reference(x, params, H, W)

    assert out.shape == (B, N, c1)
    np.testing.assert_allclose(np.asarray(out), np.asarray(ref), rtol=2e-2, atol=2e-2)
    print("KERNEL_OK")
</pallas_src>

<mosaic_0001>
module attributes {stable_mosaic.version = 11 : i64} {
  func.func @mixffn_kernel(%arg0: i32, %arg1: memref<32x128xbf16, #tpu.memory_space<vmem>>, %arg2: memref<2x128xf32, #tpu.memory_space<vmem>>, %arg3: memref<64x32xbf16, #tpu.memory_space<vmem>>, %arg4: memref<64x1xf32, #tpu.memory_space<vmem>>, %arg5: memref<64x64xbf16, #tpu.memory_space<vmem>>, %arg6: memref<64x1xf32, #tpu.memory_space<vmem>>, %arg7: memref<64x49xf32, #tpu.memory_space<vmem>>, %arg8: memref<64x1xf32, #tpu.memory_space<vmem>>, %arg9: memref<64x64xbf16, #tpu.memory_space<vmem>>, %arg10: memref<64x1xf32, #tpu.memory_space<vmem>>, %arg11: memref<32x64xbf16, #tpu.memory_space<vmem>>, %arg12: memref<32x1xf32, #tpu.memory_space<vmem>>, %arg13: memref<32x128xf32, #tpu.memory_space<vmem>>) attributes {dimension_semantics = [#tpu.dimension_semantics<arbitrary>], iteration_bounds = array<i64: 1>, scalar_prefetch = 0 : i64, scratch_operands = 0 : i64, tpu.core_type = #tpu.core_type<tc>, window_params = [{pipeline_mode = #tpu.pipeline_mode<synchronous>, transform_indices = @transform_0, window_bounds = array<i64: 32, 128>}, {pipeline_mode = #tpu.pipeline_mode<synchronous>, transform_indices = @transform_1, window_bounds = array<i64: 2, 128>}, {pipeline_mode = #tpu.pipeline_mode<synchronous>, transform_indices = @transform_2, window_bounds = array<i64: 64, 32>}, {pipeline_mode = #tpu.pipeline_mode<synchronous>, transform_indices = @transform_3, window_bounds = array<i64: 64, 1>}, {pipeline_mode = #tpu.pipeline_mode<synchronous>, transform_indices = @transform_4, window_bounds = array<i64: 64, 64>}, {pipeline_mode = #tpu.pipeline_mode<synchronous>, transform_indices = @transform_5, window_bounds = array<i64: 64, 1>}, {pipeline_mode = #tpu.pipeline_mode<synchronous>, transform_indices = @transform_6, window_bounds = array<i64: 64, 49>}, {pipeline_mode = #tpu.pipeline_mode<synchronous>, transform_indices = @transform_7, window_bounds = array<i64: 64, 1>}, {pipeline_mode = #tpu.pipeline_mode<synchronous>, transform_indices = @transform_8, window_bounds = array<i64: 64, 64>}, {pipeline_mode = #tpu.pipeline_mode<synchronous>, transform_indices = @transform_9, window_bounds = array<i64: 64, 1>}, {pipeline_mode = #tpu.pipeline_mode<synchronous>, transform_indices = @transform_10, window_bounds = array<i64: 32, 64>}, {pipeline_mode = #tpu.pipeline_mode<synchronous>, transform_indices = @transform_11, window_bounds = array<i64: 32, 1>}, {pipeline_mode = #tpu.pipeline_mode<synchronous>, transform_indices = @transform_12, window_bounds = array<i64: 32, 128>}]} {
    %c0 = arith.constant 0 : index
    %c0_0 = arith.constant 0 : index
    %0 = vector.load %arg3[%c0, %c0_0] : memref<64x32xbf16, #tpu.memory_space<vmem>>, vector<64x32xbf16>
    %c0_1 = arith.constant 0 : index
    %c0_2 = arith.constant 0 : index
    %1 = vector.load %arg1[%c0_1, %c0_2] : memref<32x128xbf16, #tpu.memory_space<vmem>>, vector<32x128xbf16>
    %cst = arith.constant dense<0.000000e+00> : vector<64x128xf32>
    %2 = tpu.matmul %0, %1, %cst {dimension_numbers = #tpu.dot_dimension_numbers<[1], [0], [0], [1], [0, 0, 1, 1], [], []>} : vector<64x32xbf16>, vector<32x128xbf16>, vector<64x128xf32> -> vector<64x128xf32>
    %c0_3 = arith.constant 0 : index
    %c0_4 = arith.constant 0 : index
    %3 = vector.load %arg4[%c0_3, %c0_4] : memref<64x1xf32, #tpu.memory_space<vmem>>, vector<64x1xf32>
    %4 = vector.broadcast %3 : vector<64x1xf32> to vector<64x128xf32>
    %5 = arith.addf %2, %4 : vector<64x128xf32>
    %c0_5 = arith.constant 0 : index
    %c0_6 = arith.constant 0 : index
    %6 = vector.load %arg5[%c0_5, %c0_6] : memref<64x64xbf16, #tpu.memory_space<vmem>>, vector<64x64xbf16>
    %7 = arith.truncf %5 : vector<64x128xf32> to vector<64x128xbf16>
    %cst_7 = arith.constant dense<0.000000e+00> : vector<64x128xf32>
    %8 = tpu.matmul %6, %7, %cst_7 {dimension_numbers = #tpu.dot_dimension_numbers<[1], [0], [0], [1], [0, 0, 1, 1], [], []>} : vector<64x64xbf16>, vector<64x128xbf16>, vector<64x128xf32> -> vector<64x128xf32>
    %c0_8 = arith.constant 0 : index
    %c0_9 = arith.constant 0 : index
    %9 = vector.load %arg6[%c0_8, %c0_9] : memref<64x1xf32, #tpu.memory_space<vmem>>, vector<64x1xf32>
    %10 = vector.broadcast %9 : vector<64x1xf32> to vector<64x128xf32>
    %11 = arith.addf %8, %10 : vector<64x128xf32>
    %c0_10 = arith.constant 0 : index
    %c0_11 = arith.constant 0 : index
    %12 = vector.load %arg2[%c0_10, %c0_11] : memref<2x128xf32, #tpu.memory_space<vmem>>, vector<2x128xf32>
    %13 = vector.extract_strided_slice %12 {offsets = [0, 0], sizes = [1, 128], strides = [1, 1]} : vector<2x128xf32> to vector<1x128xf32>
    %14 = vector.extract_strided_slice %12 {offsets = [1, 0], sizes = [1, 128], strides = [1, 1]} : vector<2x128xf32> to vector<1x128xf32>
    %c0_12 = arith.constant 0 : index
    %c0_13 = arith.constant 0 : index
    %15 = vector.load %arg7[%c0_12, %c0_13] : memref<64x49xf32, #tpu.memory_space<vmem>>, vector<64x49xf32>
    %c24_i32 = arith.constant 24 : i32
    %16 = tpu.dynamic_rotate %11 by %c24_i32 dim 1 : vector<64x128xf32>, i32 -> vector<64x128xf32>
    %cst_14 = arith.constant 3.000000e+00 : f32
    %17 = vector.broadcast %cst_14 : f32 to vector<1x128xf32>
    %18 = arith.cmpf oge, %13, %17 : vector<1x128xf32>
    %cst_15 = arith.constant 1.000000e+01 : f32
    %19 = vector.broadcast %cst_15 : f32 to vector<1x128xf32>
    %20 = arith.cmpf ole, %13, %19 : vector<1x128xf32>
    %21 = arith.andi %18, %20 : vector<1x128xi1>
    %cst_16 = arith.constant 1.000000e+00 : f32
    %cst_17 = arith.constant 0.000000e+00 : f32
    %22 = vector.broadcast %cst_16 : f32 to vector<1x128xf32>
    %23 = vector.broadcast %cst_17 : f32 to vector<1x128xf32>
    %24 = arith.select %21, %22, %23 : vector<1x128xi1>, vector<1x128xf32>
    %25 = vector.broadcast %24 : vector<1x128xf32> to vector<64x128xf32>
    %26 = arith.mulf %16, %25 : vector<64x128xf32>
    %27 = vector.extract_strided_slice %15 {offsets = [0, 0], sizes = [64, 1], strides = [1, 1]} : vector<64x49xf32> to vector<64x1xf32>
    %28 = vector.broadcast %27 : vector<64x1xf32> to vector<64x128xf32>
    %29 = arith.mulf %26, %28 : vector<64x128xf32>
    %30 = vector.extract_strided_slice %15 {offsets = [0, 1], sizes = [64, 1], strides = [1, 1]} : vector<64x49xf32> to vector<64x1xf32>
    %31 = vector.broadcast %30 : vector<64x1xf32> to vector<64x128xf32>
    %32 = arith.mulf %26, %31 : vector<64x128xf32>
    %33 = vector.extract_strided_slice %15 {offsets = [0, 2], sizes = [64, 1], strides = [1, 1]} : vector<64x49xf32> to vector<64x1xf32>
    %34 = vector.broadcast %33 : vector<64x1xf32> to vector<64x128xf32>
    %35 = arith.mulf %26, %34 : vector<64x128xf32>
    %36 = vector.extract_strided_slice %15 {offsets = [0, 3], sizes = [64, 1], strides = [1, 1]} : vector<64x49xf32> to vector<64x1xf32>
    %37 = vector.broadcast %36 : vector<64x1xf32> to vector<64x128xf32>
    %38 = arith.mulf %26, %37 : vector<64x128xf32>
    %39 = vector.extract_strided_slice %15 {offsets = [0, 4], sizes = [64, 1], strides = [1, 1]} : vector<64x49xf32> to vector<64x1xf32>
    %40 = vector.broadcast %39 : vector<64x1xf32> to vector<64x128xf32>
    %41 = arith.mulf %26, %40 : vector<64x128xf32>
    %42 = vector.extract_strided_slice %15 {offsets = [0, 5], sizes = [64, 1], strides = [1, 1]} : vector<64x49xf32> to vector<64x1xf32>
    %43 = vector.broadcast %42 : vector<64x1xf32> to vector<64x128xf32>
    %44 = arith.mulf %26, %43 : vector<64x128xf32>
    %45 = vector.extract_strided_slice %15 {offsets = [0, 6], sizes = [64, 1], strides = [1, 1]} : vector<64x49xf32> to vector<64x1xf32>
    %46 = vector.broadcast %45 : vector<64x1xf32> to vector<64x128xf32>
    %47 = arith.mulf %26, %46 : vector<64x128xf32>
    %c16_i32 = arith.constant 16 : i32
    %48 = tpu.dynamic_rotate %11 by %c16_i32 dim 1 : vector<64x128xf32>, i32 -> vector<64x128xf32>
    %cst_18 = arith.constant 2.000000e+00 : f32
    %49 = vector.broadcast %cst_18 : f32 to vector<1x128xf32>
    %50 = arith.cmpf oge, %13, %49 : vector<1x128xf32>
    %cst_19 = arith.constant 9.000000e+00 : f32
    %51 = vector.broadcast %cst_19 : f32 to vector<1x128xf32>
    %52 = arith.cmpf ole, %13, %51 : vector<1x128xf32>
    %53 = arith.andi %50, %52 : vector<1x128xi1>
    %cst_20 = arith.constant 1.000000e+00 : f32
    %cst_21 = arith.constant 0.000000e+00 : f32
    %54 = vector.broadcast %cst_20 : f32 to vector<1x128xf32>
    %55 = vector.broadcast %cst_21 : f32 to vector<1x128xf32>
    %56 = arith.select %53, %54, %55 : vector<1x128xi1>, vector<1x128xf32>
    %57 = vector.broadcast %56 : vector<1x128xf32> to vector<64x128xf32>
    %58 = arith.mulf %48, %57 : vector<64x128xf32>
    %59 = vector.extract_strided_slice %15 {offsets = [0, 7], sizes = [64, 1], strides = [1, 1]} : vector<64x49xf32> to vector<64x1xf32>
    %60 = vector.broadcast %59 : vector<64x1xf32> to vector<64x128xf32>
    %61 = arith.mulf %58, %60 : vector<64x128xf32>
    %62 = arith.addf %29, %61 : vector<64x128xf32>
    %63 = vector.extract_strided_slice %15 {offsets = [0, 8], sizes = [64, 1], strides = [1, 1]} : vector<64x49xf32> to vector<64x1xf32>
    %64 = vector.broadcast %63 : vector<64x1xf32> to vector<64x128xf32>
    %65 = arith.mulf %58, %64 : vector<64x128xf32>
    %66 = arith.addf %32, %65 : vector<64x128xf32>
    %67 = vector.extract_strided_slice %15 {offsets = [0, 9], sizes = [64, 1], strides = [1, 1]} : vector<64x49xf32> to vector<64x1xf32>
    %68 = vector.broadcast %67 : vector<64x1xf32> to vector<64x128xf32>
    %69 = arith.mulf %58, %68 : vector<64x128xf32>
    %70 = arith.addf %35, %69 : vector<64x128xf32>
    %71 = vector.extract_strided_slice %15 {offsets = [0, 10], sizes = [64, 1], strides = [1, 1]} : vector<64x49xf32> to vector<64x1xf32>
    %72 = vector.broadcast %71 : vector<64x1xf32> to vector<64x128xf32>
    %73 = arith.mulf %58, %72 : vector<64x128xf32>
    %74 = arith.addf %38, %73 : vector<64x128xf32>
    %75 = vector.extract_strided_slice %15 {offsets = [0, 11], sizes = [64, 1], strides = [1, 1]} : vector<64x49xf32> to vector<64x1xf32>
    %76 = vector.broadcast %75 : vector<64x1xf32> to vector<64x128xf32>
    %77 = arith.mulf %58, %76 : vector<64x128xf32>
    %78 = arith.addf %41, %77 : vector<64x128xf32>
    %79 = vector.extract_strided_slice %15 {offsets = [0, 12], sizes = [64, 1], strides = [1, 1]} : vector<64x49xf32> to vector<64x1xf32>
    %80 = vector.broadcast %79 : vector<64x1xf32> to vector<64x128xf32>
    %81 = arith.mulf %58, %80 : vector<64x128xf32>
    %82 = arith.addf %44, %81 : vector<64x128xf32>
    %83 = vector.extract_strided_slice %15 {offsets = [0, 13], sizes = [64, 1], strides = [1, 1]} : vector<64x49xf32> to vector<64x1xf32>
    %84 = vector.broadcast %83 : vector<64x1xf32> to vector<64x128xf32>
    %85 = arith.mulf %58, %84 : vector<64x128xf32>
    %86 = arith.addf %47, %85 : vector<64x128xf32>
    %c8_i32 = arith.constant 8 : i32
    %87 = tpu.dynamic_rotate %11 by %c8_i32 dim 1 : vector<64x128xf32>, i32 -> vector<64x128xf32>
    %cst_22 = arith.constant 1.000000e+00 : f32
    %88 = vector.broadcast %cst_22 : f32 to vector<1x128xf32>
    %89 = arith.cmpf oge, %13, %88 : vector<1x128xf32>
    %cst_23 = arith.constant 8.000000e+00 : f32
    %90 = vector.broadcast %cst_23 : f32 to vector<1x128xf32>
    %91 = arith.cmpf ole, %13, %90 : vector<1x128xf32>
    %92 = arith.andi %89, %91 : vector<1x128xi1>
    %cst_24 = arith.constant 1.000000e+00 : f32
    %cst_25 = arith.constant 0.000000e+00 : f32
    %93 = vector.broadcast %cst_24 : f32 to vector<1x128xf32>
    %94 = vector.broadcast %cst_25 : f32 to vector<1x128xf32>
    %95 = arith.select %92, %93, %94 : vector<1x128xi1>, vector<1x128xf32>
    %96 = vector.broadcast %95 : vector<1x128xf32> to vector<64x128xf32>
    %97 = arith.mulf %87, %96 : vector<64x128xf32>
    %98 = vector.extract_strided_slice %15 {offsets = [0, 14], sizes = [64, 1], strides = [1, 1]} : vector<64x49xf32> to vector<64x1xf32>
    %99 = vector.broadcast %98 : vector<64x1xf32> to vector<64x128xf32>
    %100 = arith.mulf %97, %99 : vector<64x128xf32>
    %101 = arith.addf %62, %100 : vector<64x128xf32>
    %102 = vector.extract_strided_slice %15 {offsets = [0, 15], sizes = [64, 1], strides = [1, 1]} : vector<64x49xf32> to vector<64x1xf32>
    %103 = vector.broadcast %102 : vector<64x1xf32> to vector<64x128xf32>
    %104 = arith.mulf %97, %103 : vector<64x128xf32>
    %105 = arith.addf %66, %104 : vector<64x128xf32>
    %106 = vector.extract_strided_slice %15 {offsets = [0, 16], sizes = [64, 1], strides = [1, 1]} : vector<64x49xf32> to vector<64x1xf32>
    %107 = vector.broadcast %106 : vector<64x1xf32> to vector<64x128xf32>
    %108 = arith.mulf %97, %107 : vector<64x128xf32>
    %109 = arith.addf %70, %108 : vector<64x128xf32>
    %110 = vector.extract_strided_slice %15 {offsets = [0, 17], sizes = [64, 1], strides = [1, 1]} : vector<64x49xf32> to vector<64x1xf32>
    %111 = vector.broadcast %110 : vector<64x1xf32> to vector<64x128xf32>
    %112 = arith.mulf %97, %111 : vector<64x128xf32>
    %113 = arith.addf %74, %112 : vector<64x128xf32>
    %114 = vector.extract_strided_slice %15 {offsets = [0, 18], sizes = [64, 1], strides = [1, 1]} : vector<64x49xf32> to vector<64x1xf32>
    %115 = vector.broadcast %114 : vector<64x1xf32> to vector<64x128xf32>
    %116 = arith.mulf %97, %115 : vector<64x128xf32>
    %117 = arith.addf %78, %116 : vector<64x128xf32>
    %118 = vector.extract_strided_slice %15 {offsets = [0, 19], sizes = [64, 1], strides = [1, 1]} : vector<64x49xf32> to vector<64x1xf32>
    %119 = vector.broadcast %118 : vector<64x1xf32> to vector<64x128xf32>
    %120 = arith.mulf %97, %119 : vector<64x128xf32>
    %121 = arith.addf %82, %120 : vector<64x128xf32>
    %122 = vector.extract_strided_slice %15 {offsets = [0, 20], sizes = [64, 1], strides = [1, 1]} : vector<64x49xf32> to vector<64x1xf32>
    %123 = vector.broadcast %122 : vector<64x1xf32> to vector<64x128xf32>
    %124 = arith.mulf %97, %123 : vector<64x128xf32>
    %125 = arith.addf %86, %124 : vector<64x128xf32>
    %126 = vector.extract_strided_slice %15 {offsets = [0, 21], sizes = [64, 1], strides = [1, 1]} : vector<64x49xf32> to vector<64x1xf32>
    %127 = vector.broadcast %126 : vector<64x1xf32> to vector<64x128xf32>
    %128 = arith.mulf %11, %127 : vector<64x128xf32>
    %129 = arith.addf %101, %128 : vector<64x128xf32>
    %130 = vector.extract_strided_slice %15 {offsets = [0, 22], sizes = [64, 1], strides = [1, 1]} : vector<64x49xf32> to vector<64x1xf32>
    %131 = vector.broadcast %130 : vector<64x1xf32> to vector<64x128xf32>
    %132 = arith.mulf %11, %131 : vector<64x128xf32>
    %133 = arith.addf %105, %132 : vector<64x128xf32>
    %134 = vector.extract_strided_slice %15 {offsets = [0, 23], sizes = [64, 1], strides = [1, 1]} : vector<64x49xf32> to vector<64x1xf32>
    %135 = vector.broadcast %134 : vector<64x1xf32> to vector<64x128xf32>
    %136 = arith.mulf %11, %135 : vector<64x128xf32>
    %137 = arith.addf %109, %136 : vector<64x128xf32>
    %138 = vector.extract_strided_slice %15 {offsets = [0, 24], sizes = [64, 1], strides = [1, 1]} : vector<64x49xf32> to vector<64x1xf32>
    %139 = vector.broadcast %138 : vector<64x1xf32> to vector<64x128xf32>
    %140 = arith.mulf %11, %139 : vector<64x128xf32>
    %141 = arith.addf %113, %140 : vector<64x128xf32>
    %142 = vector.extract_strided_slice %15 {offsets = [0, 25], sizes = [64, 1], strides = [1, 1]} : vector<64x49xf32> to vector<64x1xf32>
    %143 = vector.broadcast %142 : vector<64x1xf32> to vector<64x128xf32>
    %144 = arith.mulf %11, %143 : vector<64x128xf32>
    %145 = arith.addf %117, %144 : vector<64x128xf32>
    %146 = vector.extract_strided_slice %15 {offsets = [0, 26], sizes = [64, 1], strides = [1, 1]} : vector<64x49xf32> to vector<64x1xf32>
    %147 = vector.broadcast %146 : vector<64x1xf32> to vector<64x128xf32>
    %148 = arith.mulf %11, %147 : vector<64x128xf32>
    %149 = arith.addf %121, %148 : vector<64x128xf32>
    %150 = vector.extract_strided_slice %15 {offsets = [0, 27], sizes = [64, 1], strides = [1, 1]} : vector<64x49xf32> to vector<64x1xf32>
    %151 = vector.broadcast %150 : vector<64x1xf32> to vector<64x128xf32>
    %152 = arith.mulf %11, %151 : vector<64x128xf32>
    %153 = arith.addf %125, %152 : vector<64x128xf32>
    %c120_i32 = arith.constant 120 : i32
    %154 = tpu.dynamic_rotate %11 by %c120_i32 dim 1 : vector<64x128xf32>, i32 -> vector<64x128xf32>
    %cst_26 = arith.constant -1.000000e+00 : f32
    %155 = vector.broadcast %cst_26 : f32 to vector<1x128xf32>
    %156 = arith.cmpf oge, %13, %155 : vector<1x128xf32>
    %cst_27 = arith.constant 6.000000e+00 : f32
    %157 = vector.broadcast %cst_27 : f32 to vector<1x128xf32>
    %158 = arith.cmpf ole, %13, %157 : vector<1x128xf32>
    %159 = arith.andi %156, %158 : vector<1x128xi1>
    %cst_28 = arith.constant 1.000000e+00 : f32
    %cst_29 = arith.constant 0.000000e+00 : f32
    %160 = vector.broadcast %cst_28 : f32 to vector<1x128xf32>
    %161 = vector.broadcast %cst_29 : f32 to vector<1x128xf32>
    %162 = arith.select %159, %160, %161 : vector<1x128xi1>, vector<1x128xf32>
    %163 = vector.broadcast %162 : vector<1x128xf32> to vector<64x128xf32>
    %164 = arith.mulf %154, %163 : vector<64x128xf32>
    %165 = vector.extract_strided_slice %15 {offsets = [0, 28], sizes = [64, 1], strides = [1, 1]} : vector<64x49xf32> to vector<64x1xf32>
    %166 = vector.broadcast %165 : vector<64x1xf32> to vector<64x128xf32>
    %167 = arith.mulf %164, %166 : vector<64x128xf32>
    %168 = arith.addf %129, %167 : vector<64x128xf32>
    %169 = vector.extract_strided_slice %15 {offsets = [0, 29], sizes = [64, 1], strides = [1, 1]} : vector<64x49xf32> to vector<64x1xf32>
    %170 = vector.broadcast %169 : vector<64x1xf32> to vector<64x128xf32>
    %171 = arith.mulf %164, %170 : vector<64x128xf32>
    %172 = arith.addf %133, %171 : vector<64x128xf32>
    %173 = vector.extract_strided_slice %15 {offsets = [0, 30], sizes = [64, 1], strides = [1, 1]} : vector<64x49xf32> to vector<64x1xf32>
    %174 = vector.broadcast %173 : vector<64x1xf32> to vector<64x128xf32>
    %175 = arith.mulf %164, %174 : vector<64x128xf32>
    %176 = arith.addf %137, %175 : vector<64x128xf32>
    %177 = vector.extract_strided_slice %15 {offsets = [0, 31], sizes = [64, 1], strides = [1, 1]} : vector<64x49xf32> to vector<64x1xf32>
    %178 = vector.broadcast %177 : vector<64x1xf32> to vector<64x128xf32>
    %179 = arith.mulf %164, %178 : vector<64x128xf32>
    %180 = arith.addf %141, %179 : vector<64x128xf32>
    %181 = vector.extract_strided_slice %15 {offsets = [0, 32], sizes = [64, 1], strides = [1, 1]} : vector<64x49xf32> to vector<64x1xf32>
    %182 = vector.broadcast %181 : vector<64x1xf32> to vector<64x128xf32>
    %183 = arith.mulf %164, %182 : vector<64x128xf32>
    %184 = arith.addf %145, %183 : vector<64x128xf32>
    %185 = vector.extract_strided_slice %15 {offsets = [0, 33], sizes = [64, 1], strides = [1, 1]} : vector<64x49xf32> to vector<64x1xf32>
    %186 = vector.broadcast %185 : vector<64x1xf32> to vector<64x128xf32>
    %187 = arith.mulf %164, %186 : vector<64x128xf32>
    %188 = arith.addf %149, %187 : vector<64x128xf32>
    %189 = vector.extract_strided_slice %15 {offsets = [0, 34], sizes = [64, 1], strides = [1, 1]} : vector<64x49xf32> to vector<64x1xf32>
    %190 = vector.broadcast %189 : vector<64x1xf32> to vector<64x128xf32>
    %191 = arith.mulf %164, %190 : vector<64x128xf32>
    %192 = arith.addf %153, %191 : vector<64x128xf32>
    %c112_i32 = arith.constant 112 : i32
    %193 = tpu.dynamic_rotate %11 by %c112_i32 dim 1 : vector<64x128xf32>, i32 -> vector<64x128xf32>
    %cst_30 = arith.constant -2.000000e+00 : f32
    %194 = vector.broadcast %cst_30 : f32 to vector<1x128xf32>
    %195 = arith.cmpf oge, %13, %194 : vector<1x128xf32>
    %cst_31 = arith.constant 5.000000e+00 : f32
    %196 = vector.broadcast %cst_31 : f32 to vector<1x128xf32>
    %197 = arith.cmpf ole, %13, %196 : vector<1x128xf32>
    %198 = arith.andi %195, %197 : vector<1x128xi1>
    %cst_32 = arith.constant 1.000000e+00 : f32
    %cst_33 = arith.constant 0.000000e+00 : f32
    %199 = vector.broadcast %cst_32 : f32 to vector<1x128xf32>
    %200 = vector.broadcast %cst_33 : f32 to vector<1x128xf32>
    %201 = arith.select %198, %199, %200 : vector<1x128xi1>, vector<1x128xf32>
    %202 = vector.broadcast %201 : vector<1x128xf32> to vector<64x128xf32>
    %203 = arith.mulf %193, %202 : vector<64x128xf32>
    %204 = vector.extract_strided_slice %15 {offsets = [0, 35], sizes = [64, 1], strides = [1, 1]} : vector<64x49xf32> to vector<64x1xf32>
    %205 = vector.broadcast %204 : vector<64x1xf32> to vector<64x128xf32>
    %206 = arith.mulf %203, %205 : vector<64x128xf32>
    %207 = arith.addf %168, %206 : vector<64x128xf32>
    %208 = vector.extract_strided_slice %15 {offsets = [0, 36], sizes = [64, 1], strides = [1, 1]} : vector<64x49xf32> to vector<64x1xf32>
    %209 = vector.broadcast %208 : vector<64x1xf32> to vector<64x128xf32>
    %210 = arith.mulf %203, %209 : vector<64x128xf32>
    %211 = arith.addf %172, %210 : vector<64x128xf32>
    %212 = vector.extract_strided_slice %15 {offsets = [0, 37], sizes = [64, 1], strides = [1, 1]} : vector<64x49xf32> to vector<64x1xf32>
    %213 = vector.broadcast %212 : vector<64x1xf32> to vector<64x128xf32>
    %214 = arith.mulf %203, %213 : vector<64x128xf32>
    %215 = arith.addf %176, %214 : vector<64x128xf32>
    %216 = vector.extract_strided_slice %15 {offsets = [0, 38], sizes = [64, 1], strides = [1, 1]} : vector<64x49xf32> to vector<64x1xf32>
    %217 = vector.broadcast %216 : vector<64x1xf32> to vector<64x128xf32>
    %218 = arith.mulf %203, %217 : vector<64x128xf32>
    %219 = arith.addf %180, %218 : vector<64x128xf32>
    %220 = vector.extract_strided_slice %15 {offsets = [0, 39], sizes = [64, 1], strides = [1, 1]} : vector<64x49xf32> to vector<64x1xf32>
    %221 = vector.broadcast %220 : vector<64x1xf32> to vector<64x128xf32>
    %222 = arith.mulf %203, %221 : vector<64x128xf32>
    %223 = arith.addf %184, %222 : vector<64x128xf32>
    %224 = vector.extract_strided_slice %15 {offsets = [0, 40], sizes = [64, 1], strides = [1, 1]} : vector<64x49xf32> to vector<64x1xf32>
    %225 = vector.broadcast %224 : vector<64x1xf32> to vector<64x128xf32>
    %226 = arith.mulf %203, %225 : vector<64x128xf32>
    %227 = arith.addf %188, %226 : vector<64x128xf32>
    %228 = vector.extract_strided_slice %15 {offsets = [0, 41], sizes = [64, 1], strides = [1, 1]} : vector<64x49xf32> to vector<64x1xf32>
    %229 = vector.broadcast %228 : vector<64x1xf32> to vector<64x128xf32>
    %230 = arith.mulf %203, %229 : vector<64x128xf32>
    %231 = arith.addf %192, %230 : vector<64x128xf32>
    %c104_i32 = arith.constant 104 : i32
    %232 = tpu.dynamic_rotate %11 by %c104_i32 dim 1 : vector<64x128xf32>, i32 -> vector<64x128xf32>
    %cst_34 = arith.constant -3.000000e+00 : f32
    %233 = vector.broadcast %cst_34 : f32 to vector<1x128xf32>
    %234 = arith.cmpf oge, %13, %233 : vector<1x128xf32>
    %cst_35 = arith.constant 4.000000e+00 : f32
    %235 = vector.broadcast %cst_35 : f32 to vector<1x128xf32>
    %236 = arith.cmpf ole, %13, %235 : vector<1x128xf32>
    %237 = arith.andi %234, %236 : vector<1x128xi1>
    %cst_36 = arith.constant 1.000000e+00 : f32
    %cst_37 = arith.constant 0.000000e+00 : f32
    %238 = vector.broadcast %cst_36 : f32 to vector<1x128xf32>
    %239 = vector.broadcast %cst_37 : f32 to vector<1x128xf32>
    %240 = arith.select %237, %238, %239 : vector<1x128xi1>, vector<1x128xf32>
    %241 = vector.broadcast %240 : vector<1x128xf32> to vector<64x128xf32>
    %242 = arith.mulf %232, %241 : vector<64x128xf32>
    %243 = vector.extract_strided_slice %15 {offsets = [0, 42], sizes = [64, 1], strides = [1, 1]} : vector<64x49xf32> to vector<64x1xf32>
    %244 = vector.broadcast %243 : vector<64x1xf32> to vector<64x128xf32>
    %245 = arith.mulf %242, %244 : vector<64x128xf32>
    %246 = arith.addf %207, %245 : vector<64x128xf32>
    %247 = vector.extract_strided_slice %15 {offsets = [0, 43], sizes = [64, 1], strides = [1, 1]} : vector<64x49xf32> to vector<64x1xf32>
    %248 = vector.broadcast %247 : vector<64x1xf32> to vector<64x128xf32>
    %249 = arith.mulf %242, %248 : vector<64x128xf32>
    %250 = arith.addf %211, %249 : vector<64x128xf32>
    %251 = vector.extract_strided_slice %15 {offsets = [0, 44], sizes = [64, 1], strides = [1, 1]} : vector<64x49xf32> to vector<64x1xf32>
    %252 = vector.broadcast %251 : vector<64x1xf32> to vector<64x128xf32>
    %253 = arith.mulf %242, %252 : vector<64x128xf32>
    %254 = arith.addf %215, %253 : vector<64x128xf32>
    %255 = vector.extract_strided_slice %15 {offsets = [0, 45], sizes = [64, 1], strides = [1, 1]} : vector<64x49xf32> to vector<64x1xf32>
    %256 = vector.broadcast %255 : vector<64x1xf32> to vector<64x128xf32>
    %257 = arith.mulf %242, %256 : vector<64x128xf32>
    %258 = arith.addf %219, %257 : vector<64x128xf32>
    %259 = vector.extract_strided_slice %15 {offsets = [0, 46], sizes = [64, 1], strides = [1, 1]} : vector<64x49xf32> to vector<64x1xf32>
    %260 = vector.broadcast %259 : vector<64x1xf32> to vector<64x128xf32>
    %261 = arith.mulf %242, %260 : vector<64x128xf32>
    %262 = arith.addf %223, %261 : vector<64x128xf32>
    %263 = vector.extract_strided_slice %15 {offsets = [0, 47], sizes = [64, 1], strides = [1, 1]} : vector<64x49xf32> to vector<64x1xf32>
    %264 = vector.broadcast %263 : vector<64x1xf32> to vector<64x128xf32>
    %265 = arith.mulf %242, %264 : vector<64x128xf32>
    %266 = arith.addf %227, %265 : vector<64x128xf32>
    %267 = vector.extract_strided_slice %15 {offsets = [0, 48], sizes = [64, 1], strides = [1, 1]} : vector<64x49xf32> to vector<64x1xf32>
    %268 = vector.broadcast %267 : vector<64x1xf32> to vector<64x128xf32>
    %269 = arith.mulf %242, %268 : vector<64x128xf32>
    %270 = arith.addf %231, %269 : vector<64x128xf32>
    %c3_i32 = arith.constant 3 : i32
    %271 = tpu.dynamic_rotate %246 by %c3_i32 dim 1 : vector<64x128xf32>, i32 -> vector<64x128xf32>
    %cst_38 = arith.constant 3.000000e+00 : f32
    %272 = vector.broadcast %cst_38 : f32 to vector<1x128xf32>
    %273 = arith.cmpf oge, %14, %272 : vector<1x128xf32>
    %cst_39 = arith.constant 1.000000e+01 : f32
    %274 = vector.broadcast %cst_39 : f32 to vector<1x128xf32>
    %275 = arith.cmpf ole, %14, %274 : vector<1x128xf32>
    %276 = arith.andi %273, %275 : vector<1x128xi1>
    %cst_40 = arith.constant 1.000000e+00 : f32
    %cst_41 = arith.constant 0.000000e+00 : f32
    %277 = vector.broadcast %cst_40 : f32 to vector<1x128xf32>
    %278 = vector.broadcast %cst_41 : f32 to vector<1x128xf32>
    %279 = arith.select %276, %277, %278 : vector<1x128xi1>, vector<1x128xf32>
    %280 = vector.broadcast %279 : vector<1x128xf32> to vector<64x128xf32>
    %281 = arith.mulf %271, %280 : vector<64x128xf32>
    %c2_i32 = arith.constant 2 : i32
    %282 = tpu.dynamic_rotate %250 by %c2_i32 dim 1 : vector<64x128xf32>, i32 -> vector<64x128xf32>
    %cst_42 = arith.constant 2.000000e+00 : f32
    %283 = vector.broadcast %cst_42 : f32 to vector<1x128xf32>
    %284 = arith.cmpf oge, %14, %283 : vector<1x128xf32>
    %cst_43 = arith.constant 9.000000e+00 : f32
    %285 = vector.broadcast %cst_43 : f32 to vector<1x128xf32>
    %286 = arith.cmpf ole, %14, %285 : vector<1x128xf32>
    %287 = arith.andi %284, %286 : vector<1x128xi1>
    %cst_44 = arith.constant 1.000000e+00 : f32
    %cst_45 = arith.constant 0.000000e+00 : f32
    %288 = vector.broadcast %cst_44 : f32 to vector<1x128xf32>
    %289 = vector.broadcast %cst_45 : f32 to vector<1x128xf32>
    %290 = arith.select %287, %288, %289 : vector<1x128xi1>, vector<1x128xf32>
    %291 = vector.broadcast %290 : vector<1x128xf32> to vector<64x128xf32>
    %292 = arith.mulf %282, %291 : vector<64x128xf32>
    %293 = arith.addf %281, %292 : vector<64x128xf32>
    %c1_i32 = arith.constant 1 : i32
    %294 = tpu.dynamic_rotate %254 by %c1_i32 dim 1 : vector<64x128xf32>, i32 -> vector<64x128xf32>
    %cst_46 = arith.constant 1.000000e+00 : f32
    %295 = vector.broadcast %cst_46 : f32 to vector<1x128xf32>
    %296 = arith.cmpf oge, %14, %295 : vector<1x128xf32>
    %cst_47 = arith.constant 8.000000e+00 : f32
    %297 = vector.broadcast %cst_47 : f32 to vector<1x128xf32>
    %298 = arith.cmpf ole, %14, %297 : vector<1x128xf32>
    %299 = arith.andi %296, %298 : vector<1x128xi1>
    %cst_48 = arith.constant 1.000000e+00 : f32
    %cst_49 = arith.constant 0.000000e+00 : f32
    %300 = vector.broadcast %cst_48 : f32 to vector<1x128xf32>
    %301 = vector.broadcast %cst_49 : f32 to vector<1x128xf32>
    %302 = arith.select %299, %300, %301 : vector<1x128xi1>, vector<1x128xf32>
    %303 = vector.broadcast %302 : vector<1x128xf32> to vector<64x128xf32>
    %304 = arith.mulf %294, %303 : vector<64x128xf32>
    %305 = arith.addf %293, %304 : vector<64x128xf32>
    %306 = arith.addf %305, %258 : vector<64x128xf32>
    %c127_i32 = arith.constant 127 : i32
    %307 = tpu.dynamic_rotate %262 by %c127_i32 dim 1 : vector<64x128xf32>, i32 -> vector<64x128xf32>
    %cst_50 = arith.constant -1.000000e+00 : f32
    %308 = vector.broadcast %cst_50 : f32 to vector<1x128xf32>
    %309 = arith.cmpf oge, %14, %308 : vector<1x128xf32>
    %cst_51 = arith.constant 6.000000e+00 : f32
    %310 = vector.broadcast %cst_51 : f32 to vector<1x128xf32>
    %311 = arith.cmpf ole, %14, %310 : vector<1x128xf32>
    %312 = arith.andi %309, %311 : vector<1x128xi1>
    %cst_52 = arith.constant 1.000000e+00 : f32
    %cst_53 = arith.constant 0.000000e+00 : f32
    %313 = vector.broadcast %cst_52 : f32 to vector<1x128xf32>
    %314 = vector.broadcast %cst_53 : f32 to vector<1x128xf32>
    %315 = arith.select %312, %313, %314 : vector<1x128xi1>, vector<1x128xf32>
    %316 = vector.broadcast %315 : vector<1x128xf32> to vector<64x128xf32>
    %317 = arith.mulf %307, %316 : vector<64x128xf32>
    %318 = arith.addf %306, %317 : vector<64x128xf32>
    %c126_i32 = arith.constant 126 : i32
    %319 = tpu.dynamic_rotate %266 by %c126_i32 dim 1 : vector<64x128xf32>, i32 -> vector<64x128xf32>
    %cst_54 = arith.constant -2.000000e+00 : f32
    %320 = vector.broadcast %cst_54 : f32 to vector<1x128xf32>
    %321 = arith.cmpf oge, %14, %320 : vector<1x128xf32>
    %cst_55 = arith.constant 5.000000e+00 : f32
    %322 = vector.broadcast %cst_55 : f32 to vector<1x128xf32>
    %323 = arith.cmpf ole, %14, %322 : vector<1x128xf32>
    %324 = arith.andi %321, %323 : vector<1x128xi1>
    %cst_56 = arith.constant 1.000000e+00 : f32
    %cst_57 = arith.constant 0.000000e+00 : f32
    %325 = vector.broadcast %cst_56 : f32 to vector<1x128xf32>
    %326 = vector.broadcast %cst_57 : f32 to vector<1x128xf32>
    %327 = arith.select %324, %325, %326 : vector<1x128xi1>, vector<1x128xf32>
    %328 = vector.broadcast %327 : vector<1x128xf32> to vector<64x128xf32>
    %329 = arith.mulf %319, %328 : vector<64x128xf32>
    %330 = arith.addf %318, %329 : vector<64x128xf32>
    %c125_i32 = arith.constant 125 : i32
    %331 = tpu.dynamic_rotate %270 by %c125_i32 dim 1 : vector<64x128xf32>, i32 -> vector<64x128xf32>
    %cst_58 = arith.constant -3.000000e+00 : f32
    %332 = vector.broadcast %cst_58 : f32 to vector<1x128xf32>
    %333 = arith.cmpf oge, %14, %332 : vector<1x128xf32>
    %cst_59 = arith.constant 4.000000e+00 : f32
    %334 = vector.broadcast %cst_59 : f32 to vector<1x128xf32>
    %335 = arith.cmpf ole, %14, %334 : vector<1x128xf32>
    %336 = arith.andi %333, %335 : vector<1x128xi1>
    %cst_60 = arith.constant 1.000000e+00 : f32
    %cst_61 = arith.constant 0.000000e+00 : f32
    %337 = vector.broadcast %cst_60 : f32 to vector<1x128xf32>
    %338 = vector.broadcast %cst_61 : f32 to vector<1x128xf32>
    %339 = arith.select %336, %337, %338 : vector<1x128xi1>, vector<1x128xf32>
    %340 = vector.broadcast %339 : vector<1x128xf32> to vector<64x128xf32>
    %341 = arith.mulf %331, %340 : vector<64x128xf32>
    %342 = arith.addf %330, %341 : vector<64x128xf32>
    %c0_62 = arith.constant 0 : index
    %c0_63 = arith.constant 0 : index
    %343 = vector.load %arg8[%c0_62, %c0_63] : memref<64x1xf32, #tpu.memory_space<vmem>>, vector<64x1xf32>
    %344 = vector.broadcast %343 : vector<64x1xf32> to vector<64x128xf32>
    %345 = arith.addf %342, %344 : vector<64x128xf32>
    %c0_64 = arith.constant 0 : index
    %c0_65 = arith.constant 0 : index
    %346 = vector.load %arg9[%c0_64, %c0_65] : memref<64x64xbf16, #tpu.memory_space<vmem>>, vector<64x64xbf16>
    %347 = arith.truncf %345 : vector<64x128xf32> to vector<64x128xbf16>
    %cst_66 = arith.constant dense<0.000000e+00> : vector<64x128xf32>
    %348 = tpu.matmul %346, %347, %cst_66 {dimension_numbers = #tpu.dot_dimension_numbers<[1], [0], [0], [1], [0, 0, 1, 1], [], []>} : vector<64x64xbf16>, vector<64x128xbf16>, vector<64x128xf32> -> vector<64x128xf32>
    %c0_67 = arith.constant 0 : index
    %c0_68 = arith.constant 0 : index
    %349 = vector.load %arg10[%c0_67, %c0_68] : memref<64x1xf32, #tpu.memory_space<vmem>>, vector<64x1xf32>
    %350 = vector.broadcast %349 : vector<64x1xf32> to vector<64x128xf32>
    %351 = arith.addf %348, %350 : vector<64x128xf32>
    %cst_69 = arith.constant 5.000000e-01 : f32
    %352 = vector.broadcast %cst_69 : f32 to vector<64x128xf32>
    %353 = arith.mulf %352, %351 : vector<64x128xf32>
    %cst_70 = arith.constant 0.707106769 : f32
    %354 = vector.broadcast %cst_70 : f32 to vector<64x128xf32>
    %355 = arith.mulf %351, %354 : vector<64x128xf32>
    %cst_71 = arith.constant 0.000000e+00 : f32
    %356 = vector.broadcast %cst_71 : f32 to vector<64x128xf32>
    %357 = arith.cmpf oge, %355, %356 : vector<64x128xf32>
    %cst_72 = arith.constant 1.000000e+00 : f32
    %cst_73 = arith.constant -1.000000e+00 : f32
    %358 = vector.broadcast %cst_72 : f32 to vector<64x128xf32>
    %359 = vector.broadcast %cst_73 : f32 to vector<64x128xf32>
    %360 = arith.select %357, %358, %359 : vector<64x128xi1>, vector<64x128xf32>
    %361 = math.absf %355 : vector<64x128xf32>
    %cst_74 = arith.constant 0.327591091 : f32
    %362 = vector.broadcast %cst_74 : f32 to vector<64x128xf32>
    %363 = arith.mulf %362, %361 : vector<64x128xf32>
    %cst_75 = arith.constant 1.000000e+00 : f32
    %364 = vector.broadcast %cst_75 : f32 to vector<64x128xf32>
    %365 = arith.addf %364, %363 : vector<64x128xf32>
    %cst_76 = arith.constant 1.000000e+00 : f32
    %366 = vector.broadcast %cst_76 : f32 to vector<64x128xf32>
    %367 = arith.divf %366, %365 : vector<64x128xf32>
    %cst_77 = arith.constant 1.06140542 : f32
    %368 = vector.broadcast %cst_77 : f32 to vector<64x128xf32>
    %369 = arith.mulf %368, %367 : vector<64x128xf32>
    %cst_78 = arith.constant -1.45315206 : f32
    %370 = vector.broadcast %cst_78 : f32 to vector<64x128xf32>
    %371 = arith.addf %369, %370 : vector<64x128xf32>
    %372 = arith.mulf %371, %367 : vector<64x128xf32>
    %cst_79 = arith.constant 1.42141378 : f32
    %373 = vector.broadcast %cst_79 : f32 to vector<64x128xf32>
    %374 = arith.addf %372, %373 : vector<64x128xf32>
    %375 = arith.mulf %374, %367 : vector<64x128xf32>
    %cst_80 = arith.constant -0.284496725 : f32
    %376 = vector.broadcast %cst_80 : f32 to vector<64x128xf32>
    %377 = arith.addf %375, %376 : vector<64x128xf32>
    %378 = arith.mulf %377, %367 : vector<64x128xf32>
    %cst_81 = arith.constant 0.254829586 : f32
    %379 = vector.broadcast %cst_81 : f32 to vector<64x128xf32>
    %380 = arith.addf %378, %379 : vector<64x128xf32>
    %381 = arith.mulf %380, %367 : vector<64x128xf32>
    %cst_82 = arith.constant 0.000000e+00 : f32
    %382 = vector.broadcast %cst_82 : f32 to vector<64x128xf32>
    %383 = arith.subf %382, %361 : vector<64x128xf32>
    %384 = arith.mulf %383, %361 : vector<64x128xf32>
    %385 = math.exp %384 : vector<64x128xf32>
    %386 = arith.mulf %381, %385 : vector<64x128xf32>
    %cst_83 = arith.constant 1.000000e+00 : f32
    %387 = vector.broadcast %cst_83 : f32 to vector<64x128xf32>
    %388 = arith.subf %387, %386 : vector<64x128xf32>
    %389 = arith.mulf %360, %388 : vector<64x128xf32>
    %cst_84 = arith.constant 1.000000e+00 : f32
    %390 = vector.broadcast %cst_84 : f32 to vector<64x128xf32>
    %391 = arith.addf %390, %389 : vector<64x128xf32>
    %392 = arith.mulf %353, %391 : vector<64x128xf32>
    %c0_85 = arith.constant 0 : index
    %c0_86 = arith.constant 0 : index
    %393 = vector.load %arg11[%c0_85, %c0_86] : memref<32x64xbf16, #tpu.memory_space<vmem>>, vector<32x64xbf16>
    %394 = arith.truncf %392 : vector<64x128xf32> to vector<64x128xbf16>
    %cst_87 = arith.constant dense<0.000000e+00> : vector<32x128xf32>
    %395 = tpu.matmul %393, %394, %cst_87 {dimension_numbers = #tpu.dot_dimension_numbers<[1], [0], [0], [1], [0, 0, 1, 1], [], []>} : vector<32x64xbf16>, vector<64x128xbf16>, vector<32x128xf32> -> vector<32x128xf32>
    %c0_88 = arith.constant 0 : index
    %c0_89 = arith.constant 0 : index
    %396 = vector.load %arg12[%c0_88, %c0_89] : memref<32x1xf32, #tpu.memory_space<vmem>>, vector<32x1xf32>
    %397 = vector.broadcast %396 : vector<32x1xf32> to vector<32x128xf32>
    %398 = arith.addf %395, %397 : vector<32x128xf32>
    %c0_90 = arith.constant 0 : index
    %c0_91 = arith.constant 0 : index
    %399 = vector.load %arg13[%c0_90, %c0_91] : memref<32x128xf32, #tpu.memory_space<vmem>>, vector<32x128xf32>
    tpu.vector_store %arg13[%c0_90, %c0_91], %398 {strides = array<i32>} : memref<32x128xf32, #tpu.memory_space<vmem>>, vector<32x128xf32>,
    return
  }
  func.func @transform_0(%arg0: i32) -> (i32, i32) {
    %c0_i32 = arith.constant 0 : i32
    %c0_i32_0 = arith.constant 0 : i32
    %c0_i32_1 = arith.constant 0 : i32
    return %c0_i32, %c0_i32_0 : i32, i32
  }
  func.func @transform_1(%arg0: i32) -> (i32, i32) {
    %c0_i32 = arith.constant 0 : i32
    %c0_i32_0 = arith.constant 0 : i32
    %c0_i32_1 = arith.constant 0 : i32
    return %c0_i32, %c0_i32_0 : i32, i32
  }
  func.func @transform_2(%arg0: i32) -> (i32, i32) {
    %c0_i32 = arith.constant 0 : i32
    %c0_i32_0 = arith.constant 0 : i32
    %c0_i32_1 = arith.constant 0 : i32
    return %c0_i32, %c0_i32_0 : i32, i32
  }
  func.func @transform_3(%arg0: i32) -> (i32, i32) {
    %c0_i32 = arith.constant 0 : i32
    %c0_i32_0 = arith.constant 0 : i32
    %c0_i32_1 = arith.constant 0 : i32
    return %c0_i32, %c0_i32_0 : i32, i32
  }
  func.func @transform_4(%arg0: i32) -> (i32, i32) {
    %c0_i32 = arith.constant 0 : i32
    %c0_i32_0 = arith.constant 0 : i32
    %c0_i32_1 = arith.constant 0 : i32
    return %c0_i32, %c0_i32_0 : i32, i32
  }
  func.func @transform_5(%arg0: i32) -> (i32, i32) {
    %c0_i32 = arith.constant 0 : i32
    %c0_i32_0 = arith.constant 0 : i32
    %c0_i32_1 = arith.constant 0 : i32
    return %c0_i32, %c0_i32_0 : i32, i32
  }
  func.func @transform_6(%arg0: i32) -> (i32, i32) {
    %c0_i32 = arith.constant 0 : i32
    %c0_i32_0 = arith.constant 0 : i32
    %c0_i32_1 = arith.constant 0 : i32
    return %c0_i32, %c0_i32_0 : i32, i32
  }
  func.func @transform_7(%arg0: i32) -> (i32, i32) {
    %c0_i32 = arith.constant 0 : i32
    %c0_i32_0 = arith.constant 0 : i32
    %c0_i32_1 = arith.constant 0 : i32
    return %c0_i32, %c0_i32_0 : i32, i32
  }
  func.func @transform_8(%arg0: i32) -> (i32, i32) {
    %c0_i32 = arith.constant 0 : i32
    %c0_i32_0 = arith.constant 0 : i32
    %c0_i32_1 = arith.constant 0 : i32
    return %c0_i32, %c0_i32_0 : i32, i32
  }
  func.func @transform_9(%arg0: i32) -> (i32, i32) {
    %c0_i32 = arith.constant 0 : i32
    %c0_i32_0 = arith.constant 0 : i32
    %c0_i32_1 = arith.constant 0 : i32
    return %c0_i32, %c0_i32_0 : i32, i32
  }
  func.func @transform_10(%arg0: i32) -> (i32, i32) {
    %c0_i32 = arith.constant 0 : i32
    %c0_i32_0 = arith.constant 0 : i32
    %c0_i32_1 = arith.constant 0 : i32
    return %c0_i32, %c0_i32_0 : i32, i32
  }
  func.func @transform_11(%arg0: i32) -> (i32, i32) {
    %c0_i32 = arith.constant 0 : i32
    %c0_i32_0 = arith.constant 0 : i32
    %c0_i32_1 = arith.constant 0 : i32
    return %c0_i32, %c0_i32_0 : i32, i32
  }
  func.func @transform_12(%arg0: i32) -> (i32, i32) {
    %c0_i32 = arith.constant 0 : i32
    %c0_i32_0 = arith.constant 0 : i32
    %c0_i32_1 = arith.constant 0 : i32
    return %c0_i32, %c0_i32_0 : i32, i32
  }
}

</mosaic_0001>

<bundles_post_ra>
// kernel: tpu_custom_call.1
= control target key start
LH: loop header
LB: loop body
LE: loop exit
PB: predicated region body
PF: predicated region fallthrough
CT: control target
= control target key end

     0   :  { %v7507_v3 = vmov 0   ;;  %s7494_s0 = inlined_call_operand.vmem [shape: bf16[32,128], index: 0, kind: input, shape index: {}]   ;;  %s7495_s1 = inlined_call_operand.vmem [shape: f32[2,128], index: 1, kind: input, shape index: {}]   ;;  %s7496_s2 = inlined_call_operand.vmem [shape: bf16[64,32], index: 2, kind: input, shape index: {}]   ;;  %s7497_s3 = inlined_call_operand.vmem [shape: f32[64,1], index: 3, kind: input, shape index: {}]   ;;  %s7498_s4 = inlined_call_operand.vmem [shape: bf16[64,64], index: 4, kind: input, shape index: {}]   ;;  %s7499_s5 = inlined_call_operand.vmem [shape: f32[64,1], index: 5, kind: input, shape index: {}]   ;;  %s7500_s6 = inlined_call_operand.vmem [shape: f32[64,49], index: 6, kind: input, shape index: {}]   ;;  %s7501_s7 = inlined_call_operand.vmem [shape: f32[64,1], index: 7, kind: input, shape index: {}]   ;;  %s7502_s8 = inlined_call_operand.vmem [shape: bf16[64,64], index: 8, kind: input, shape index: {}]   ;;  %s7503_s9 = inlined_call_operand.vmem [shape: f32[64,1], index: 9, kind: input, shape index: {}]   ;;  %s7504_s10 = inlined_call_operand.vmem [shape: bf16[32,64], index: 10, kind: input, shape index: {}]   ;;  %s7505_s11 = inlined_call_operand.vmem [shape: f32[32,1], index: 11, kind: input, shape index: {}]   ;;  %s7506_s12 = inlined_call_operand.hbm [shape: f32[32,128], index: 12, kind: output, shape index: {}]  }
   0x1   :  { %v59_v0 = vld [vmem:[%s7497_s3 + $0x20] sm:$0xff]  ;;  %v57_v1 = vld [vmem:[%s7497_s3 + $0x10] sm:$0xff]  ;;  %v3653_v2 = vld [vmem:[%s7494_s0 + $0x8] sm:$0xff]  ;;  %3731 = vset.pattern.permute.xlu2 %v7507_v3  ;;  %3730 = vset.pattern.permute.xlu1 %v7507_v3 }
   0x2   :  { %v55_v4 = vld [vmem:[%s7497_s3] sm:$0xff]  ;;  %85 = vperm.xlu2 %3731, %v59_v0   ;;  %75 = vperm.xlu1 %3730, %v57_v1  }
   0x3   :  { %154 = vmatpush.bf16.msra.mxu0 %v3653_v2  ;;  %3729 = vset.pattern.permute.xlu0 %v7507_v3  ;;  %v3652_v5 = vld [vmem:[%s7494_s0] sm:$0xff] }
   0x4   :  { %65 = vperm.xlu0 %3729, %v55_v4  }
   0x5   :  { %17 = vsyncpa [#allocation3], 0  ;;  %v60_v6 = vld [vmem:[%s7497_s3 + $0x28] sm:$0xff]  ;;  %v58_v7 = vld [vmem:[%s7497_s3 + $0x18] sm:$0xff]  ;;  %vm135_vm0 = vcmask 261120   ;;  %v3978_v30 = vmov 1  }
   0x6   :  { %v3648_v8 = vld [vmem:[%s7496_s2] sm:$0xff]  ;;  %v56_v9 = vld [vmem:[%s7497_s3 + $0x8] sm:$0xff]  ;;  %v62_v11 = vld [vmem:[%s7497_s3 + $0x38] sm:$0xff]  ;;  %v3979_v32 = vmov 2   ;;  %v3980_v35 = vmov 3   ;;  %v3981_v41 = vmov 4  }
   0x7   :  { %155 = vmatpush.bf16.msra.mxu0 %v3652_v5  ;;  %v189_v10 = vld [vmem:[%s7499_s5] sm:$0xff]  ;;  %v61_v12 = vld [vmem:[%s7497_s3 + $0x30] sm:$0xff]  ;;  %v192_v13 = vld [vmem:[%s7499_s5 + $0x18] sm:$0xff]  ;;  %v3982_v48 = vmov 5   ;;  %v3983_v55 = vmov 6   ;;  %v3984_v0 = vmov 7  }
   0x8   :  { %v191_v14 = vld [vmem:[%s7499_s5 + $0x10] sm:$0xff]  ;;  %v3649_v15 = vld [vmem:[%s7496_s2 + $0x8] sm:$0xff]  ;;  %v193_v19 = vld [vmem:[%s7499_s5 + $0x20] sm:$0xff]  ;;  %vm257_vm1 = vcmask 523264   ;;  %s3991_s28 = smov 24   ;;  %s3993_s29 = smov 8  }
   0x9   :  { %v190_v16 = vld [vmem:[%s7499_s5 + $0x8] sm:$0xff]  ;;  %v195_v17 = vld [vmem:[%s7499_s5 + $0x30] sm:$0xff]  ;;  %v196_v23 = vld [vmem:[%s7499_s5 + $0x38] sm:$0xff]  ;;  %s4009_s26 = smov 120   ;;  %s4017_s27 = smov 112  }
   0xa   :  { %90 = vperm.xlu2 %3731, %v60_v6   ;;  %80 = vperm.xlu1 %3730, %v58_v7   ;;  %v194_v18 = vld [vmem:[%s7499_s5 + $0x28] sm:$0xff]  ;;  %v4172_v20 = vld [vmem:[%s7500_s6 + $0x10] sm:$0xff]  ;;  %v4196_v25 = vld [vmem:[%s7500_s6 + $0x20] sm:$0xff]  ;;  %s4033_s24 = smov 2   ;;  %s4034_s25 = smov 1  }
   0xb   :  { %3594 = vmatmul.msk.bf16.vlgmr.msra.gmra.mxu0 %vm135_vm0, %v3648_v8  ;;  %v4177_v21 = vld [vmem:[%s7500_s6 + $0x8] sm:$0xff]  ;;  %v3650_v22 = vld [vmem:[%s7496_s2 + $0x10] sm:$0xff]  ;;  %v4201_v26 = vld [vmem:[%s7500_s6] sm:$0xff]  ;;  %s4038_s16 = smov 125   ;;  %s3558_s20 = sshll.u32 %s7506_s12, 4  ;;  %s3559_s20 = int_to_ptr.hbm [resolvable:$true] %s3558_s20 }
   0xc   :  { %70 = vperm.xlu0 %3729, %v56_v9   ;;  %v4191_v24 = vld [vmem:[%s7500_s6 + $0x28] sm:$0xff]  ;;  %v4209_v27 = vld [vmem:[%s7500_s6 + $0x38] sm:$0xff]  ;;  %v4226_v31 = vld [vmem:[%s7500_s6 + $0x30] sm:$0xff]  ;;  %s4040_s0 = smov [#allocation2]  }
   0xd   :  { %v3651_v28 = vld [vmem:[%s7496_s2 + $0x18] sm:$0xff]  ;;  %s4041_s2 = smov 128  }
   0xe   :  { %v4217_v29 = vld [vmem:[%s7500_s6 + $0x18] sm:$0xff] }
  0x12   :  { %199 = vperm.xlu2 %3731, %v189_v10   ;;  %100 = vperm.xlu1 %3730, %v62_v11  }
  0x14   :  { %95 = vperm.xlu0 %3729, %v61_v12  }
  0x1a   :  { %214 = vperm.xlu2 %3731, %v192_v13   ;;  %209 = vperm.xlu1 %3730, %v191_v14  }
  0x1b   :  { %3595 = vmatmul.msk.bf16.gmra.mxu0 %vm135_vm0, %v3649_v15 }
  0x1c   :  { %204 = vperm.xlu0 %3729, %v190_v16  }
  0x22   :  { %229 = vperm.xlu2 %3731, %v195_v17   ;;  %224 = vperm.xlu1 %3730, %v194_v18  }
  0x24   :  { %219 = vperm.xlu0 %3729, %v193_v19  }
  0x2a   :  { %349 = vperm.xlu2 %3731, %v4172_v20   ;;  %344 = vperm.xlu1 %3730, %v4177_v21  }
  0x2b   :  { %3596 = vmatmul.msk.bf16.gmra.mxu0 %vm135_vm0, %v3650_v22  ;;  %v3985_v22 = vmov 8  }
  0x2c   :  { %234 = vperm.xlu0 %3729, %v196_v23  }
  0x32   :  { %364 = vperm.xlu2 %3731, %v4191_v24   ;;  %359 = vperm.xlu1 %3730, %v4196_v25  }
  0x34   :  { %339 = vperm.xlu0 %3729, %v4201_v26  }
  0x3a   :  { %3732 = vset.pattern.permute.xlu2 %v3978_v30  ;;  %374 = vperm.xlu1 %3730, %v4209_v27  }
  0x3b   :  { %3597 = vmatmul.msk.bf16.gmra.mxu0 %vm135_vm0, %v3651_v28  ;;  %386 = vperm.xlu2 %3732, %v4201_v26  }
  0x3c   :  { %354 = vperm.xlu0 %3729, %v4217_v29  }
  0x42   :  { %3734 = vset.pattern.permute.xlu1 %v3978_v30 }
  0x43   :  { %398 = vperm.xlu2 %3732, %v4217_v29   ;;  %394 = vperm.xlu1 %3734, %v4172_v20  }
  0x44   :  { %369 = vperm.xlu0 %3729, %v4226_v31  }
  0x4b   :  { %406 = vperm.xlu2 %3732, %v4191_v24   ;;  %402 = vperm.xlu1 %3734, %v4196_v25  }
  0x4c   :  { %3733 = vset.pattern.permute.xlu0 %v3978_v30 }
  0x4d   :  { %390 = vperm.xlu0 %3733, %v4177_v21  }
  0x53   :  { %3735 = vset.pattern.permute.xlu2 %v3979_v32  ;;  %414 = vperm.xlu1 %3734, %v4209_v27  }
  0x54   :  { %426 = vperm.xlu2 %3735, %v4201_v26  }
  0x55   :  { %410 = vperm.xlu0 %3733, %v4226_v31  }
  0x5b   :  { %3737 = vset.pattern.permute.xlu1 %v3979_v32 }
  0x5c   :  { %438 = vperm.xlu2 %3735, %v4217_v29   ;;  %v4238_v33 = vpop.permute.xlu2 %85  ;;  %434 = vperm.xlu1 %3737, %v4172_v20  }
  0x5d   :  { %3736 = vset.pattern.permute.xlu0 %v3979_v32 }
  0x5e   :  { %430 = vperm.xlu0 %3736, %v4177_v21  }
  0x64   :  { %446 = vperm.xlu2 %3735, %v4191_v24   ;;  %v4243_v34 = vpop.permute.xlu2 %90  ;;  %442 = vperm.xlu1 %3737, %v4196_v25  }
  0x66   :  { %450 = vperm.xlu0 %3736, %v4226_v31  }
  0x6c   :  { %3738 = vset.pattern.permute.xlu2 %v3980_v35  ;;  %v4247_v36 = vpop.permute.xlu2 %199  ;;  %454 = vperm.xlu1 %3737, %v4209_v27  }
  0x6d   :  { %466 = vperm.xlu2 %3738, %v4201_v26  }
  0x6e   :  { %3739 = vset.pattern.permute.xlu0 %v3980_v35 }
  0x6f   :  { %470 = vperm.xlu0 %3739, %v4177_v21  }
  0x74   :  { %v4252_v37 = vpop.permute.xlu2 %214  ;;  %3740 = vset.pattern.permute.xlu1 %v3980_v35  ;;  %v4254_v38 = vpop.permute.xlu1 %75 }
  0x75   :  { %478 = vperm.xlu2 %3738, %v4217_v29   ;;  %474 = vperm.xlu1 %3740, %v4172_v20  }
  0x76   :  { %v66_v56 = vpop.permute.xlu0 %65 }
  0x77   :  { %490 = vperm.xlu0 %3739, %v4226_v31  }
  0x7c   :  { %v4259_v39 = vpop.permute.xlu2 %229  ;;  %v4261_v40 = vpop.permute.xlu1 %80 }
  0x7d   :  { %486 = vperm.xlu2 %3738, %v4191_v24   ;;  %482 = vperm.xlu1 %3740, %v4196_v25  }
  0x7e   :  { %v71_v61 = vpop.permute.xlu0 %70 }
  0x7f   :  { %3742 = vset.pattern.permute.xlu0 %v3981_v41 }
  0x80   :  { %510 = vperm.xlu0 %3742, %v4177_v21  }
  0x84   :  { %v4266_v42 = vpop.permute.xlu2 %349  ;;  %v101_v43 = vpop.permute.xlu1 %100 }
  0x85   :  { %7669 = vst [vmem:[#allocation5_spill] sm:$0xff] %v4266_v42  ;;  %3741 = vset.pattern.permute.xlu2 %v3981_v41  ;;  %494 = vperm.xlu1 %3740, %v4209_v27  }
  0x86   :  { %506 = vperm.xlu2 %3741, %v4201_v26   ;;  %v96_v4 = vpop.permute.xlu0 %95 }
  0x88   :  { %v4270_v44 = vpop.f32.mrf.mxu0  ;;  %530 = vperm.xlu0 %3742, %v4226_v31  }
  0x89   :  { %v158_v23 = vadd.f32 %v4270_v44, %v66_v56 }
  0x8c   :  { %v4273_v45 = vpop.permute.xlu1 %209  ;;  %v4275_v46 = vpop.permute.xlu2 %364 }
  0x8d   :  { %7670 = vst [vmem:[#allocation6_spill] sm:$0xff] %v4275_v46  ;;  %3743 = vset.pattern.permute.xlu1 %v3981_v41  ;;  %v3995_v46 = vmov 15  }
  0x8e   :  { %518 = vperm.xlu2 %3741, %v4217_v29   ;;  %514 = vperm.xlu1 %3743, %v4172_v20   ;;  %v4323_v11 = vpop.permute.xlu0 %204 }
  0x90   :  { %v4279_v47 = vpop.f32.mrf.mxu0  ;;  %3745 = vset.pattern.permute.xlu0 %v3982_v48 }
  0x91   :  { %550 = vperm.xlu0 %3745, %v4177_v21   ;;  %v160_v28 = vadd.f32 %v4279_v47, %v71_v61 }
  0x94   :  { %v4282_v49 = vpop.permute.xlu1 %224 }
  0x95   :  { %v4284_v50 = vpop.permute.xlu2 %386 }
  0x96   :  { %7671 = vst [vmem:[#allocation7_spill] sm:$0xff] %v4284_v50  ;;  %526 = vperm.xlu2 %3741, %v4191_v24   ;;  %522 = vperm.xlu1 %3743, %v4196_v25   ;;  %v4338_v32 = vpop.permute.xlu0 %219 }
  0x98   :  { %v162_v51 = vpop.f32.mrf.mxu0 }
  0x99   :  { %570 = vperm.xlu0 %3745, %v4226_v31   ;;  %v163_v19 = vadd.f32 %v162_v51, %v4254_v38  ;;  %v3654_v38 = vld [vmem:[%s7498_s4] sm:$0xff] }
  0x9c   :  { %v4289_v52 = vpop.permute.xlu1 %344 }
  0x9d   :  { %7672 = vst [vmem:[#allocation8_spill] sm:$0xff] %v4289_v52  ;;  %v4291_v53 = vpop.permute.xlu2 %398 }
  0x9e   :  { %7673 = vst [vmem:[#allocation9_spill] sm:$0xff] %v4291_v53  ;;  %3744 = vset.pattern.permute.xlu2 %v3982_v48  ;;  %534 = vperm.xlu1 %3743, %v4209_v27  }
  0x9f   :  { %546 = vperm.xlu2 %3744, %v4201_v26  }
  0xa0   :  { %v164_v54 = vpop.f32.mrf.mxu0 }
  0xa1   :  { %3748 = vset.pattern.permute.xlu0 %v3983_v55  ;;  %v165_v16 = vadd.f32 %v164_v54, %v4261_v40  ;;  %v4351_v40 = vpop.permute.xlu0 %234  ;;  %v3986_v54 = vmov 9  }
  0xa2   :  { %590 = vperm.xlu0 %3748, %v4177_v21  }
  0xa3   :  { %v186_v30 = vpack.c.bf16 %v165_v16, %v163_v19 }
  0xa4   :  { %v4296_v57 = vpop.permute.xlu1 %359 }
  0xa5   :  { %7674 = vst [vmem:[#allocation10_spill] sm:$0xff] %v4296_v57  ;;  %v4298_v58 = vpop.permute.xlu2 %406 }
  0xa6   :  { %7675 = vst [vmem:[#allocation11_spill] sm:$0xff] %v4298_v58  ;;  %3746 = vset.pattern.permute.xlu1 %v3982_v48  ;;  %v3655_v48 = vld [vmem:[%s7498_s4 + $0x8] sm:$0xff] }
  0xa7   :  { %558 = vperm.xlu2 %3744, %v4217_v29   ;;  %554 = vperm.xlu1 %3746, %v4172_v20  }
  0xa8   :  { %v167_v59 = vpop.f32.mrf.mxu0 }
  0xa9   :  { %v168_v14 = vadd.f32 %v167_v59, %v4238_v33  ;;  %v4361_v47 = vpop.permute.xlu0 %339 }
  0xaa   :  { %610 = vperm.xlu0 %3748, %v4226_v31   ;;  %7686 = vst [vmem:[#allocation22_spill] sm:$0xff] %v4361_v47 }
  0xac   :  { %v4303_v60 = vpop.permute.xlu1 %374 }
  0xad   :  { %7676 = vst [vmem:[#allocation12_spill] sm:$0xff] %v4303_v60 }
  0xae   :  { %v4305_v62 = vpop.permute.xlu2 %426 }
  0xaf   :  { %7677 = vst [vmem:[#allocation13_spill] sm:$0xff] %v4305_v62  ;;  %566 = vperm.xlu2 %3744, %v4191_v24   ;;  %562 = vperm.xlu1 %3746, %v4196_v25  }
  0xb0   :  { %v169_v63 = vpop.f32.mrf.mxu0 }
  0xb1   :  { %v170_v12 = vadd.f32 %v169_v63, %v4243_v34  ;;  %v185_v34 = vpack.c.bf16 %v160_v28, %v158_v23  ;;  %v4377_v59 = vpop.permute.xlu0 %354  ;;  %v3656_v63 = vld [vmem:[%s7498_s4 + $0x10] sm:$0xff] }
  0xb2   :  { %3752 = vset.pattern.permute.xlu0 %v3984_v0  ;;  %7688 = vst [vmem:[#allocation24_spill] sm:$0xff] %v4377_v59 }
  0xb3   :  { %663 = vperm.xlu0 %3752, %v4172_v20   ;;  %v187_v17 = vpack.c.bf16 %v170_v12, %v168_v14 }
  0xb5   :  { %v4310_v1 = vpop.permute.xlu1 %394 }
  0xb6   :  { %7678 = vst [vmem:[#allocation14_spill] sm:$0xff] %v4310_v1  ;;  %v4312_v2 = vpop.permute.xlu2 %438 }
  0xb7   :  { %7679 = vst [vmem:[#allocation15_spill] sm:$0xff] %v4312_v2  ;;  %3747 = vset.pattern.permute.xlu2 %v3983_v55  ;;  %574 = vperm.xlu1 %3746, %v4209_v27  }
  0xb8   :  { %v172_v5 = vpop.f32.mrf.mxu0  ;;  %586 = vperm.xlu2 %3747, %v4201_v26  }
  0xb9   :  { %v173_v9 = vadd.f32 %v172_v5, %v96_v4  ;;  %v4390_v4 = vpop.permute.xlu0 %369 }
  0xba   :  { %7690 = vst [vmem:[#allocation26_spill] sm:$0xff] %v4390_v4 }
  0xbb   :  { %683 = vperm.xlu0 %3752, %v4209_v27  }
  0xbd   :  { %v4317_v6 = vpop.permute.xlu1 %402 }
  0xbe   :  { %7680 = vst [vmem:[#allocation16_spill] sm:$0xff] %v4317_v6  ;;  %v4319_v7 = vpop.permute.xlu2 %446 }
  0xbf   :  { %3749 = vset.pattern.permute.xlu1 %v3983_v55 }
  0xc0   :  { %v174_v8 = vpop.f32.mrf.mxu0  ;;  %598 = vperm.xlu2 %3747, %v4217_v29   ;;  %594 = vperm.xlu1 %3749, %v4172_v20  }
  0xc1   :  { %v175_v10 = vadd.f32 %v174_v8, %v101_v43 }
  0xc3   :  { %v188_v13 = vpack.c.bf16 %v175_v10, %v173_v9  ;;  %3755 = vset.pattern.permute.xlu0 %v3985_v22  ;;  %v3987_v9 = vmov 10   ;;  %v4399_v10 = vpop.permute.xlu0 %390 }
  0xc4   :  { %711 = vperm.xlu0 %3755, %v4172_v20   ;;  %7692 = vst [vmem:[#allocation28_spill] sm:$0xff] %v4399_v10 }
  0xc5   :  { %274 = vmatpush.bf16.msra.mxu1 %v188_v13  ;;  %v4327_v15 = vpop.permute.xlu1 %414  ;;  %v3657_v13 = vld [vmem:[%s7498_s4 + $0x18] sm:$0xff]  ;;  %s3990_s4 = smov 16  }
  0xc6   :  { %7681 = vst [vmem:[#allocation17_spill] sm:$0xff] %v4327_v15 }
  0xc7   :  { %v4330_v18 = vpop.permute.xlu2 %466 }
  0xc8   :  { %7682 = vst [vmem:[#allocation18_spill] sm:$0xff] %v4330_v18  ;;  %606 = vperm.xlu2 %3747, %v4191_v24   ;;  %602 = vperm.xlu1 %3749, %v4196_v25  }
  0xc9   :  { %275 = vmatpush.bf16.msra.mxu1 %v187_v17 }
  0xcb   :  { %v4412_v16 = vpop.permute.xlu0 %410 }
  0xcc   :  { %731 = vperm.xlu0 %3755, %v4209_v27   ;;  %7693 = vst [vmem:[#allocation29_spill] sm:$0xff] %v4412_v16 }
  0xcd   :  { %276 = vmatpush.bf16.msra.mxu1 %v186_v30  ;;  %v3988_v30 = vmov 11  }
  0xce   :  { %v4340_v33 = vpop.permute.xlu1 %434 }
  0xcf   :  { %7683 = vst [vmem:[#allocation19_spill] sm:$0xff] %v4340_v33  ;;  %v4342_v35 = vpop.permute.xlu2 %478 }
  0xd0   :  { %3751 = vset.pattern.permute.xlu2 %v3984_v0  ;;  %614 = vperm.xlu1 %3749, %v4209_v27  }
  0xd1   :  { %277 = vmatpush.bf16.msra.mxu1 %v185_v34  ;;  %659 = vperm.xlu2 %3751, %v4177_v21  }
  0xd4   :  { %3614 = vmatmul.msk.bf16.vlgmr.msra.gmra.mxu1 %vm257_vm1, %v3654_v38  ;;  %3758 = vset.pattern.permute.xlu0 %v3986_v54 }
  0xd5   :  { %759 = vperm.xlu0 %3758, %v4172_v20  }
  0xd6   :  { %v4353_v41 = vpop.permute.xlu1 %442 }
  0xd7   :  { %7684 = vst [vmem:[#allocation20_spill] sm:$0xff] %v4353_v41  ;;  %v4355_v43 = vpop.permute.xlu2 %486 }
  0xd8   :  { %3750 = vset.pattern.permute.xlu1 %v3984_v0 }
  0xd9   :  { %671 = vperm.xlu2 %3751, %v4196_v25   ;;  %655 = vperm.xlu1 %3750, %v4201_v26  }
  0xdd   :  { %779 = vperm.xlu0 %3758, %v4209_v27  }
  0xde   :  { %v4359_v44 = vpop.permute.xlu1 %454 }
  0xdf   :  { %7685 = vst [vmem:[#allocation21_spill] sm:$0xff] %v4359_v44 }
  0xe0   :  { %v4366_v51 = vpop.permute.xlu2 %506 }
  0xe1   :  { %7687 = vst [vmem:[#allocation23_spill] sm:$0xff] %v4366_v51  ;;  %679 = vperm.xlu2 %3751, %v4226_v31   ;;  %667 = vperm.xlu1 %3750, %v4217_v29  }
  0xe4   :  { %3615 = vmatmul.msk.bf16.gmra.mxu1 %vm257_vm1, %v3655_v48 }
  0xe5   :  { %3761 = vset.pattern.permute.xlu0 %v3987_v9 }
  0xe6   :  { %807 = vperm.xlu0 %3761, %v4172_v20  }
  0xe7   :  { %v4372_v55 = vpop.permute.xlu1 %474 }
  0xe8   :  { %v4374_v56 = vpop.permute.xlu2 %518 }
  0xe9   :  { %3754 = vset.pattern.permute.xlu2 %v3985_v22  ;;  %675 = vperm.xlu1 %3750, %v4191_v24  }
  0xea   :  { %707 = vperm.xlu2 %3754, %v4177_v21  }
  0xee   :  { %827 = vperm.xlu0 %3761, %v4209_v27  }
  0xef   :  { %v4381_v61 = vpop.permute.xlu1 %482 }
  0xf0   :  { %v4386_v0 = vpop.permute.xlu2 %526 }
  0xf1   :  { %7689 = vst [vmem:[#allocation25_spill] sm:$0xff] %v4386_v0  ;;  %3753 = vset.pattern.permute.xlu1 %v3985_v22  ;;  %v4421_v22 = vpop.permute.xlu0 %430 }
  0xf2   :  { %719 = vperm.xlu2 %3754, %v4196_v25   ;;  %703 = vperm.xlu1 %3753, %v4201_v26   ;;  %7695 = vst [vmem:[#allocation31_spill] sm:$0xff] %v4421_v22 }
  0xf4   :  { %3616 = vmatmul.msk.bf16.gmra.mxu1 %vm257_vm1, %v3656_v63 }
  0xf6   :  { %3764 = vset.pattern.permute.xlu0 %v3988_v30 }
  0xf7   :  { %v4393_v5 = vpop.permute.xlu1 %494  ;;  %855 = vperm.xlu0 %3764, %v4172_v20  }
  0xf9   :  { %v4395_v8 = vpop.permute.xlu2 %546  ;;  %v4429_v34 = vpop.permute.xlu0 %450 }
  0xfa   :  { %7691 = vst [vmem:[#allocation27_spill] sm:$0xff] %v4395_v8  ;;  %727 = vperm.xlu2 %3754, %v4226_v31   ;;  %715 = vperm.xlu1 %3753, %v4217_v29  }
  0xfb   :  { %7698 = vst [vmem:[#allocation34_spill] sm:$0xff] %v4429_v34  ;;  %v7517_v34 = vmov 0.0  }
  0xff   :  { %875 = vperm.xlu0 %3764, %v4209_v27  }
 0x100   :  { %v4402_v12 = vpop.permute.xlu1 %514 }
 0x101   :  { %v4407_v14 = vpop.permute.xlu2 %558 }
 0x102   :  { %3757 = vset.pattern.permute.xlu2 %v3986_v54  ;;  %723 = vperm.xlu1 %3753, %v4191_v24  }
 0x103   :  { %755 = vperm.xlu2 %3757, %v4177_v21  }
 0x104   :  { %3617 = vmatmul.msk.bf16.gmra.mxu1 %vm257_vm1, %v3657_v13 }
 0x108   :  { %v4415_v17 = vpop.permute.xlu1 %522 }
 0x109   :  { %7694 = vst [vmem:[#allocation30_spill] sm:$0xff] %v4415_v17  ;;  %v4417_v19 = vpop.permute.xlu2 %566 }
 0x10a   :  { %3756 = vset.pattern.permute.xlu1 %v3986_v54  ;;  %v4438_v54 = vpop.permute.xlu0 %470 }
 0x10b   :  { %767 = vperm.xlu2 %3757, %v4196_v25   ;;  %751 = vperm.xlu1 %3756, %v4201_v26  }
 0x110   :  { %v4423_v23 = vpop.permute.xlu1 %534 }
 0x111   :  { %7696 = vst [vmem:[#allocation32_spill] sm:$0xff] %v4423_v23 }
 0x112   :  { %v4425_v28 = vpop.permute.xlu2 %586  ;;  %v4447_v3 = vpop.permute.xlu0 %490 }
 0x113   :  { %7697 = vst [vmem:[#allocation33_spill] sm:$0xff] %v4425_v28  ;;  %775 = vperm.xlu2 %3757, %v4226_v31   ;;  %763 = vperm.xlu1 %3756, %v4217_v29   ;;  %v3989_v28 = vmov 12  }
 0x114   :  { %3767 = vset.pattern.permute.xlu0 %v3989_v28 }
 0x119   :  { %v4432_v38 = vpop.permute.xlu1 %554 }
 0x11a   :  { %v4434_v48 = vpop.permute.xlu2 %598  ;;  %v4455_v62 = vpop.permute.xlu0 %510 }
 0x11b   :  { %3760 = vset.pattern.permute.xlu2 %v3987_v9  ;;  %771 = vperm.xlu1 %3756, %v4191_v24  }
 0x11c   :  { %803 = vperm.xlu2 %3760, %v4177_v21  }
 0x121   :  { %v4441_v63 = vpop.permute.xlu1 %562 }
 0x122   :  { %v4443_v13 = vpop.permute.xlu2 %606  ;;  %v4463_v50 = vpop.permute.xlu0 %530 }
 0x123   :  { %3759 = vset.pattern.permute.xlu1 %v3987_v9 }
 0x124   :  { %815 = vperm.xlu2 %3760, %v4196_v25   ;;  %799 = vperm.xlu1 %3759, %v4201_v26  }
 0x129   :  { %v4449_v18 = vpop.permute.xlu1 %574 }
 0x12a   :  { %7699 = vst [vmem:[#allocation35_spill] sm:$0xff] %v4449_v18  ;;  %v4473_v2 = vpop.permute.xlu0 %550 }
 0x12b   :  { %v4451_v8 = vpop.permute.xlu2 %659 }
 0x12c   :  { %7700 = vst [vmem:[#allocation36_spill] sm:$0xff] %v4451_v8  ;;  %823 = vperm.xlu2 %3760, %v4226_v31   ;;  %811 = vperm.xlu1 %3759, %v4217_v29  }
 0x132   :  { %v4457_v52 = vpop.permute.xlu1 %594  ;;  %v4483_v53 = vpop.permute.xlu0 %570 }
 0x133   :  { %v4459_v9 = vpop.permute.xlu2 %671 }
 0x134   :  { %7701 = vst [vmem:[#allocation37_spill] sm:$0xff] %v4459_v9  ;;  %3763 = vset.pattern.permute.xlu2 %v3988_v30  ;;  %819 = vperm.xlu1 %3759, %v4191_v24  }
 0x135   :  { %851 = vperm.xlu2 %3763, %v4177_v21  }
 0x13a   :  { %v4465_v8 = vpop.permute.xlu1 %602 }
 0x13b   :  { %v4467_v22 = vpop.permute.xlu2 %679 }
 0x13c   :  { %7702 = vst [vmem:[#allocation38_spill] sm:$0xff] %v4467_v22  ;;  %3762 = vset.pattern.permute.xlu1 %v3988_v30 }
 0x13d   :  { %863 = vperm.xlu2 %3763, %v4196_v25   ;;  %847 = vperm.xlu1 %3762, %v4201_v26  }
 0x142   :  { %v4471_v17 = vpop.permute.xlu1 %614 }
 0x144   :  { %v4475_v0 = vpop.permute.xlu2 %707 }
 0x145   :  { %7703 = vst [vmem:[#allocation39_spill] sm:$0xff] %v4475_v0  ;;  %871 = vperm.xlu2 %3763, %v4226_v31   ;;  %859 = vperm.xlu1 %3762, %v4217_v29  }
 0x14b   :  { %v4479_v58 = vpop.permute.xlu1 %655 }
 0x14c   :  { %7704 = vst [vmem:[#allocation40_spill] sm:$0xff] %v4479_v58  ;;  %v4481_v44 = vpop.permute.xlu2 %719 }
 0x14d   :  { %7705 = vst [vmem:[#allocation41_spill] sm:$0xff] %v4481_v44  ;;  %3766 = vset.pattern.permute.xlu2 %v3989_v28  ;;  %867 = vperm.xlu1 %3762, %v4191_v24   ;;  %v4497_v44 = vpop.permute.xlu0 %590 }
 0x14e   :  { %899 = vperm.xlu2 %3766, %v4177_v21  }
 0x151   :  { %v279_v30 = vpop.f32.mrf.mxu1 }
 0x152   :  { %v4490_v9 = vadd.f32 %v279_v30, %v4247_v36 }
 0x153   :  { %v4487_v59 = vpop.permute.xlu1 %667 }
 0x154   :  { %7706 = vst [vmem:[#allocation42_spill] sm:$0xff] %v4487_v59  ;;  %v4492_v18 = vpop.permute.xlu2 %727 }
 0x155   :  { %7707 = vst [vmem:[#allocation43_spill] sm:$0xff] %v4490_v9  ;;  %3765 = vset.pattern.permute.xlu1 %v3989_v28  ;;  %v4512_v28 = vpop.permute.xlu0 %610 }
 0x156   :  { %7708 = vst [vmem:[#allocation44_spill] sm:$0xff] %v4492_v18  ;;  %895 = vperm.xlu1 %3765, %v4201_v26   ;;  %625 = vrot.lane.b32.xlu2 %v4490_v9, %s3990_s4 }
 0x159   :  { %v281_v60 = vpop.f32.mrf.mxu1 }
 0x15a   :  { %v4500_v16 = vadd.f32 %v281_v60, %v4323_v11 }
 0x15b   :  { %v4502_v41 = vpop.permute.xlu1 %675 }
 0x15c   :  { %7709 = vst [vmem:[#allocation45_spill] sm:$0xff] %v4500_v16  ;;  %627 = vrot.lane.b32.xlu0 %v4500_v16, %s3990_s4 }
 0x15d   :  { %7710 = vst [vmem:[#allocation46_spill] sm:$0xff] %v4502_v41  ;;  %v4506_v36 = vpop.permute.xlu2 %755  ;;  %v4525_v6 = vpop.permute.xlu0 %663 }
 0x15e   :  { %7711 = vst [vmem:[#allocation47_spill] sm:$0xff] %v4506_v36  ;;  %310 = vrot.lane.b32.xlu2 %v4500_v16, %s3991_s28  ;;  %308 = vrot.lane.b32.xlu1 %v4490_v9, %s3991_s28 }
 0x15f   :  { %7715 = vst [vmem:[#allocation51_spill] sm:$0xff] %v4525_v6 }
 0x161   :  { %v284_v30 = vpop.f32.mrf.mxu1 }
 0x162   :  { %v4515_v60 = vadd.f32 %v284_v30, %v4273_v45 }
 0x164   :  { %7712 = vst [vmem:[#allocation48_spill] sm:$0xff] %v4515_v60  ;;  %312 = vrot.lane.b32.xlu0 %v4515_v60, %s3991_s28  ;;  %v4519_v11 = vpop.permute.xlu1 %703 }
 0x165   :  { %7713 = vst [vmem:[#allocation49_spill] sm:$0xff] %v4519_v11  ;;  %v4521_v18 = vpop.permute.xlu2 %767  ;;  %v4545_v33 = vpop.permute.xlu0 %683 }
 0x166   :  { %7714 = vst [vmem:[#allocation50_spill] sm:$0xff] %v4521_v18  ;;  %911 = vperm.xlu2 %3766, %v4196_v25   ;;  %907 = vperm.xlu1 %3765, %v4217_v29  }
 0x167   :  { %7721 = vst [vmem:[#allocation57_spill] sm:$0xff] %v4545_v33 }
 0x169   :  { %v286_v36 = vpop.f32.mrf.mxu1 }
 0x16a   :  { %v4539_v18 = vadd.f32 %v286_v36, %v4252_v37 }
 0x16c   :  { %903 = vperm.xlu0 %3767, %v4172_v20   ;;  %v4528_v57 = vpop.permute.xlu1 %715  ;;  %7719 = vst [vmem:[#allocation55_spill] sm:$0xff] %v4539_v18 }
 0x16d   :  { %7716 = vst [vmem:[#allocation52_spill] sm:$0xff] %v4528_v57  ;;  %v4530_v45 = vpop.permute.xlu2 %775  ;;  %v4565_v33 = vpop.permute.xlu0 %711 }
 0x16e   :  { %7717 = vst [vmem:[#allocation53_spill] sm:$0xff] %v4530_v45  ;;  %919 = vperm.xlu2 %3766, %v4226_v31   ;;  %629 = vrot.lane.b32.xlu1 %v4515_v60, %s3990_s4 }
 0x16f   :  { %7724 = vst [vmem:[#allocation60_spill] sm:$0xff] %v4565_v33 }
 0x171   :  { %v289_v30 = vpop.f32.mrf.mxu1 }
 0x172   :  { %v4536_v11 = vadd.f32 %v289_v30, %v4338_v32  ;;  %v3992_v32 = vmov 13  }
 0x174   :  { %7718 = vst [vmem:[#allocation54_spill] sm:$0xff] %v4536_v11  ;;  %633 = vrot.lane.b32.xlu0 %v4536_v11, %s3990_s4  ;;  %v4543_v6 = vpop.permute.xlu1 %723 }
 0x175   :  { %7720 = vst [vmem:[#allocation56_spill] sm:$0xff] %v4543_v6 }
 0x176   :  { %631 = vrot.lane.b32.xlu2 %v4539_v18, %s3990_s4  ;;  %314 = vrot.lane.b32.xlu1 %v4539_v18, %s3991_s28  ;;  %v4551_v1 = vpop.permute.xlu2 %803 }
 0x177   :  { %3769 = vset.pattern.permute.xlu2 %v3992_v32 }
 0x179   :  { %v291_v30 = vpop.f32.mrf.mxu1 }
 0x17a   :  { %v4554_v37 = vadd.f32 %v291_v30, %v4282_v49  ;;  %v4575_v30 = vpop.permute.xlu0 %731 }
 0x17b   :  { %7726 = vst [vmem:[#allocation62_spill] sm:$0xff] %v4575_v30 }
 0x17c   :  { %7722 = vst [vmem:[#allocation58_spill] sm:$0xff] %v4554_v37  ;;  %318 = vrot.lane.b32.xlu0 %v4554_v37, %s3991_s28 }
 0x17d   :  { %v4558_v36 = vpop.permute.xlu1 %751 }
 0x17e   :  { %7723 = vst [vmem:[#allocation59_spill] sm:$0xff] %v4558_v36  ;;  %316 = vrot.lane.b32.xlu2 %v4536_v11, %s3991_s28  ;;  %915 = vperm.xlu1 %3765, %v4191_v24   ;;  %v4563_v6 = vpop.permute.xlu2 %815 }
 0x181   :  { %v294_v42 = vpop.f32.mrf.mxu1 }
 0x182   :  { %v4581_v33 = vadd.f32 %v294_v42, %v4259_v39  ;;  %v4593_v59 = vpop.permute.xlu0 %759 }
 0x183   :  { %7729 = vst [vmem:[#allocation65_spill] sm:$0xff] %v4593_v59 }
 0x184   :  { %923 = vperm.xlu0 %3767, %v4209_v27   ;;  %7728 = vst [vmem:[#allocation64_spill] sm:$0xff] %v4581_v33 }
 0x185   :  { %v4568_v23 = vpop.permute.xlu1 %763 }
 0x186   :  { %7725 = vst [vmem:[#allocation61_spill] sm:$0xff] %v4568_v23  ;;  %947 = vperm.xlu2 %3769, %v4177_v21   ;;  %635 = vrot.lane.b32.xlu1 %v4554_v37, %s3990_s4  ;;  %v4573_v49 = vpop.permute.xlu2 %823 }
 0x187   :  { %3768 = vset.pattern.permute.xlu1 %v3992_v32 }
 0x189   :  { %v296_v36 = vpop.f32.mrf.mxu1 }
 0x18a   :  { %v4578_v57 = vadd.f32 %v296_v36, %v4351_v40  ;;  %v4604_v40 = vpop.permute.xlu0 %779 }
 0x18b   :  { %7732 = vst [vmem:[#allocation68_spill] sm:$0xff] %v4604_v40 }
 0x18c   :  { %7727 = vst [vmem:[#allocation63_spill] sm:$0xff] %v4578_v57  ;;  %639 = vrot.lane.b32.xlu0 %v4578_v57, %s3990_s4 }
 0x18d   :  { %v4585_v23 = vpop.permute.xlu1 %771  ;;  %3770 = vset.pattern.permute.xlu0 %v3992_v32 }
 0x18e   :  { %637 = vrot.lane.b32.xlu2 %v4581_v33, %s3990_s4  ;;  %320 = vrot.lane.b32.xlu1 %v4581_v33, %s3991_s28  ;;  %s4037_s4 = smov 126  }
 0x18f   :  { %v4591_v22 = vpop.permute.xlu2 %851 }
 0x194   :  { %951 = vperm.xlu0 %3770, %v4172_v20  }
 0x196   :  { %v4596_v39 = vpop.permute.xlu1 %799  ;;  %322 = vrot.lane.b32.xlu2 %v4578_v57, %s3991_s28  ;;  %943 = vperm.xlu1 %3768, %v4201_v26  }
 0x197   :  { %7730 = vst [vmem:[#allocation66_spill] sm:$0xff] %v4596_v39  ;;  %v4601_v42 = vpop.permute.xlu2 %863  ;;  %v3994_v39 = vmov 14  }
 0x198   :  { %7731 = vst [vmem:[#allocation67_spill] sm:$0xff] %v4601_v42  ;;  %v4618_v42 = vpop.permute.xlu0 %807 }
 0x19c   :  { %971 = vperm.xlu0 %3770, %v4209_v27  }
 0x19e   :  { %v4606_v32 = vpop.permute.xlu1 %811  ;;  %959 = vperm.xlu2 %3769, %v4196_v25   ;;  %955 = vperm.xlu1 %3768, %v4217_v29  }
 0x19f   :  { %v4610_v36 = vpop.permute.xlu2 %871 }
 0x1a0   :  { %v4630_v10 = vpop.permute.xlu0 %827 }
 0x1a4   :  { %994 = vrot.lane.b32.xlu0 %v4515_v60, %s3993_s29 }
 0x1a5   :  { %3771 = vset.pattern.permute.xlu0 %v3994_v39 }
 0x1a6   :  { %v4614_v59 = vpop.permute.xlu1 %819  ;;  %967 = vperm.xlu2 %3769, %v4226_v31   ;;  %963 = vperm.xlu1 %3768, %v4191_v24  }
 0x1a8   :  { %v900_v40 = vpop.permute.xlu2 %899  ;;  %v4639_v0 = vpop.permute.xlu0 %855 }
 0x1ac   :  { %1000 = vrot.lane.b32.xlu0 %v4554_v37, %s3993_s29 }
 0x1ae   :  { %992 = vrot.lane.b32.xlu2 %v4500_v16, %s3993_s29  ;;  %990 = vrot.lane.b32.xlu1 %v4490_v9, %s3993_s29  ;;  %v7527_v16 = vmov 16  }
 0x1af   :  { %v4626_v58 = vpop.permute.xlu1 %847  ;;  %3773 = vset.pattern.permute.xlu2 %v3994_v39  ;;  %3772 = vset.pattern.permute.xlu1 %v3994_v39 }
 0x1b0   :  { %7733 = vst [vmem:[#allocation69_spill] sm:$0xff] %v4626_v58  ;;  %v4628_v51 = vpop.permute.xlu2 %625  ;;  %v4657_v41 = vpop.permute.xlu0 %875 }
 0x1b1   :  { %7734 = vst [vmem:[#allocation70_spill] sm:$0xff] %v4628_v51  ;;  %v4653_v51 = vld [vmem:[%s7495_s1] sm:$0x3] }
 0x1b2   :  { %7736 = vst [vmem:[#allocation72_spill] sm:$0xff] %v4653_v51  ;;  %vm641_vm2 = vcmp.ge.f32.partialorder %v4653_v51, 2.0  ;;  %vm642_vm3 = vcmp.le.f32.partialorder %v4653_v51, 9.0  ;;  %vm324_vm4 = vcmp.ge.f32.partialorder %v4653_v51, 3.0  ;;  %vm325_vm5 = vcmp.le.f32.partialorder %v4653_v51, 10.0 }
 0x1b3   :  { %7737 = vst [vmem:[#allocation73_spill] sm:$0xff] %v4657_v41  ;;  %vm643_vm6 = vmand %vm641_vm2, %vm642_vm3 }
 0x1b4   :  { %1020 = vperm.xlu0 %3771, %v4201_v26   ;;  %vm326_vm7 = vmand %vm324_vm4, %vm325_vm5  ;;  %v4669_v15 = vsel %vm643_vm6, 1.0, %v7517_v34 }
 0x1b5   :  { %7739 = vst [vmem:[#allocation75_spill] sm:$0xff] %v4669_v15  ;;  %v4672_v41 = vsel %vm326_vm7, 1.0, %v7517_v34  ;;  %v4676_v30 = vperm.slane %v4669_v15, 0 }
 0x1b6   :  { %998 = vrot.lane.b32.xlu2 %v4536_v11, %s3993_s29  ;;  %996 = vrot.lane.b32.xlu1 %v4539_v18, %s3993_s29  ;;  %7740 = vst [vmem:[#allocation76_spill] sm:$0xff] %v4672_v41  ;;  %v4679_v51 = vperm.slane %v4672_v41, 0 }
 0x1b7   :  { %v4637_v4 = vpop.permute.xlu1 %859  ;;  %7741 = vst [vmem:[#allocation77_spill] sm:$0xff] %v4676_v30 }
 0x1b8   :  { %v311_v47 = vpop.permute.xlu2 %310  ;;  %7742 = vst [vmem:[#allocation78_spill] sm:$0xff] %v4679_v51 }
 0x1b9   :  { %v4689_v34 = vmul.f32 %v4679_v51, %v311_v47 }
 0x1bb   :  { %7745 = vst [vmem:[#allocation81_spill] sm:$0xff] %v4689_v34  ;;  %v538_v47 = vmul.f32 %v4455_v62, %v4689_v34  ;;  %v578_v18 = vmul.f32 %v4473_v2, %v4689_v34 }
 0x1bc   :  { %1040 = vperm.xlu0 %3771, %v4191_v24  }
 0x1be   :  { %1004 = vrot.lane.b32.xlu2 %v4578_v57, %s3993_s29  ;;  %1002 = vrot.lane.b32.xlu1 %v4581_v33, %s3993_s29 }
 0x1bf   :  { %v4646_v39 = vpop.permute.xlu1 %867 }
 0x1c0   :  { %7735 = vst [vmem:[#allocation71_spill] sm:$0xff] %v4646_v39  ;;  %v4648_v58 = vpop.permute.xlu2 %911 }
 0x1c4   :  { %3774 = vset.pattern.permute.xlu0 %v3995_v46 }
 0x1c5   :  { %1068 = vperm.xlu0 %3774, %v4201_v26  }
 0x1c6   :  { %1028 = vperm.xlu2 %3773, %v4172_v20   ;;  %1024 = vperm.xlu1 %3772, %v4177_v21  }
 0x1c8   :  { %v4664_v39 = vpop.permute.xlu1 %895  ;;  %v4666_v45 = vpop.permute.xlu2 %919 }
 0x1c9   :  { %7738 = vst [vmem:[#allocation74_spill] sm:$0xff] %v4664_v39 }
 0x1cd   :  { %1088 = vperm.xlu0 %3774, %v4191_v24  }
 0x1ce   :  { %v628_v57 = vpop.permute.xlu0 %627  ;;  %1036 = vperm.xlu2 %3773, %v4196_v25   ;;  %1032 = vperm.xlu1 %3772, %v4217_v29  }
 0x1cf   :  { %v4684_v39 = vmul.f32 %v4676_v30, %v628_v57  ;;  %v498_v57 = vmul.f32 %v4438_v54, %v4689_v34 }
 0x1d0   :  { %v632_v11 = vpop.permute.xlu2 %631  ;;  %v4686_v37 = vpop.permute.xlu1 %308 }
 0x1d1   :  { %7743 = vst [vmem:[#allocation79_spill] sm:$0xff] %v4684_v39  ;;  %v831_v15 = vmul.f32 %v4551_v1, %v4684_v39  ;;  %v879_v41 = vmul.f32 %v4591_v22, %v4684_v39 }
 0x1d2   :  { %7744 = vst [vmem:[#allocation80_spill] sm:$0xff] %v4686_v37 }
 0x1d3   :  { %v4703_v33 = vadd.f32 %v831_v15, %v498_v57  ;;  %v4705_v22 = vadd.f32 %v879_v41, %v538_v47 }
 0x1d5   :  { %3777 = vset.pattern.permute.xlu0 %v7527_v16  ;;  %v927_v16 = vmul.f32 %v900_v40, %v4684_v39  ;;  %v618_v40 = vmul.f32 %v4497_v44, %v4689_v34 }
 0x1d6   :  { %1116 = vperm.xlu0 %3777, %v4201_v26   ;;  %v313_v60 = vpop.permute.xlu0 %312  ;;  %1048 = vperm.xlu2 %3773, %v4209_v27  }
 0x1d7   :  { %1044 = vperm.xlu1 %3772, %v4226_v31   ;;  %v4710_v9 = vadd.f32 %v927_v16, %v578_v18  ;;  %v4714_v62 = vmul.f32 %v4679_v51, %v313_v60 }
 0x1d8   :  { %v317_v1 = vpop.permute.xlu2 %316  ;;  %v908_v37 = vpop.permute.xlu1 %907 }
 0x1d9   :  { %7746 = vst [vmem:[#allocation82_spill] sm:$0xff] %v4714_v62  ;;  %v499_v60 = vmul.f32 %v4372_v55, %v4714_v62  ;;  %v539_v57 = vmul.f32 %v4402_v12, %v4714_v62 }
 0x1de   :  { %1136 = vperm.xlu0 %3777, %v4191_v24   ;;  %v904_v54 = vpop.permute.xlu0 %903  ;;  %3776 = vset.pattern.permute.xlu2 %v3995_v46 }
 0x1df   :  { %3775 = vset.pattern.permute.xlu1 %v3995_v46  ;;  %1076 = vperm.xlu2 %3776, %v4172_v20  }
 0x1e0   :  { %1072 = vperm.xlu1 %3775, %v4177_v21   ;;  %v948_v15 = vpop.permute.xlu2 %947  ;;  %v630_v41 = vpop.permute.xlu1 %629 }
 0x1e1   :  { %v975_v2 = vmul.f32 %v948_v15, %v4684_v39  ;;  %v4722_v18 = vmul.f32 %v4676_v30, %v630_v41  ;;  %v579_v15 = vmul.f32 %v4432_v38, %v4714_v62  ;;  %v7533_v41 = vmov 17   ;;  %v7883_v39 = vld [vmem:[#allocation54_spill] sm:$0xff] }
 0x1e3   :  { %7747 = vst [vmem:[#allocation83_spill] sm:$0xff] %v4722_v18  ;;  %v4724_v16 = vadd.f32 %v975_v2, %v618_v40  ;;  %v832_v46 = vmul.f32 %v4618_v42, %v4722_v18  ;;  %v880_v47 = vmul.f32 %v4639_v0, %v4722_v18  ;;  %v928_v44 = vmul.f32 %v904_v54, %v4722_v18 }
 0x1e4   :  { %v4743_v42 = vmul.f32 %v4679_v51, %v317_v1 }
 0x1e5   :  { %v4738_v2 = vadd.f32 %v832_v46, %v499_v60  ;;  %v4740_v55 = vadd.f32 %v880_v47, %v539_v57  ;;  %v4750_v0 = vadd.f32 %v928_v44, %v579_v15  ;;  %v4754_v60 = vmul.f32 %v4676_v30, %v632_v11 }
 0x1e6   :  { %3780 = vset.pattern.permute.xlu0 %v7533_v41  ;;  %v634_v40 = vpop.permute.xlu0 %633  ;;  %7748 = vst [vmem:[#allocation84_spill] sm:$0xff] %v4743_v42  ;;  %v501_v57 = vmul.f32 %v4381_v61, %v4743_v42 }
 0x1e7   :  { %v4746_v12 = vmul.f32 %v4676_v30, %v634_v40  ;;  %1164 = vperm.xlu0 %3780, %v4201_v26   ;;  %1084 = vperm.xlu2 %3776, %v4196_v25   ;;  %7750 = vst [vmem:[#allocation86_spill] sm:$0xff] %v4750_v0  ;;  %v833_v40 = vmul.f32 %v4606_v32, %v4754_v60 }
 0x1e8   :  { %1080 = vperm.xlu1 %3775, %v4217_v29   ;;  %v638_v38 = vpop.permute.xlu2 %637  ;;  %v315_v54 = vpop.permute.xlu1 %314  ;;  %7751 = vst [vmem:[#allocation87_spill] sm:$0xff] %v4754_v60  ;;  %v881_v32 = vmul.f32 %v4637_v4, %v4754_v60  ;;  %v7760_v4 = vmov 16  }
 0x1e9   :  { %7749 = vst [vmem:[#allocation85_spill] sm:$0xff] %v4746_v12  ;;  %v4757_v46 = vmul.f32 %v4679_v51, %v315_v54  ;;  %v834_v1 = vmul.f32 %v4563_v6, %v4746_v12 }
 0x1eb   :  { %7752 = vst [vmem:[#allocation88_spill] sm:$0xff] %v4757_v46  ;;  %v4763_v47 = vadd.f32 %v834_v1, %v501_v57  ;;  %v500_v15 = vmul.f32 %v4342_v35, %v4757_v46  ;;  %v540_v61 = vmul.f32 %v4374_v56, %v4757_v46  ;;  %v930_v1 = vmul.f32 %v4648_v58, %v4746_v12 }
 0x1ec   :  { %v580_v35 = vmul.f32 %v4407_v14, %v4757_v46  ;;  %v929_v57 = vmul.f32 %v908_v37, %v4754_v60  ;;  %v3999_v14 = vmov 18  }
 0x1ed   :  { %7753 = vst [vmem:[#allocation89_spill] sm:$0xff] %v4763_v47  ;;  %v4772_v54 = vadd.f32 %v833_v40, %v500_v15  ;;  %v4785_v41 = vadd.f32 %v881_v32, %v540_v61  ;;  %v621_v61 = vmul.f32 %v4465_v8, %v4743_v42 }
 0x1ee   :  { %v319_v44 = vpop.permute.xlu0 %318  ;;  %v4789_v40 = vadd.f32 %v929_v57, %v580_v35 }
 0x1ef   :  { %1184 = vperm.xlu0 %3780, %v4191_v24   ;;  %1096 = vperm.xlu2 %3776, %v4209_v27   ;;  %7754 = vst [vmem:[#allocation90_spill] sm:$0xff] %v4772_v54  ;;  %v581_v27 = vmul.f32 %v4441_v63, %v4743_v42  ;;  %v4794_v58 = vmul.f32 %v4679_v51, %v319_v44  ;;  %v7565_v42 = vmov 30  }
 0x1f0   :  { %1092 = vperm.xlu1 %3775, %v4226_v31   ;;  %v323_v11 = vpop.permute.xlu2 %322  ;;  %v916_v6 = vpop.permute.xlu1 %915  ;;  %7755 = vst [vmem:[#allocation91_spill] sm:$0xff] %v4785_v41 }
 0x1f1   :  { %v4787_v15 = vadd.f32 %v930_v1, %v581_v27  ;;  %7757 = vst [vmem:[#allocation93_spill] sm:$0xff] %v4789_v40  ;;  %v7541_v40 = vmov 22  }
 0x1f2   :  { %7759 = vst [vmem:[#allocation95_spill] sm:$0xff] %v4794_v58 }
 0x1f3   :  { %7756 = vst [vmem:[#allocation92_spill] sm:$0xff] %v4787_v15 }
 0x1f6   :  { %v4791_v56 = vpop.permute.xlu0 %923 }
 0x1f7   :  { %7758 = vst [vmem:[#allocation94_spill] sm:$0xff] %v4791_v56  ;;  %3783 = vset.pattern.permute.xlu0 %v3999_v14  ;;  %3779 = vset.pattern.permute.xlu2 %v7760_v4 }
 0x1f8   :  { %1212 = vperm.xlu0 %3783, %v4201_v26   ;;  %3778 = vset.pattern.permute.xlu1 %v7760_v4  ;;  %v960_v63 = vpop.permute.xlu2 %959  ;;  %v636_v37 = vpop.permute.xlu1 %635  ;;  %v462_v26 = vmul.f32 %v4319_v7, %v4794_v58  ;;  %v4824_v4 = vmul.f32 %v4679_v51, %v323_v11 }
 0x1f9   :  { %1124 = vperm.xlu2 %3779, %v4172_v20   ;;  %v978_v1 = vmul.f32 %v960_v63, %v4746_v12  ;;  %1120 = vperm.xlu1 %3778, %v4177_v21   ;;  %v4806_v44 = vmul.f32 %v4676_v30, %v636_v37  ;;  %v502_v20 = vmul.f32 %v4355_v43, %v4794_v58 }
 0x1fa   :  { %v582_v21 = vmul.f32 %v4417_v19, %v4794_v58  ;;  %7764 = vst [vmem:[#allocation99_spill] sm:$0xff] %v4824_v4  ;;  %v504_v37 = vmul.f32 %v4393_v5, %v4824_v4 }
 0x1fb   :  { %7761 = vst [vmem:[#allocation96_spill] sm:$0xff] %v4806_v44  ;;  %v4808_v35 = vadd.f32 %v978_v1, %v621_v61  ;;  %v787_v32 = vmul.f32 %v4585_v23, %v4806_v44  ;;  %v835_v8 = vmul.f32 %v4614_v59, %v4806_v44  ;;  %v931_v27 = vmul.f32 %v916_v6, %v4806_v44 }
 0x1fc   :  { %v4834_v59 = vmul.f32 %v4676_v30, %v638_v38 }
 0x1fd   :  { %7762 = vst [vmem:[#allocation97_spill] sm:$0xff] %v4808_v35  ;;  %v4821_v57 = vadd.f32 %v787_v32, %v462_v26  ;;  %v4826_v63 = vadd.f32 %v835_v8, %v502_v20  ;;  %v4828_v23 = vadd.f32 %v931_v27, %v582_v21  ;;  %v7537_v8 = vmov 19  }
 0x1fe   :  { %v640_v7 = vpop.permute.xlu0 %639  ;;  %7768 = vst [vmem:[#allocation103_spill] sm:$0xff] %v4834_v59  ;;  %v836_v38 = vmul.f32 %v4573_v49, %v4834_v59  ;;  %v932_v32 = vmul.f32 %v4666_v45, %v4834_v59 }
 0x1ff   :  { %7763 = vst [vmem:[#allocation98_spill] sm:$0xff] %v4821_v57  ;;  %v4831_v43 = vmul.f32 %v4676_v30, %v640_v7  ;;  %v7805_v57 = vmov 20   ;;  %v7587_v30 = vmov 35  }
 0x200   :  { %7765 = vst [vmem:[#allocation100_spill] sm:$0xff] %v4826_v63  ;;  %1232 = vperm.xlu0 %3783, %v4191_v24   ;;  %v968_v19 = vpop.permute.xlu2 %967  ;;  %v321_v6 = vpop.permute.xlu1 %320 }
 0x201   :  { %7766 = vst [vmem:[#allocation101_spill] sm:$0xff] %v4828_v23  ;;  %1132 = vperm.xlu2 %3779, %v4196_v25   ;;  %1128 = vperm.xlu1 %3778, %v4217_v29   ;;  %v4840_v11 = vmul.f32 %v4679_v51, %v321_v6  ;;  %v837_v61 = vmul.f32 %v4630_v10, %v4831_v43 }
 0x202   :  { %7767 = vst [vmem:[#allocation102_spill] sm:$0xff] %v4831_v43  ;;  %v884_v25 = vmul.f32 %v4610_v36, %v4834_v59  ;;  %v980_v20 = vmul.f32 %v968_v19, %v4834_v59  ;;  %v624_v6 = vmul.f32 %v4471_v17, %v4824_v4  ;;  %v7593_v59 = vmov 36  }
 0x203   :  { %7769 = vst [vmem:[#allocation104_spill] sm:$0xff] %v4840_v11  ;;  %v4846_v1 = vadd.f32 %v837_v61, %v504_v37  ;;  %v503_v24 = vmul.f32 %v4447_v3, %v4840_v11  ;;  %v543_v5 = vmul.f32 %v4463_v50, %v4840_v11  ;;  %v583_v10 = vmul.f32 %v4483_v53, %v4840_v11 }
 0x204   :  { %v619_v3 = vmul.f32 %v4457_v52, %v4714_v62  ;;  %v623_v36 = vmul.f32 %v4512_v28, %v4840_v11  ;;  %v4882_v52 = vld [vmem:[%s7500_s6] sm:$0xff]  ;;  %v4888_v28 = vld [vmem:[%s7500_s6 + $0x38] sm:$0xff]  ;;  %v7597_v11 = vmov 37  }
 0x205   :  { %v4854_v26 = vadd.f32 %v836_v38, %v503_v24  ;;  %v4873_v53 = vadd.f32 %v884_v25, %v543_v5  ;;  %v4875_v45 = vadd.f32 %v932_v32, %v583_v10  ;;  %v4904_v25 = vld [vmem:[%s7500_s6 + $0x28] sm:$0xff]  ;;  %v4915_v5 = vld [vmem:[%s7500_s6 + $0x10] sm:$0xff] }
 0x206   :  { %v952_v29 = vpop.permute.xlu0 %951  ;;  %v4892_v7 = vadd.f32 %v980_v20, %v623_v36  ;;  %v4923_v32 = vld [vmem:[%s7500_s6 + $0x8] sm:$0xff]  ;;  %v7535_v36 = vmov 20   ;;  %v622_v20 = vmul.f32 %v4443_v13, %v4794_v58 }
 0x207   :  { %7770 = vst [vmem:[#allocation105_spill] sm:$0xff] %v4854_v26  ;;  %v976_v49 = vmul.f32 %v952_v29, %v4722_v18  ;;  %v620_v29 = vmul.f32 %v4434_v48, %v4757_v46  ;;  %v7848_v18 = vmov 25  }
 0x208   :  { %3786 = vset.pattern.permute.xlu0 %v7537_v8  ;;  %v4869_v50 = vpop.permute.xlu2 %992  ;;  %v4871_v21 = vpop.permute.xlu1 %943  ;;  %7772 = vst [vmem:[#allocation107_spill] sm:$0xff] %v4873_v53 }
 0x209   :  { %7771 = vst [vmem:[#allocation106_spill] sm:$0xff] %v4871_v21  ;;  %v4877_v27 = vadd.f32 %v976_v49, %v619_v3  ;;  %1260 = vperm.xlu0 %3786, %v4882_v52   ;;  %1144 = vperm.xlu2 %3779, %v4888_v28  }
 0x20a   :  { %7773 = vst [vmem:[#allocation108_spill] sm:$0xff] %v4875_v45  ;;  %1140 = vperm.xlu1 %3778, %v4226_v31   ;;  %v7777_v31 = vmov 17  }
 0x20b   :  { %7774 = vst [vmem:[#allocation109_spill] sm:$0xff] %v4877_v27 }
 0x20c   :  { %7775 = vst [vmem:[#allocation110_spill] sm:$0xff] %v4892_v7  ;;  %v7605_v7 = vmov 39  }
 0x20e   :  { %v972_v19 = vpop.permute.xlu0 %971 }
 0x20f   :  { %v981_v37 = vmul.f32 %v972_v19, %v4831_v43 }
 0x210   :  { %v4897_v61 = vpop.permute.xlu2 %998  ;;  %v956_v24 = vpop.permute.xlu1 %955 }
 0x211   :  { %7776 = vst [vmem:[#allocation111_spill] sm:$0xff] %v4897_v61  ;;  %v4899_v38 = vadd.f32 %v981_v37, %v624_v6  ;;  %1280 = vperm.xlu0 %3786, %v4904_v25   ;;  %3782 = vset.pattern.permute.xlu2 %v7777_v31  ;;  %v977_v17 = vmul.f32 %v956_v24, %v4754_v60  ;;  %v4938_v6 = vld [vmem:[%s7500_s6 + $0x20] sm:$0xff]  ;;  %v4946_v24 = vld [vmem:[%s7500_s6 + $0x18] sm:$0xff]  ;;  %v7831_v61 = vld [vmem:[#allocation55_spill] sm:$0xff]  ;;  %v7879_v60 = vmov 28  }
 0x212   :  { %3781 = vset.pattern.permute.xlu1 %v7777_v31  ;;  %1172 = vperm.xlu2 %3782, %v4915_v5  }
 0x213   :  { %v4918_v10 = vadd.f32 %v977_v17, %v620_v29  ;;  %1168 = vperm.xlu1 %3781, %v4923_v32   ;;  %v4960_v17 = vld [vmem:[%s7500_s6 + $0x30] sm:$0xff] }
 0x215   :  { %7778 = vst [vmem:[#allocation112_spill] sm:$0xff] %v4918_v10  ;;  %v7543_v10 = vmov 23  }
 0x216   :  { %v4926_v48 = vpop.permute.xlu0 %994 }
 0x218   :  { %v4928_v3 = vpop.permute.xlu2 %1004  ;;  %v964_v49 = vpop.permute.xlu1 %963 }
 0x219   :  { %3789 = vset.pattern.permute.xlu0 %v7535_v36  ;;  %v979_v19 = vmul.f32 %v964_v49, %v4806_v44  ;;  %v7539_v36 = vmov 21  }
 0x21a   :  { %1308 = vperm.xlu0 %3789, %v4882_v52   ;;  %1180 = vperm.xlu2 %3782, %v4938_v6  }
 0x21b   :  { %v4941_v37 = vadd.f32 %v979_v19, %v622_v20  ;;  %1176 = vperm.xlu1 %3781, %v4946_v24  }
 0x21d   :  { %7779 = vst [vmem:[#allocation113_spill] sm:$0xff] %v4941_v37  ;;  %v7906_v37 = vld [vmem:[#allocation72_spill] sm:$0xff] }
 0x21e   :  { %v4949_v13 = vpop.permute.xlu0 %1000  ;;  %vm1006_vm8 = vcmp.ge.f32.partialorder %v7906_v37, 1.0  ;;  %vm1007_vm9 = vcmp.le.f32.partialorder %v7906_v37, 8.0 }
 0x21f   :  { %7780 = vst [vmem:[#allocation114_spill] sm:$0xff] %v4949_v13  ;;  %vm1008_vm10 = vmand %vm1006_vm8, %vm1007_vm9 }
 0x220   :  { %v4951_v31 = vpop.permute.xlu2 %1028  ;;  %v4953_v29 = vpop.permute.xlu1 %990 }
 0x221   :  { %7781 = vst [vmem:[#allocation115_spill] sm:$0xff] %v4951_v31 }
 0x222   :  { %7782 = vst [vmem:[#allocation116_spill] sm:$0xff] %v4953_v29  ;;  %1328 = vperm.xlu0 %3789, %v4904_v25   ;;  %1192 = vperm.xlu2 %3782, %v4888_v28  }
 0x223   :  { %1188 = vperm.xlu1 %3781, %v4960_v17  }
 0x226   :  { %v4963_v49 = vpop.permute.xlu0 %1020 }
 0x227   :  { %7783 = vst [vmem:[#allocation117_spill] sm:$0xff] %v4963_v49 }
 0x228   :  { %v4965_v20 = vpop.permute.xlu2 %1036  ;;  %v4967_v19 = vpop.permute.xlu1 %996 }
 0x229   :  { %7784 = vst [vmem:[#allocation118_spill] sm:$0xff] %v4965_v20  ;;  %v7830_v20 = vmov 23  }
 0x22a   :  { %7785 = vst [vmem:[#allocation119_spill] sm:$0xff] %v4967_v19  ;;  %3792 = vset.pattern.permute.xlu0 %v7539_v36  ;;  %3785 = vset.pattern.permute.xlu2 %v3999_v14 }
 0x22b   :  { %3784 = vset.pattern.permute.xlu1 %v3999_v14  ;;  %1356 = vperm.xlu0 %3792, %v4882_v52  }
 0x22c   :  { %1220 = vperm.xlu2 %3785, %v4915_v5   ;;  %1216 = vperm.xlu1 %3784, %v4923_v32  }
 0x22e   :  { %v4975_v8 = vpop.permute.xlu0 %1040 }
 0x22f   :  { %7786 = vst [vmem:[#allocation120_spill] sm:$0xff] %v4975_v8 }
 0x230   :  { %v4977_v54 = vpop.permute.xlu2 %1048  ;;  %v4979_v63 = vpop.permute.xlu1 %1002 }
 0x231   :  { %7787 = vst [vmem:[#allocation121_spill] sm:$0xff] %v4977_v54 }
 0x232   :  { %7788 = vst [vmem:[#allocation122_spill] sm:$0xff] %v4979_v63 }
 0x233   :  { %1376 = vperm.xlu0 %3792, %v4904_v25  }
 0x234   :  { %1228 = vperm.xlu2 %3785, %v4938_v6   ;;  %1224 = vperm.xlu1 %3784, %v4946_v24  }
 0x237   :  { %v4984_v36 = vpop.permute.xlu0 %1068 }
 0x238   :  { %7789 = vst [vmem:[#allocation123_spill] sm:$0xff] %v4984_v36  ;;  %v4986_v14 = vpop.permute.xlu1 %1024  ;;  %v7795_v36 = vmov 19  }
 0x239   :  { %7790 = vst [vmem:[#allocation124_spill] sm:$0xff] %v4986_v14  ;;  %v4988_v26 = vpop.permute.xlu2 %1076 }
 0x23a   :  { %7791 = vst [vmem:[#allocation125_spill] sm:$0xff] %v4988_v26  ;;  %v7840_v26 = vmov 24  }
 0x23b   :  { %3795 = vset.pattern.permute.xlu0 %v7541_v40 }
 0x23c   :  { %1240 = vperm.xlu2 %3785, %v4888_v28   ;;  %1236 = vperm.xlu1 %3784, %v4960_v17  }
 0x23d   :  { %1404 = vperm.xlu0 %3795, %v4882_v52  }
 0x23f   :  { %v4994_v21 = vpop.permute.xlu0 %1088 }
 0x240   :  { %7792 = vst [vmem:[#allocation126_spill] sm:$0xff] %v4994_v21  ;;  %v4996_v47 = vpop.permute.xlu1 %1032 }
 0x241   :  { %7793 = vst [vmem:[#allocation127_spill] sm:$0xff] %v4996_v47  ;;  %v4998_v23 = vpop.permute.xlu2 %1084 }
 0x242   :  { %7794 = vst [vmem:[#allocation128_spill] sm:$0xff] %v4998_v23 }
 0x244   :  { %3788 = vset.pattern.permute.xlu2 %v7795_v36  ;;  %3787 = vset.pattern.permute.xlu1 %v7795_v36 }
 0x245   :  { %1424 = vperm.xlu0 %3795, %v4904_v25   ;;  %1268 = vperm.xlu2 %3788, %v4915_v5  }
 0x246   :  { %1264 = vperm.xlu1 %3787, %v4923_v32  }
 0x248   :  { %v5005_v40 = vpop.permute.xlu0 %1116 }
 0x249   :  { %7796 = vst [vmem:[#allocation129_spill] sm:$0xff] %v5005_v40  ;;  %v5007_v14 = vpop.permute.xlu1 %1044  ;;  %v5009_v35 = vpop.permute.xlu2 %1096 }
 0x24a   :  { %7797 = vst [vmem:[#allocation130_spill] sm:$0xff] %v5007_v14 }
 0x24b   :  { %7798 = vst [vmem:[#allocation131_spill] sm:$0xff] %v5009_v35 }
 0x24d   :  { %3798 = vset.pattern.permute.xlu0 %v7543_v10  ;;  %1276 = vperm.xlu2 %3788, %v4938_v6  }
 0x24e   :  { %1272 = vperm.xlu1 %3787, %v4946_v24   ;;  %1452 = vperm.xlu0 %3798, %v4882_v52  }
 0x250   :  { %v5015_v36 = vpop.permute.xlu0 %1136 }
 0x251   :  { %7799 = vst [vmem:[#allocation132_spill] sm:$0xff] %v5015_v36  ;;  %v7545_v36 = vmov 24  }
 0x252   :  { %v5017_v45 = vpop.permute.xlu1 %1072 }
 0x253   :  { %7800 = vst [vmem:[#allocation133_spill] sm:$0xff] %v5017_v45  ;;  %v5019_v53 = vpop.permute.xlu2 %1124 }
 0x254   :  { %7801 = vst [vmem:[#allocation134_spill] sm:$0xff] %v5019_v53 }
 0x255   :  { %1288 = vperm.xlu2 %3788, %v4888_v28  }
 0x256   :  { %1284 = vperm.xlu1 %3787, %v4960_v17   ;;  %1472 = vperm.xlu0 %3798, %v4904_v25  }
 0x259   :  { %v5024_v40 = vpop.permute.xlu0 %1164 }
 0x25a   :  { %7802 = vst [vmem:[#allocation135_spill] sm:$0xff] %v5024_v40  ;;  %v5026_v10 = vpop.permute.xlu1 %1080 }
 0x25b   :  { %7803 = vst [vmem:[#allocation136_spill] sm:$0xff] %v5026_v10  ;;  %v5028_v41 = vpop.permute.xlu2 %1132 }
 0x25c   :  { %7804 = vst [vmem:[#allocation137_spill] sm:$0xff] %v5028_v41 }
 0x25d   :  { %3791 = vset.pattern.permute.xlu2 %v7805_v57 }
 0x25e   :  { %3790 = vset.pattern.permute.xlu1 %v7805_v57  ;;  %3801 = vset.pattern.permute.xlu0 %v7545_v36 }
 0x25f   :  { %1316 = vperm.xlu2 %3791, %v4915_v5   ;;  %1312 = vperm.xlu1 %3790, %v4923_v32  }
 0x260   :  { %1500 = vperm.xlu0 %3801, %v4882_v52  }
 0x261   :  { %v5036_v45 = vpop.permute.xlu0 %1184 }
 0x262   :  { %7806 = vst [vmem:[#allocation138_spill] sm:$0xff] %v5036_v45  ;;  %v5038_v40 = vpop.permute.xlu1 %1092  ;;  %v7547_v45 = vmov 25  }
 0x263   :  { %7807 = vst [vmem:[#allocation139_spill] sm:$0xff] %v5038_v40  ;;  %v5040_v10 = vpop.permute.xlu2 %1144 }
 0x264   :  { %7808 = vst [vmem:[#allocation140_spill] sm:$0xff] %v5040_v10 }
 0x267   :  { %1324 = vperm.xlu2 %3791, %v4938_v6   ;;  %1320 = vperm.xlu1 %3790, %v4946_v24  }
 0x268   :  { %1520 = vperm.xlu0 %3801, %v4904_v25  }
 0x26a   :  { %v5045_v57 = vpop.permute.xlu0 %1212 }
 0x26b   :  { %7809 = vst [vmem:[#allocation141_spill] sm:$0xff] %v5045_v57  ;;  %v5047_v36 = vpop.permute.xlu1 %1120  ;;  %v7814_v57 = vmov 21  }
 0x26c   :  { %7810 = vst [vmem:[#allocation142_spill] sm:$0xff] %v5047_v36  ;;  %v5049_v47 = vpop.permute.xlu2 %1172 }
 0x26f   :  { %1336 = vperm.xlu2 %3791, %v4888_v28   ;;  %1332 = vperm.xlu1 %3790, %v4960_v17  }
 0x270   :  { %3804 = vset.pattern.permute.xlu0 %v7547_v45 }
 0x271   :  { %1548 = vperm.xlu0 %3804, %v4882_v52  }
 0x272   :  { %v5055_v41 = vpop.permute.xlu0 %1232 }
 0x273   :  { %7811 = vst [vmem:[#allocation143_spill] sm:$0xff] %v5055_v41  ;;  %v5057_v53 = vpop.permute.xlu1 %1128 }
 0x274   :  { %7812 = vst [vmem:[#allocation144_spill] sm:$0xff] %v5057_v53  ;;  %v5059_v15 = vpop.permute.xlu2 %1180 }
 0x275   :  { %7813 = vst [vmem:[#allocation145_spill] sm:$0xff] %v5059_v15  ;;  %v7549_v15 = vmov 26  }
 0x277   :  { %3794 = vset.pattern.permute.xlu2 %v7814_v57  ;;  %3793 = vset.pattern.permute.xlu1 %v7814_v57 }
 0x278   :  { %1364 = vperm.xlu2 %3794, %v4915_v5   ;;  %1360 = vperm.xlu1 %3793, %v4923_v32  }
 0x279   :  { %1568 = vperm.xlu0 %3804, %v4904_v25  }
 0x27b   :  { %v5066_v36 = vpop.permute.xlu0 %1260 }
 0x27c   :  { %7815 = vst [vmem:[#allocation146_spill] sm:$0xff] %v5066_v36  ;;  %v5068_v45 = vpop.permute.xlu1 %1140  ;;  %v5070_v19 = vpop.permute.xlu2 %1192 }
 0x27d   :  { %7816 = vst [vmem:[#allocation147_spill] sm:$0xff] %v5068_v45 }
 0x280   :  { %1372 = vperm.xlu2 %3794, %v4938_v6   ;;  %1368 = vperm.xlu1 %3793, %v4946_v24  }
 0x281   :  { %3807 = vset.pattern.permute.xlu0 %v7549_v15  ;;  %v7821_v15 = vmov 22  }
 0x282   :  { %1596 = vperm.xlu0 %3807, %v4882_v52  }
 0x283   :  { %v5076_v57 = vpop.permute.xlu0 %1280 }
 0x284   :  { %7817 = vst [vmem:[#allocation148_spill] sm:$0xff] %v5076_v57  ;;  %v7551_v57 = vmov 27  }
 0x285   :  { %v5078_v53 = vpop.permute.xlu1 %1168 }
 0x286   :  { %v5080_v41 = vpop.permute.xlu2 %1220 }
 0x288   :  { %1384 = vperm.xlu2 %3794, %v4888_v28   ;;  %1380 = vperm.xlu1 %3793, %v4960_v17  }
 0x28a   :  { %1616 = vperm.xlu0 %3807, %v4904_v25  }
 0x28c   :  { %v5085_v36 = vpop.permute.xlu0 %1308 }
 0x28d   :  { %7818 = vst [vmem:[#allocation149_spill] sm:$0xff] %v5085_v36  ;;  %v5087_v49 = vpop.permute.xlu1 %1176 }
 0x28e   :  { %7819 = vst [vmem:[#allocation150_spill] sm:$0xff] %v5087_v49  ;;  %v5089_v23 = vpop.permute.xlu2 %1228 }
 0x28f   :  { %7820 = vst [vmem:[#allocation151_spill] sm:$0xff] %v5089_v23 }
 0x290   :  { %3797 = vset.pattern.permute.xlu2 %v7821_v15  ;;  %3796 = vset.pattern.permute.xlu1 %v7821_v15 }
 0x291   :  { %1412 = vperm.xlu2 %3797, %v4915_v5   ;;  %1408 = vperm.xlu1 %3796, %v4923_v32  }
 0x292   :  { %3810 = vset.pattern.permute.xlu0 %v7551_v57  ;;  %v7826_v57 = vld [vmem:[#allocation43_spill] sm:$0xff] }
 0x293   :  { %1644 = vperm.xlu0 %3810, %v4882_v52  }
 0x294   :  { %v5097_v29 = vpop.permute.xlu0 %1328 }
 0x295   :  { %7822 = vst [vmem:[#allocation152_spill] sm:$0xff] %v5097_v29  ;;  %v5099_v36 = vpop.permute.xlu1 %1188  ;;  %v7910_v29 = vmov 0.0  }
 0x296   :  { %7823 = vst [vmem:[#allocation153_spill] sm:$0xff] %v5099_v36  ;;  %v5101_v49 = vpop.permute.xlu2 %1240  ;;  %v7555_v36 = vmov 28   ;;  %v5405_v13 = vsel %vm1008_vm10, 1.0, %v7910_v29 }
 0x297   :  { %7824 = vst [vmem:[#allocation154_spill] sm:$0xff] %v5101_v49  ;;  %v5410_v37 = vperm.slane %v5405_v13, 0 }
 0x298   :  { %7911 = vst [vmem:[#allocation218_spill] sm:$0xff] %v5405_v13 }
 0x299   :  { %1420 = vperm.xlu2 %3797, %v4938_v6   ;;  %1416 = vperm.xlu1 %3796, %v4946_v24   ;;  %7912 = vst [vmem:[#allocation219_spill] sm:$0xff] %v5410_v37 }
 0x29b   :  { %1664 = vperm.xlu0 %3810, %v4904_v25  }
 0x29d   :  { %v5106_v15 = vpop.permute.xlu0 %1356 }
 0x29e   :  { %7825 = vst [vmem:[#allocation155_spill] sm:$0xff] %v5106_v15  ;;  %v5108_v23 = vpop.permute.xlu1 %1216 }
 0x29f   :  { %v5110_v21 = vpop.permute.xlu2 %1268 }
 0x2a1   :  { %1432 = vperm.xlu2 %3797, %v4888_v28   ;;  %1428 = vperm.xlu1 %3796, %v4960_v17  }
 0x2a3   :  { %1691 = vrot.lane.b32.xlu0 %v7826_v57, %s4009_s26 }
 0x2a4   :  { %3814 = vset.pattern.permute.xlu0 %v7555_v36 }
 0x2a5   :  { %v5117_v31 = vpop.permute.xlu0 %1376 }
 0x2a6   :  { %7827 = vst [vmem:[#allocation156_spill] sm:$0xff] %v5117_v31  ;;  %v5119_v10 = vpop.permute.xlu1 %1224  ;;  %v7885_v31 = vld [vmem:[#allocation63_spill] sm:$0xff] }
 0x2a7   :  { %7828 = vst [vmem:[#allocation157_spill] sm:$0xff] %v5119_v10  ;;  %v5121_v15 = vpop.permute.xlu2 %1276  ;;  %v7835_v10 = vld [vmem:[#allocation64_spill] sm:$0xff] }
 0x2a8   :  { %7829 = vst [vmem:[#allocation158_spill] sm:$0xff] %v5121_v15 }
 0x2a9   :  { %3800 = vset.pattern.permute.xlu2 %v7830_v20  ;;  %3799 = vset.pattern.permute.xlu1 %v7830_v20 }
 0x2aa   :  { %1460 = vperm.xlu2 %3800, %v4915_v5   ;;  %1456 = vperm.xlu1 %3799, %v4923_v32  }
 0x2ab   :  { %1697 = vrot.lane.b32.xlu0 %v7831_v61, %s4009_s26 }
 0x2ae   :  { %v5129_v46 = vpop.permute.xlu1 %1236 }
 0x2af   :  { %7832 = vst [vmem:[#allocation159_spill] sm:$0xff] %v5129_v46  ;;  %v5131_v36 = vpop.permute.xlu0 %1404  ;;  %v5133_v12 = vpop.permute.xlu2 %1288 }
 0x2b0   :  { %7833 = vst [vmem:[#allocation160_spill] sm:$0xff] %v5131_v36 }
 0x2b1   :  { %7834 = vst [vmem:[#allocation161_spill] sm:$0xff] %v5133_v12 }
 0x2b2   :  { %1468 = vperm.xlu2 %3800, %v4938_v6   ;;  %1464 = vperm.xlu1 %3799, %v4946_v24  }
 0x2b3   :  { %1703 = vrot.lane.b32.xlu0 %v7835_v10, %s4009_s26 }
 0x2b7   :  { %v5139_v20 = vpop.permute.xlu0 %1424 }
 0x2b8   :  { %7836 = vst [vmem:[#allocation64_spill] sm:$0xff] %v5139_v20  ;;  %v5141_v15 = vpop.permute.xlu1 %1264 }
 0x2b9   :  { %v5143_v56 = vpop.permute.xlu2 %1316 }
 0x2ba   :  { %1480 = vperm.xlu2 %3800, %v4888_v28   ;;  %1476 = vperm.xlu1 %3799, %v4960_v17  }
 0x2bb   :  { %1725 = vperm.xlu0 %3814, %v4923_v32  }
 0x2c0   :  { %v5148_v36 = vpop.permute.xlu1 %1272  ;;  %v5150_v46 = vpop.permute.xlu0 %1452 }
 0x2c1   :  { %7837 = vst [vmem:[#allocation162_spill] sm:$0xff] %v5148_v36  ;;  %v5152_v12 = vpop.permute.xlu2 %1324  ;;  %v7559_v36 = vmov 29  }
 0x2c2   :  { %7838 = vst [vmem:[#allocation163_spill] sm:$0xff] %v5150_v46  ;;  %3803 = vset.pattern.permute.xlu2 %v7840_v26  ;;  %3802 = vset.pattern.permute.xlu1 %v7840_v26 }
 0x2c3   :  { %7839 = vst [vmem:[#allocation164_spill] sm:$0xff] %v5152_v12  ;;  %1745 = vperm.xlu0 %3814, %v4960_v17   ;;  %1508 = vperm.xlu2 %3803, %v4915_v5  }
 0x2c4   :  { %1504 = vperm.xlu1 %3802, %v4923_v32  }
 0x2c8   :  { %v5159_v20 = vpop.permute.xlu1 %1284  ;;  %v5161_v40 = vpop.permute.xlu0 %1472 }
 0x2c9   :  { %7841 = vst [vmem:[#allocation165_spill] sm:$0xff] %v5159_v20  ;;  %v5163_v54 = vpop.permute.xlu2 %1336 }
 0x2ca   :  { %7842 = vst [vmem:[#allocation166_spill] sm:$0xff] %v5161_v40 }
 0x2cb   :  { %3817 = vset.pattern.permute.xlu0 %v7559_v36  ;;  %1516 = vperm.xlu2 %3803, %v4938_v6  }
 0x2cc   :  { %1512 = vperm.xlu1 %3802, %v4946_v24   ;;  %1773 = vperm.xlu0 %3817, %v4923_v32  }
 0x2d1   :  { %v5169_v26 = vpop.permute.xlu1 %1312 }
 0x2d2   :  { %v5171_v46 = vpop.permute.xlu0 %1500  ;;  %v5173_v12 = vpop.permute.xlu2 %1364 }
 0x2d3   :  { %7843 = vst [vmem:[#allocation167_spill] sm:$0xff] %v5171_v46  ;;  %1528 = vperm.xlu2 %3803, %v4888_v28  }
 0x2d4   :  { %7844 = vst [vmem:[#allocation168_spill] sm:$0xff] %v5173_v12  ;;  %1524 = vperm.xlu1 %3802, %v4960_v17   ;;  %1793 = vperm.xlu0 %3817, %v4960_v17  }
 0x2d9   :  { %v5178_v20 = vpop.permute.xlu1 %1320 }
 0x2da   :  { %7845 = vst [vmem:[#allocation169_spill] sm:$0xff] %v5178_v20  ;;  %v5180_v36 = vpop.permute.xlu0 %1520  ;;  %v5182_v40 = vpop.permute.xlu2 %1372 }
 0x2db   :  { %7846 = vst [vmem:[#allocation170_spill] sm:$0xff] %v5180_v36  ;;  %3806 = vset.pattern.permute.xlu2 %v7848_v18 }
 0x2dc   :  { %7847 = vst [vmem:[#allocation171_spill] sm:$0xff] %v5182_v40  ;;  %3805 = vset.pattern.permute.xlu1 %v7848_v18  ;;  %3820 = vset.pattern.permute.xlu0 %v7565_v42  ;;  %v7569_v40 = vmov 31  }
 0x2dd   :  { %1556 = vperm.xlu2 %3806, %v4915_v5   ;;  %1552 = vperm.xlu1 %3805, %v4923_v32  }
 0x2de   :  { %1821 = vperm.xlu0 %3820, %v4923_v32  }
 0x2e1   :  { %v5190_v46 = vpop.permute.xlu1 %1332 }
 0x2e2   :  { %7849 = vst [vmem:[#allocation172_spill] sm:$0xff] %v5190_v46  ;;  %v5192_v20 = vpop.permute.xlu2 %1384 }
 0x2e3   :  { %7850 = vst [vmem:[#allocation173_spill] sm:$0xff] %v5192_v20  ;;  %v5194_v36 = vpop.permute.xlu0 %1548 }
 0x2e4   :  { %7851 = vst [vmem:[#allocation174_spill] sm:$0xff] %v5194_v36 }
 0x2e5   :  { %1564 = vperm.xlu2 %3806, %v4938_v6   ;;  %1560 = vperm.xlu1 %3805, %v4946_v24  }
 0x2e6   :  { %1841 = vperm.xlu0 %3820, %v4960_v17  }
 0x2ea   :  { %v5199_v18 = vpop.permute.xlu1 %1360 }
 0x2eb   :  { %7852 = vst [vmem:[#allocation175_spill] sm:$0xff] %v5199_v18  ;;  %v5201_v42 = vpop.permute.xlu0 %1568  ;;  %v5203_v12 = vpop.permute.xlu2 %1412  ;;  %v7858_v18 = vmov 26  }
 0x2ec   :  { %7853 = vst [vmem:[#allocation176_spill] sm:$0xff] %v5201_v42 }
 0x2ed   :  { %7854 = vst [vmem:[#allocation177_spill] sm:$0xff] %v5203_v12  ;;  %1576 = vperm.xlu2 %3806, %v4888_v28   ;;  %1572 = vperm.xlu1 %3805, %v4960_v17  }
 0x2ee   :  { %3823 = vset.pattern.permute.xlu0 %v7569_v40 }
 0x2ef   :  { %1869 = vperm.xlu0 %3823, %v4923_v32  }
 0x2f2   :  { %v5209_v36 = vpop.permute.xlu1 %1368 }
 0x2f3   :  { %7855 = vst [vmem:[#allocation178_spill] sm:$0xff] %v5209_v36  ;;  %v5211_v20 = vpop.permute.xlu2 %1420 }
 0x2f4   :  { %7856 = vst [vmem:[#allocation179_spill] sm:$0xff] %v5211_v20  ;;  %v5213_v62 = vpop.permute.xlu0 %1596 }
 0x2f5   :  { %7857 = vst [vmem:[#allocation180_spill] sm:$0xff] %v5213_v62  ;;  %3809 = vset.pattern.permute.xlu2 %v7858_v18  ;;  %3808 = vset.pattern.permute.xlu1 %v7858_v18  ;;  %v7571_v62 = vmov 32  }
 0x2f6   :  { %1604 = vperm.xlu2 %3809, %v4915_v5   ;;  %1600 = vperm.xlu1 %3808, %v4923_v32  }
 0x2f7   :  { %1889 = vperm.xlu0 %3823, %v4960_v17  }
 0x2fa   :  { %v5220_v42 = vpop.permute.xlu1 %1380 }
 0x2fb   :  { %7859 = vst [vmem:[#allocation181_spill] sm:$0xff] %v5220_v42  ;;  %v5222_v40 = vpop.permute.xlu2 %1432 }
 0x2fc   :  { %7860 = vst [vmem:[#allocation182_spill] sm:$0xff] %v5222_v40  ;;  %v5224_v12 = vpop.permute.xlu0 %1616 }
 0x2fd   :  { %7861 = vst [vmem:[#allocation183_spill] sm:$0xff] %v5224_v12 }
 0x2fe   :  { %1612 = vperm.xlu2 %3809, %v4938_v6   ;;  %1608 = vperm.xlu1 %3808, %v4946_v24  }
 0x2ff   :  { %3826 = vset.pattern.permute.xlu0 %v7571_v62  ;;  %v7868_v62 = vmov 27  }
 0x300   :  { %1917 = vperm.xlu0 %3826, %v4923_v32  }
 0x303   :  { %v5230_v18 = vpop.permute.xlu1 %1408 }
 0x304   :  { %7862 = vst [vmem:[#allocation184_spill] sm:$0xff] %v5230_v18  ;;  %v5232_v36 = vpop.permute.xlu2 %1460 }
 0x305   :  { %7863 = vst [vmem:[#allocation185_spill] sm:$0xff] %v5232_v36  ;;  %v5234_v20 = vpop.permute.xlu0 %1644 }
 0x306   :  { %7864 = vst [vmem:[#allocation186_spill] sm:$0xff] %v5234_v20  ;;  %1624 = vperm.xlu2 %3809, %v4888_v28   ;;  %1620 = vperm.xlu1 %3808, %v4960_v17   ;;  %v7573_v20 = vmov 33  }
 0x308   :  { %1937 = vperm.xlu0 %3826, %v4960_v17  }
 0x30b   :  { %v5239_v12 = vpop.permute.xlu1 %1416 }
 0x30c   :  { %7865 = vst [vmem:[#allocation187_spill] sm:$0xff] %v5239_v12  ;;  %v5241_v42 = vpop.permute.xlu2 %1468 }
 0x30d   :  { %7866 = vst [vmem:[#allocation188_spill] sm:$0xff] %v5241_v42  ;;  %v5243_v49 = vpop.permute.xlu0 %1664 }
 0x30e   :  { %7867 = vst [vmem:[#allocation189_spill] sm:$0xff] %v5243_v49  ;;  %3812 = vset.pattern.permute.xlu2 %v7868_v62  ;;  %3811 = vset.pattern.permute.xlu1 %v7868_v62 }
 0x30f   :  { %1652 = vperm.xlu2 %3812, %v4915_v5   ;;  %1648 = vperm.xlu1 %3811, %v4923_v32  }
 0x310   :  { %3829 = vset.pattern.permute.xlu0 %v7573_v20  ;;  %v7577_v20 = vmov 34  }
 0x311   :  { %1965 = vperm.xlu0 %3829, %v4923_v32  }
 0x313   :  { %v5251_v18 = vpop.permute.xlu1 %1428 }
 0x314   :  { %7869 = vst [vmem:[#allocation190_spill] sm:$0xff] %v5251_v18  ;;  %v5253_v12 = vpop.permute.xlu2 %1480 }
 0x315   :  { %7870 = vst [vmem:[#allocation191_spill] sm:$0xff] %v5253_v12  ;;  %v5255_v42 = vpop.permute.xlu0 %1691 }
 0x316   :  { %7871 = vst [vmem:[#allocation192_spill] sm:$0xff] %v5255_v42 }
 0x317   :  { %1660 = vperm.xlu2 %3812, %v4938_v6   ;;  %1656 = vperm.xlu1 %3811, %v4946_v24  }
 0x319   :  { %1985 = vperm.xlu0 %3829, %v4960_v17  }
 0x31c   :  { %v5260_v62 = vpop.permute.xlu1 %1456 }
 0x31d   :  { %7872 = vst [vmem:[#allocation193_spill] sm:$0xff] %v5260_v62  ;;  %v5262_v36 = vpop.permute.xlu0 %1697  ;;  %v5264_v14 = vpop.permute.xlu2 %1508  ;;  %v7877_v62 = vld [vmem:[#allocation48_spill] sm:$0xff] }
 0x31e   :  { %7873 = vst [vmem:[#allocation194_spill] sm:$0xff] %v5262_v36  ;;  %v7878_v36 = vld [vmem:[#allocation45_spill] sm:$0xff] }
 0x31f   :  { %1672 = vperm.xlu2 %3812, %v4888_v28   ;;  %1668 = vperm.xlu1 %3811, %v4960_v17  }
 0x321   :  { %3832 = vset.pattern.permute.xlu0 %v7577_v20 }
 0x322   :  { %2013 = vperm.xlu0 %3832, %v4923_v32  }
 0x324   :  { %v5270_v42 = vpop.permute.xlu1 %1464 }
 0x325   :  { %7874 = vst [vmem:[#allocation195_spill] sm:$0xff] %v5270_v42  ;;  %v5272_v12 = vpop.permute.xlu0 %1703  ;;  %v5274_v18 = vpop.permute.xlu2 %1516 }
 0x326   :  { %7875 = vst [vmem:[#allocation196_spill] sm:$0xff] %v5272_v12 }
 0x327   :  { %7876 = vst [vmem:[#allocation197_spill] sm:$0xff] %v5274_v18  ;;  %1695 = vrot.lane.b32.xlu2 %v7877_v62, %s4009_s26  ;;  %1693 = vrot.lane.b32.xlu1 %v7878_v36, %s4009_s26  ;;  %v7882_v18 = vld [vmem:[#allocation58_spill] sm:$0xff] }
 0x328   :  { %3813 = vset.pattern.permute.xlu2 %v7879_v60  ;;  %3815 = vset.pattern.permute.xlu1 %v7879_v60 }
 0x32a   :  { %2033 = vperm.xlu0 %3832, %v4960_v17  }
 0x32c   :  { %v5283_v20 = vpop.permute.xlu1 %1476 }
 0x32d   :  { %7880 = vst [vmem:[#allocation48_spill] sm:$0xff] %v5283_v20  ;;  %v5285_v34 = vpop.permute.xlu0 %1725  ;;  %v5287_v42 = vpop.permute.xlu2 %1528 }
 0x32e   :  { %7881 = vst [vmem:[#allocation198_spill] sm:$0xff] %v5285_v34 }
 0x32f   :  { %1701 = vrot.lane.b32.xlu2 %v7882_v18, %s4009_s26  ;;  %1699 = vrot.lane.b32.xlu1 %v7883_v39, %s4009_s26 }
 0x332   :  { %2058 = vrot.lane.b32.xlu0 %v7878_v36, %s4017_s27 }
 0x333   :  { %3836 = vset.pattern.permute.xlu0 %v7587_v30 }
 0x335   :  { %v5296_v60 = vpop.permute.xlu0 %1745 }
 0x336   :  { %7884 = vst [vmem:[#allocation199_spill] sm:$0xff] %v5296_v60  ;;  %v5298_v51 = vpop.permute.xlu1 %1504 }
 0x337   :  { %1721 = vperm.xlu2 %3813, %v4882_v52   ;;  %v5301_v34 = vpop.permute.xlu2 %1556  ;;  %1705 = vrot.lane.b32.xlu1 %v7885_v31, %s4009_s26  ;;  %s4035_s26 = smov 3  }
 0x33a   :  { %2064 = vrot.lane.b32.xlu0 %v7883_v39, %s4017_s27 }
 0x33e   :  { %v5307_v8 = vpop.permute.xlu1 %1512  ;;  %v5309_v58 = vpop.permute.xlu0 %1773 }
 0x33f   :  { %7886 = vst [vmem:[#allocation63_spill] sm:$0xff] %v5307_v8  ;;  %1733 = vperm.xlu2 %3813, %v4946_v24   ;;  %v5312_v30 = vpop.permute.xlu2 %1564  ;;  %1729 = vperm.xlu1 %3815, %v4915_v5   ;;  %v7892_v8 = vmov 29  }
 0x340   :  { %7887 = vst [vmem:[#allocation200_spill] sm:$0xff] %v5309_v58 }
 0x341   :  { %7888 = vst [vmem:[#allocation201_spill] sm:$0xff] %v5312_v30 }
 0x342   :  { %2070 = vrot.lane.b32.xlu0 %v7885_v31, %s4017_s27 }
 0x346   :  { %v5317_v60 = vpop.permute.xlu1 %1524  ;;  %v5319_v44 = vpop.permute.xlu0 %1793 }
 0x347   :  { %7889 = vst [vmem:[#allocation202_spill] sm:$0xff] %v5317_v60  ;;  %1741 = vperm.xlu2 %3813, %v4904_v25   ;;  %v5322_v20 = vpop.permute.xlu2 %1576  ;;  %1737 = vperm.xlu1 %3815, %v4938_v6  }
 0x348   :  { %7890 = vst [vmem:[#allocation203_spill] sm:$0xff] %v5319_v44 }
 0x349   :  { %7891 = vst [vmem:[#allocation204_spill] sm:$0xff] %v5322_v20 }
 0x34a   :  { %2094 = vperm.xlu0 %3836, %v4915_v5  }
 0x34f   :  { %3816 = vset.pattern.permute.xlu2 %v7892_v8  ;;  %1749 = vperm.xlu1 %3815, %v4888_v28   ;;  %v5328_v30 = vpop.permute.xlu1 %1552 }
 0x350   :  { %v5330_v58 = vpop.permute.xlu0 %1821  ;;  %1769 = vperm.xlu2 %3816, %v4882_v52   ;;  %v5333_v60 = vpop.permute.xlu2 %1604  ;;  %v1580_v63 = vmul.f32 %v5328_v30, %v7878_v36 }
 0x351   :  { %7893 = vst [vmem:[#allocation205_spill] sm:$0xff] %v5330_v58 }
 0x352   :  { %2114 = vperm.xlu0 %3836, %v4888_v28  }
 0x357   :  { %3818 = vset.pattern.permute.xlu1 %v7892_v8  ;;  %v5337_v44 = vpop.permute.xlu1 %1560 }
 0x358   :  { %7894 = vst [vmem:[#allocation206_spill] sm:$0xff] %v5337_v44  ;;  %v5339_v20 = vpop.permute.xlu0 %1841  ;;  %1781 = vperm.xlu2 %3816, %v4946_v24   ;;  %v5342_v45 = vpop.permute.xlu2 %1612  ;;  %1777 = vperm.xlu1 %3818, %v4915_v5  }
 0x359   :  { %7895 = vst [vmem:[#allocation207_spill] sm:$0xff] %v5339_v20 }
 0x35a   :  { %7896 = vst [vmem:[#allocation208_spill] sm:$0xff] %v5342_v45  ;;  %3839 = vset.pattern.permute.xlu0 %v7593_v59  ;;  %v7899_v45 = vmov 30  }
 0x35b   :  { %2142 = vperm.xlu0 %3839, %v4915_v5  }
 0x35f   :  { %v5347_v58 = vpop.permute.xlu1 %1572 }
 0x360   :  { %7897 = vst [vmem:[#allocation209_spill] sm:$0xff] %v5347_v58  ;;  %1789 = vperm.xlu2 %3816, %v4904_v25   ;;  %v5350_v8 = vpop.permute.xlu2 %1624  ;;  %1785 = vperm.xlu1 %3818, %v4938_v6  }
 0x361   :  { %7898 = vst [vmem:[#allocation210_spill] sm:$0xff] %v5350_v8  ;;  %v5353_v44 = vpop.permute.xlu0 %1869 }
 0x363   :  { %2162 = vperm.xlu0 %3839, %v4888_v28  }
 0x368   :  { %3819 = vset.pattern.permute.xlu2 %v7899_v45  ;;  %1797 = vperm.xlu1 %3818, %v4888_v28   ;;  %v5358_v20 = vpop.permute.xlu1 %1600 }
 0x369   :  { %v5360_v59 = vpop.permute.xlu0 %1889  ;;  %1817 = vperm.xlu2 %3819, %v4882_v52   ;;  %v5363_v58 = vpop.permute.xlu2 %1652 }
 0x36a   :  { %7900 = vst [vmem:[#allocation211_spill] sm:$0xff] %v5360_v59 }
 0x36b   :  { %3842 = vset.pattern.permute.xlu0 %v7597_v11 }
 0x36c   :  { %2190 = vperm.xlu0 %3842, %v4915_v5  }
 0x370   :  { %3821 = vset.pattern.permute.xlu1 %v7899_v45  ;;  %v5368_v8 = vpop.permute.xlu1 %1608 }
 0x371   :  { %7901 = vst [vmem:[#allocation212_spill] sm:$0xff] %v5368_v8  ;;  %1829 = vperm.xlu2 %3819, %v4946_v24   ;;  %v5371_v40 = vpop.permute.xlu2 %1660  ;;  %1825 = vperm.xlu1 %3821, %v4915_v5   ;;  %v7603_v8 = vmov 38  }
 0x372   :  { %7902 = vst [vmem:[#allocation213_spill] sm:$0xff] %v5371_v40  ;;  %v5374_v59 = vpop.permute.xlu0 %1917  ;;  %v7905_v40 = vmov 31  }
 0x374   :  { %2210 = vperm.xlu0 %3842, %v4888_v28  }
 0x378   :  { %v5377_v35 = vpop.permute.xlu1 %1620 }
 0x379   :  { %7903 = vst [vmem:[#allocation214_spill] sm:$0xff] %v5377_v35  ;;  %1837 = vperm.xlu2 %3819, %v4904_v25   ;;  %v5380_v11 = vpop.permute.xlu2 %1672  ;;  %1833 = vperm.xlu1 %3821, %v4938_v6  }
 0x37a   :  { %v5383_v45 = vpop.permute.xlu0 %1937 }
 0x37b   :  { %7904 = vst [vmem:[#allocation215_spill] sm:$0xff] %v5383_v45 }
 0x37c   :  { %3845 = vset.pattern.permute.xlu0 %v7603_v8 }
 0x37d   :  { %2238 = vperm.xlu0 %3845, %v4915_v5  }
 0x381   :  { %3822 = vset.pattern.permute.xlu2 %v7905_v40  ;;  %v5388_v4 = vpop.permute.xlu2 %1695  ;;  %1845 = vperm.xlu1 %3821, %v4888_v28   ;;  %v1649_v35 = vpop.permute.xlu1 %1648 }
 0x382   :  { %1865 = vperm.xlu2 %3822, %v4882_v52  }
 0x383   :  { %v1966_v43 = vpop.permute.xlu0 %1965 }
 0x385   :  { %2258 = vperm.xlu0 %3845, %v4888_v28  }
 0x389   :  { %v5395_v8 = vpop.permute.xlu2 %1701  ;;  %3824 = vset.pattern.permute.xlu1 %v7905_v40  ;;  %v5398_v45 = vpop.permute.xlu1 %1656  ;;  %v5415_v40 = vld [vmem:[%s7495_s1] sm:$0x3]  ;;  %s4025_s1 = smov 104  }
 0x38a   :  { %7907 = vst [vmem:[#allocation72_spill] sm:$0xff] %v5395_v8  ;;  %1877 = vperm.xlu2 %3822, %v4946_v24   ;;  %1873 = vperm.xlu1 %3824, %v4915_v5   ;;  %vm1707_vm11 = vcmp.ge.f32.partialorder %v5415_v40, -1.0  ;;  %vm1708_vm12 = vcmp.le.f32.partialorder %v5415_v40, 6.0  ;;  %vm2072_vm14 = vcmp.ge.f32.partialorder %v5415_v40, -2.0  ;;  %vm2073_vm15 = vcmp.le.f32.partialorder %v5415_v40, 5.0 }
 0x38b   :  { %7908 = vst [vmem:[#allocation216_spill] sm:$0xff] %v5398_v45  ;;  %v5402_v49 = vpop.permute.xlu0 %1985  ;;  %vm1709_vm13 = vmand %vm1707_vm11, %vm1708_vm12  ;;  %vm2437_vm2 = vcmp.ge.f32.partialorder %v5415_v40, -3.0  ;;  %vm2438_vm3 = vcmp.le.f32.partialorder %v5415_v40, 4.0 }
 0x38c   :  { %7909 = vst [vmem:[#allocation217_spill] sm:$0xff] %v5402_v49  ;;  %v5432_v12 = vsel %vm1709_vm13, 1.0, %v7910_v29  ;;  %vm2074_vm0 = vmand %vm2072_vm14, %vm2073_vm15 }
 0x38d   :  { %3848 = vset.pattern.permute.xlu0 %v7605_v7  ;;  %v5427_v7 = vmul.f32 %v5410_v37, %v4869_v50  ;;  %7916 = vst [vmem:[#allocation223_spill] sm:$0xff] %v5432_v12  ;;  %v5442_v50 = vperm.slane %v5432_v12, 0  ;;  %vm2439_vm4 = vmand %vm2437_vm2, %vm2438_vm3 }
 0x38e   :  { %2286 = vperm.xlu0 %3848, %v4915_v5  }
 0x38f   :  { %7915 = vst [vmem:[#allocation222_spill] sm:$0xff] %v5427_v7  ;;  %v1196_v8 = vmul.f32 %v5078_v53, %v5427_v7  ;;  %v1340_v46 = vmul.f32 %v5169_v26, %v5427_v7  ;;  %v1532_v53 = vmul.f32 %v5298_v51, %v7878_v36  ;;  %v1676_v26 = vmul.f32 %v1649_v35, %v7878_v36 }
 0x390   :  { %7917 = vst [vmem:[#allocation224_spill] sm:$0xff] %v5442_v50 }
 0x391   :  { %v5419_v45 = vpop.permute.xlu2 %1721  ;;  %v5421_v49 = vpop.permute.xlu1 %1668  ;;  %v1204_v39 = vadd.f32 %v1196_v8, %v4703_v33  ;;  %v1348_v33 = vadd.f32 %v1340_v46, %v4724_v16 }
 0x392   :  { %7913 = vst [vmem:[#allocation220_spill] sm:$0xff] %v5419_v45  ;;  %1885 = vperm.xlu2 %3822, %v4904_v25   ;;  %1881 = vperm.xlu1 %3824, %v4938_v6   ;;  %v1244_v45 = vmul.f32 %v5108_v23, %v5427_v7  ;;  %v1628_v23 = vmul.f32 %v5358_v20, %v7878_v36  ;;  %v7617_v36 = vmov 40  }
 0x393   :  { %7914 = vst [vmem:[#allocation221_spill] sm:$0xff] %v5421_v49  ;;  %v1292_v49 = vmul.f32 %v5141_v15, %v5427_v7  ;;  %v7920_v7 = vmov 32   ;;  %v1540_v30 = vadd.f32 %v1532_v53, %v1204_v39 }
 0x394   :  { %v2014_v13 = vpop.permute.xlu0 %2013  ;;  %v1252_v0 = vadd.f32 %v1244_v45, %v4705_v22 }
 0x395   :  { %v1300_v51 = vadd.f32 %v1292_v49, %v4710_v9  ;;  %v7615_v49 = vmov 41  }
 0x396   :  { %2306 = vperm.xlu0 %3848, %v4888_v28   ;;  %v1588_v20 = vadd.f32 %v1580_v63, %v1252_v0 }
 0x397   :  { %v1636_v8 = vadd.f32 %v1628_v23, %v1300_v51 }
 0x399   :  { %v5451_v27 = vpop.permute.xlu2 %1733  ;;  %v1694_v15 = vpop.permute.xlu1 %1693 }
 0x39a   :  { %7918 = vst [vmem:[#allocation225_spill] sm:$0xff] %v5451_v27  ;;  %v5456_v12 = vmul.f32 %v5442_v50, %v1694_v15  ;;  %3825 = vset.pattern.permute.xlu2 %v7920_v7  ;;  %1893 = vperm.xlu1 %3824, %v4888_v28   ;;  %v1684_v15 = vadd.f32 %v1676_v26, %v1348_v33  ;;  %v7931_v26 = vmov 33  }
 0x39b   :  { %1913 = vperm.xlu2 %3825, %v4882_v52  }
 0x39c   :  { %7919 = vst [vmem:[#allocation226_spill] sm:$0xff] %v5456_v12  ;;  %v1897_v22 = vmul.f32 %v5353_v44, %v5456_v12  ;;  %v1945_v35 = vmul.f32 %v5374_v59, %v5456_v12  ;;  %v1993_v45 = vmul.f32 %v1966_v43, %v5456_v12  ;;  %v5468_v27 = vpop.permute.xlu0 %2033  ;;  %v2041_v9 = vmul.f32 %v2014_v13, %v5456_v12 }
 0x39e   :  { %3851 = vset.pattern.permute.xlu0 %v7617_v36  ;;  %v5473_v39 = vadd.f32 %v1897_v22, %v1540_v30  ;;  %v5475_v16 = vadd.f32 %v1945_v35, %v1588_v20  ;;  %v5477_v0 = vadd.f32 %v1993_v45, %v1636_v8  ;;  %v5479_v46 = vadd.f32 %v2041_v9, %v1684_v15 }
 0x39f   :  { %2334 = vperm.xlu0 %3851, %v4915_v5   ;;  %v7613_v8 = vmov 42   ;;  %v7937_v9 = vmov 34  }
 0x3a0   :  { %7921 = vst [vmem:[#allocation227_spill] sm:$0xff] %v5473_v39 }
 0x3a1   :  { %7922 = vst [vmem:[#allocation228_spill] sm:$0xff] %v5475_v16  ;;  %v5481_v44 = vpop.permute.xlu2 %1741  ;;  %v5483_v63 = vpop.permute.xlu1 %1699  ;;  %v7619_v16 = vmov 44  }
 0x3a2   :  { %7923 = vst [vmem:[#allocation229_spill] sm:$0xff] %v5477_v0  ;;  %3827 = vset.pattern.permute.xlu1 %v7920_v7  ;;  %v7621_v0 = vmov 43  }
 0x3a3   :  { %7924 = vst [vmem:[#allocation230_spill] sm:$0xff] %v5479_v46  ;;  %1925 = vperm.xlu2 %3825, %v4946_v24   ;;  %1921 = vperm.xlu1 %3827, %v4915_v5  }
 0x3a4   :  { %7925 = vst [vmem:[#allocation231_spill] sm:$0xff] %v5483_v63  ;;  %v5489_v43 = vpop.permute.xlu0 %2058 }
 0x3a5   :  { %7926 = vst [vmem:[#allocation232_spill] sm:$0xff] %v5489_v43  ;;  %v5610_v43 = vmul.f32 %v5410_v37, %v4928_v3 }
 0x3a7   :  { %2354 = vperm.xlu0 %3851, %v4888_v28  }
 0x3a9   :  { %v5491_v59 = vpop.permute.xlu1 %1705 }
 0x3aa   :  { %v5493_v13 = vpop.permute.xlu2 %1769 }
 0x3ab   :  { %7927 = vst [vmem:[#allocation233_spill] sm:$0xff] %v5493_v13  ;;  %1933 = vperm.xlu2 %3825, %v4904_v25   ;;  %1929 = vperm.xlu1 %3827, %v4938_v6  }
 0x3ac   :  { %v5501_v53 = vpop.permute.xlu0 %2064 }
 0x3ad   :  { %7929 = vst [vmem:[#allocation235_spill] sm:$0xff] %v5501_v53  ;;  %v5738_v53 = vmul.f32 %v5410_v37, %v4926_v48 }
 0x3af   :  { %3854 = vset.pattern.permute.xlu0 %v7615_v49  ;;  %v1341_v48 = vmul.f32 %v5143_v56, %v5738_v53 }
 0x3b0   :  { %2382 = vperm.xlu0 %3854, %v4915_v5  }
 0x3b1   :  { %v5499_v7 = vpop.permute.xlu1 %1729 }
 0x3b2   :  { %7928 = vst [vmem:[#allocation234_spill] sm:$0xff] %v5499_v7  ;;  %v5503_v23 = vpop.permute.xlu2 %1781 }
 0x3b3   :  { %7930 = vst [vmem:[#allocation236_spill] sm:$0xff] %v5503_v23  ;;  %3828 = vset.pattern.permute.xlu2 %v7931_v26  ;;  %1941 = vperm.xlu1 %3827, %v4888_v28   ;;  %v7625_v23 = vmov 47  }
 0x3b4   :  { %1961 = vperm.xlu2 %3828, %v4882_v52   ;;  %v5514_v30 = vpop.permute.xlu0 %2070 }
 0x3b8   :  { %2402 = vperm.xlu0 %3854, %v4888_v28  }
 0x3b9   :  { %v5509_v51 = vpop.permute.xlu1 %1737 }
 0x3ba   :  { %7932 = vst [vmem:[#allocation237_spill] sm:$0xff] %v5509_v51  ;;  %v5511_v33 = vpop.permute.xlu2 %1789 }
 0x3bb   :  { %7933 = vst [vmem:[#allocation238_spill] sm:$0xff] %v5511_v33  ;;  %3830 = vset.pattern.permute.xlu1 %v7931_v26 }
 0x3bc   :  { %1973 = vperm.xlu2 %3828, %v4946_v24   ;;  %1969 = vperm.xlu1 %3830, %v4915_v5   ;;  %v5527_v35 = vpop.permute.xlu0 %2094 }
 0x3bd   :  { %7935 = vst [vmem:[#allocation240_spill] sm:$0xff] %v5527_v35  ;;  %v1202_v35 = vmul.f32 %v5070_v19, %v5610_v43 }
 0x3bf   :  { %v1210_v7 = vadd.f32 %v1202_v35, %v4846_v1 }
 0x3c0   :  { %2425 = vrot.lane.b32.xlu0 %v7877_v62, %s4025_s1 }
 0x3c1   :  { %v5520_v20 = vpop.permute.xlu1 %1749  ;;  %3855 = vset.pattern.permute.xlu0 %v7613_v8 }
 0x3c3   :  { %v5523_v22 = vpop.permute.xlu2 %1817 }
 0x3c4   :  { %7934 = vst [vmem:[#allocation239_spill] sm:$0xff] %v5523_v22  ;;  %1981 = vperm.xlu2 %3828, %v4904_v25   ;;  %1977 = vperm.xlu1 %3830, %v4938_v6   ;;  %v5538_v26 = vpop.permute.xlu0 %2114 }
 0x3c8   :  { %2431 = vrot.lane.b32.xlu0 %v7882_v18, %s4025_s1 }
 0x3ca   :  { %v5531_v45 = vpop.permute.xlu1 %1777 }
 0x3cb   :  { %v5533_v15 = vpop.permute.xlu2 %1829 }
 0x3cc   :  { %7936 = vst [vmem:[#allocation241_spill] sm:$0xff] %v5533_v15  ;;  %3831 = vset.pattern.permute.xlu2 %v7937_v9  ;;  %1989 = vperm.xlu1 %3830, %v4888_v28  }
 0x3cd   :  { %2009 = vperm.xlu2 %3831, %v4882_v52   ;;  %v5549_v36 = vpop.permute.xlu0 %2142 }
 0x3ce   :  { %7940 = vst [vmem:[#allocation244_spill] sm:$0xff] %v5549_v36 }
 0x3d0   :  { %2451 = vperm.xlu0 %3855, %v4882_v52  }
 0x3d2   :  { %v5541_v8 = vpop.permute.xlu1 %1785 }
 0x3d3   :  { %7938 = vst [vmem:[#allocation242_spill] sm:$0xff] %v5541_v8  ;;  %v5543_v49 = vpop.permute.xlu2 %1837 }
 0x3d4   :  { %7939 = vst [vmem:[#allocation243_spill] sm:$0xff] %v5543_v49  ;;  %3833 = vset.pattern.permute.xlu1 %v7937_v9 }
 0x3d5   :  { %2021 = vperm.xlu2 %3831, %v4946_v24   ;;  %2017 = vperm.xlu1 %3833, %v4915_v5   ;;  %v5561_v5 = vpop.permute.xlu0 %2162 }
 0x3d8   :  { %2471 = vperm.xlu0 %3855, %v4904_v25  }
 0x3da   :  { %v5551_v39 = vpop.permute.xlu1 %1797 }
 0x3dc   :  { %v5553_v46 = vpop.permute.xlu2 %1865 }
 0x3dd   :  { %7941 = vst [vmem:[#allocation245_spill] sm:$0xff] %v5553_v46  ;;  %2029 = vperm.xlu2 %3831, %v4904_v25   ;;  %2025 = vperm.xlu1 %3833, %v4938_v6   ;;  %v7944_v46 = vmov 35  }
 0x3e0   :  { %3860 = vset.pattern.permute.xlu0 %v7619_v16 }
 0x3e1   :  { %2571 = vperm.xlu0 %3860, %v4960_v17  }
 0x3e3   :  { %v5559_v9 = vpop.permute.xlu1 %1825 }
 0x3e4   :  { %7942 = vst [vmem:[#allocation246_spill] sm:$0xff] %v5559_v9  ;;  %v5563_v22 = vpop.permute.xlu2 %1877  ;;  %v7970_v9 = vmov 38  }
 0x3e5   :  { %7943 = vst [vmem:[#allocation247_spill] sm:$0xff] %v5563_v22  ;;  %2056 = vrot.lane.b32.xlu2 %v7826_v57, %s4017_s27  ;;  %2037 = vperm.xlu1 %3833, %v4888_v28   ;;  %v5578_v22 = vpop.permute.xlu0 %2190 }
 0x3e6   :  { %3835 = vset.pattern.permute.xlu2 %v7944_v46  ;;  %7947 = vst [vmem:[#allocation250_spill] sm:$0xff] %v5578_v22 }
 0x3e9   :  { %2567 = vperm.xlu0 %3860, %v4904_v25  }
 0x3eb   :  { %v5570_v13 = vpop.permute.xlu1 %1833 }
 0x3ec   :  { %7945 = vst [vmem:[#allocation248_spill] sm:$0xff] %v5570_v13  ;;  %v5572_v16 = vpop.permute.xlu2 %1885 }
 0x3ed   :  { %7946 = vst [vmem:[#allocation249_spill] sm:$0xff] %v5572_v16  ;;  %2062 = vrot.lane.b32.xlu2 %v7831_v61, %s4017_s27  ;;  %2060 = vrot.lane.b32.xlu1 %v7877_v62, %s4017_s27  ;;  %v5591_v15 = vpop.permute.xlu0 %2210 }
 0x3ee   :  { %3834 = vset.pattern.permute.xlu1 %v7944_v46  ;;  %7950 = vst [vmem:[#allocation253_spill] sm:$0xff] %v5591_v15 }
 0x3f1   :  { %3864 = vset.pattern.permute.xlu0 %v7621_v0 }
 0x3f2   :  { %2499 = vperm.xlu0 %3864, %v4882_v52  }
 0x3f3   :  { %v5583_v28 = vpop.permute.xlu1 %1845 }
 0x3f4   :  { %7948 = vst [vmem:[#allocation251_spill] sm:$0xff] %v5583_v28 }
 0x3f5   :  { %2068 = vrot.lane.b32.xlu2 %v7835_v10, %s4017_s27  ;;  %v5587_v16 = vpop.permute.xlu2 %1913  ;;  %2066 = vrot.lane.b32.xlu1 %v7882_v18, %s4017_s27  ;;  %s4036_s27 = smov 127  }
 0x3f6   :  { %7949 = vst [vmem:[#allocation252_spill] sm:$0xff] %v5587_v16  ;;  %v5602_v16 = vpop.permute.xlu0 %2238 }
 0x3fa   :  { %2511 = vperm.xlu0 %3864, %v4946_v24  }
 0x3fc   :  { %v5594_v46 = vpop.permute.xlu1 %1873 }
 0x3fd   :  { %2090 = vperm.xlu2 %3835, %v4923_v32   ;;  %v5597_v0 = vpop.permute.xlu2 %1925  ;;  %2086 = vperm.xlu1 %3834, %v4882_v52  }
 0x3fe   :  { %7951 = vst [vmem:[#allocation254_spill] sm:$0xff] %v5597_v0  ;;  %v5629_v0 = vmul.f32 %v5442_v50, %v5491_v59 }
 0x402   :  { %3875 = vset.pattern.permute.xlu0 %v7625_v23  ;;  %v5619_v23 = vsel %vm2074_vm0, 1.0, %v7910_v29 }
 0x403   :  { %2711 = vperm.xlu0 %3875, %v4904_v25   ;;  %7954 = vst [vmem:[#allocation257_spill] sm:$0xff] %v5619_v23  ;;  %v5625_v3 = vperm.slane %v5619_v23, 0  ;;  %v7958_v23 = vmov 36  }
 0x404   :  { %v5606_v12 = vpop.permute.xlu1 %1881 }
 0x405   :  { %7952 = vst [vmem:[#allocation255_spill] sm:$0xff] %v5606_v12  ;;  %2102 = vperm.xlu2 %3835, %v4938_v6   ;;  %v5613_v52 = vpop.permute.xlu2 %1933  ;;  %2098 = vperm.xlu1 %3834, %v4946_v24   ;;  %v1538_v12 = vmul.f32 %v5287_v42, %v7885_v31  ;;  %v5633_v19 = vmul.f32 %v5625_v3, %v5514_v30  ;;  %v5670_v30 = vld [vmem:[%s7500_s6 + $0x28] sm:$0xff] }
 0x406   :  { %7953 = vst [vmem:[#allocation256_spill] sm:$0xff] %v5613_v52  ;;  %v2259_v52 = vpop.permute.xlu0 %2258 }
 0x407   :  { %7955 = vst [vmem:[#allocation258_spill] sm:$0xff] %v5625_v3  ;;  %v1546_v22 = vadd.f32 %v1538_v12, %v1210_v7  ;;  %v2268_v1 = vmul.f32 %v2259_v52, %v5633_v19  ;;  %v7963_v52 = vmov 37  }
 0x40c   :  { %v1894_v49 = vpop.permute.xlu1 %1893 }
 0x40d   :  { %v1903_v13 = vmul.f32 %v1894_v49, %v5629_v0  ;;  %2110 = vperm.xlu2 %3835, %v4960_v17   ;;  %2106 = vperm.xlu1 %3834, %v4904_v25   ;;  %v5653_v25 = vld [vmem:[%s7500_s6] sm:$0xff] }
 0x40e   :  { %v5638_v42 = vpop.permute.xlu2 %1961 }
 0x40f   :  { %7956 = vst [vmem:[#allocation259_spill] sm:$0xff] %v5638_v42  ;;  %v1911_v35 = vadd.f32 %v1903_v13, %v1546_v22  ;;  %v5693_v42 = vld [vmem:[%s7500_s6 + $0x20] sm:$0xff] }
 0x411   :  { %v5641_v59 = vadd.f32 %v2268_v1, %v1911_v35 }
 0x413   :  { %7957 = vst [vmem:[#allocation260_spill] sm:$0xff] %v5641_v59 }
 0x415   :  { %3838 = vset.pattern.permute.xlu2 %v7958_v23  ;;  %3837 = vset.pattern.permute.xlu1 %v7958_v23  ;;  %v5645_v12 = vpop.permute.xlu1 %1921  ;;  %v5662_v23 = vpop.permute.xlu0 %2286 }
 0x416   :  { %2138 = vperm.xlu2 %3838, %v4923_v32   ;;  %v5648_v49 = vpop.permute.xlu2 %1973  ;;  %2134 = vperm.xlu1 %3837, %v5653_v25  }
 0x417   :  { %7959 = vst [vmem:[#allocation261_spill] sm:$0xff] %v5648_v49  ;;  %v5701_v49 = vld [vmem:[%s7500_s6 + $0x18] sm:$0xff] }
 0x41d   :  { %v5656_v13 = vpop.permute.xlu1 %1929 }
 0x41e   :  { %7960 = vst [vmem:[#allocation262_spill] sm:$0xff] %v5656_v13  ;;  %2150 = vperm.xlu2 %3838, %v4938_v6   ;;  %v5659_v7 = vpop.permute.xlu2 %1981  ;;  %2146 = vperm.xlu1 %3837, %v4946_v24   ;;  %v5675_v6 = vpop.permute.xlu0 %2306 }
 0x41f   :  { %7961 = vst [vmem:[#allocation263_spill] sm:$0xff] %v5659_v7  ;;  %v5711_v7 = vld [vmem:[%s7500_s6 + $0x30] sm:$0xff] }
 0x420   :  { %7967 = vst [vmem:[#allocation268_spill] sm:$0xff] %v5711_v7 }
 0x425   :  { %v5664_v32 = vpop.permute.xlu1 %1941 }
 0x426   :  { %2158 = vperm.xlu2 %3838, %v4960_v17   ;;  %2154 = vperm.xlu1 %3837, %v5670_v30   ;;  %v5682_v17 = vld [vmem:[%s7500_s6 + $0x8] sm:$0xff] }
 0x427   :  { %v5673_v22 = vpop.permute.xlu2 %2009 }
 0x428   :  { %7962 = vst [vmem:[#allocation264_spill] sm:$0xff] %v5673_v22  ;;  %v5704_v22 = vpop.permute.xlu0 %2334 }
 0x42e   :  { %3841 = vset.pattern.permute.xlu2 %v7963_v52  ;;  %3840 = vset.pattern.permute.xlu1 %v7963_v52  ;;  %v1970_v24 = vpop.permute.xlu1 %1969 }
 0x42f   :  { %2186 = vperm.xlu2 %3841, %v5682_v17   ;;  %v5685_v1 = vpop.permute.xlu2 %2021  ;;  %2182 = vperm.xlu1 %3840, %v5653_v25  }
 0x430   :  { %7964 = vst [vmem:[#allocation265_spill] sm:$0xff] %v5685_v1  ;;  %v5717_v1 = vpop.permute.xlu0 %2354 }
 0x431   :  { %7969 = vst [vmem:[#allocation270_spill] sm:$0xff] %v5717_v1 }
 0x436   :  { %v5688_v35 = vpop.permute.xlu1 %1977 }
 0x437   :  { %7965 = vst [vmem:[#allocation266_spill] sm:$0xff] %v5688_v35  ;;  %2198 = vperm.xlu2 %3841, %v5693_v42   ;;  %v5696_v52 = vpop.permute.xlu2 %2029  ;;  %2194 = vperm.xlu1 %3840, %v5701_v49  }
 0x438   :  { %v2383_v33 = vpop.permute.xlu0 %2382 }
 0x43e   :  { %v5706_v59 = vpop.permute.xlu1 %1989 }
 0x43f   :  { %7966 = vst [vmem:[#allocation267_spill] sm:$0xff] %v5706_v59  ;;  %2206 = vperm.xlu2 %3841, %v5711_v7   ;;  %v5714_v13 = vpop.permute.xlu2 %2056  ;;  %2202 = vperm.xlu1 %3840, %v5670_v30  }
 0x440   :  { %7968 = vst [vmem:[#allocation269_spill] sm:$0xff] %v5714_v13  ;;  %v1346_v13 = vmul.f32 %v5163_v54, %v5610_v43  ;;  %v2403_v51 = vpop.permute.xlu0 %2402  ;;  %v1197_v54 = vmul.f32 %v5049_v47, %v5738_v53  ;;  %v1629_v47 = vmul.f32 %v5333_v60, %v7877_v62 }
 0x447   :  { %3844 = vset.pattern.permute.xlu2 %v7970_v9  ;;  %v5720_v8 = vpop.permute.xlu2 %2062  ;;  %3843 = vset.pattern.permute.xlu1 %v7970_v9  ;;  %v2018_v35 = vpop.permute.xlu1 %2017  ;;  %v1682_v9 = vmul.f32 %v5380_v11, %v7885_v31  ;;  %v1245_v11 = vmul.f32 %v5080_v41, %v5738_v53  ;;  %v1677_v41 = vmul.f32 %v5363_v58, %v7877_v62 }
 0x448   :  { %7971 = vst [vmem:[#allocation271_spill] sm:$0xff] %v5720_v8  ;;  %2234 = vperm.xlu2 %3844, %v5682_v17   ;;  %2230 = vperm.xlu1 %3843, %v5653_v25   ;;  %v1354_v8 = vadd.f32 %v1346_v13, %v4899_v38  ;;  %v1293_v38 = vmul.f32 %v5110_v21, %v5738_v53 }
 0x449   :  { %v5764_v21 = vmul.f32 %v5442_v50, %v5388_v4 }
 0x44a   :  { %v1690_v63 = vadd.f32 %v1682_v9, %v1354_v8  ;;  %v2412_v8 = vmul.f32 %v2403_v51, %v5633_v19  ;;  %v1581_v9 = vmul.f32 %v5301_v34, %v7877_v62  ;;  %v1253_v51 = vadd.f32 %v1245_v11, %v4740_v55 }
 0x44b   :  { %v1898_v60 = vmul.f32 %v5594_v46, %v5764_v21  ;;  %v1946_v58 = vmul.f32 %v5645_v12, %v5764_v21  ;;  %v1994_v36 = vmul.f32 %v1970_v24, %v5764_v21  ;;  %v2042_v4 = vmul.f32 %v2018_v35, %v5764_v21 }
 0x44f   :  { %v5725_v15 = vpop.permute.xlu2 %2068  ;;  %v5727_v28 = vpop.permute.xlu1 %2025 }
 0x450   :  { %7972 = vst [vmem:[#allocation272_spill] sm:$0xff] %v5727_v28  ;;  %2246 = vperm.xlu2 %3844, %v5693_v42   ;;  %2242 = vperm.xlu1 %3843, %v5701_v49  }
 0x457   :  { %v5740_v1 = vpop.permute.xlu2 %2090  ;;  %v2038_v28 = vpop.permute.xlu1 %2037 }
 0x458   :  { %7973 = vst [vmem:[#allocation273_spill] sm:$0xff] %v5740_v1  ;;  %v2047_v59 = vmul.f32 %v2038_v28, %v5629_v0  ;;  %2254 = vperm.xlu2 %3844, %v5711_v7   ;;  %2250 = vperm.xlu1 %3843, %v5670_v30   ;;  %v1533_v28 = vmul.f32 %v5264_v14, %v7877_v62  ;;  %v7975_v14 = vld [vmem:[#allocation86_spill] sm:$0xff]  ;;  %v7976_v1 = vld [vmem:[#allocation109_spill] sm:$0xff] }
 0x459   :  { %v1349_v34 = vadd.f32 %v1341_v48, %v7976_v1  ;;  %v7979_v1 = vmov 39  }
 0x45a   :  { %v2055_v13 = vadd.f32 %v2047_v59, %v1690_v63  ;;  %v1205_v63 = vadd.f32 %v1197_v54, %v4738_v2  ;;  %v1301_v59 = vadd.f32 %v1293_v38, %v7975_v14 }
 0x45b   :  { %v1685_v54 = vadd.f32 %v1677_v41, %v1349_v34  ;;  %v7988_v34 = vmov 40  }
 0x45c   :  { %v5766_v56 = vadd.f32 %v2412_v8, %v2055_v13  ;;  %v1541_v8 = vadd.f32 %v1533_v28, %v1205_v63  ;;  %v1589_v13 = vadd.f32 %v1581_v9, %v1253_v51  ;;  %v1637_v55 = vadd.f32 %v1629_v47, %v1301_v59 }
 0x45d   :  { %v2050_v35 = vadd.f32 %v2042_v4, %v1685_v54  ;;  %v7993_v54 = vmov 41  }
 0x45e   :  { %7974 = vst [vmem:[#allocation274_spill] sm:$0xff] %v5766_v56  ;;  %v1906_v46 = vadd.f32 %v1898_v60, %v1541_v8  ;;  %v1954_v12 = vadd.f32 %v1946_v58, %v1589_v13  ;;  %v2002_v24 = vadd.f32 %v1994_v36, %v1637_v55  ;;  %v7628_v60 = vmov 48  }
 0x45f   :  { %v5778_v56 = vpop.permute.xlu2 %2102  ;;  %v2061_v2 = vpop.permute.xlu1 %2060 }
 0x460   :  { %7977 = vst [vmem:[#allocation86_spill] sm:$0xff] %v5778_v56  ;;  %v5781_v11 = vmul.f32 %v5625_v3, %v2061_v2  ;;  %3847 = vset.pattern.permute.xlu2 %v7979_v1  ;;  %3846 = vset.pattern.permute.xlu1 %v7979_v1 }
 0x461   :  { %2282 = vperm.xlu2 %3847, %v5682_v17   ;;  %2278 = vperm.xlu1 %3846, %v5653_v25  }
 0x462   :  { %7978 = vst [vmem:[#allocation109_spill] sm:$0xff] %v5781_v11  ;;  %v2359_v38 = vmul.f32 %v5704_v22, %v5781_v11  ;;  %v2311_v48 = vmul.f32 %v5662_v23, %v5781_v11  ;;  %v2407_v28 = vmul.f32 %v2383_v33, %v5781_v11  ;;  %v2263_v9 = vmul.f32 %v5602_v16, %v5781_v11  ;;  %v8072_v11 = vld [vmem:[#allocation95_spill] sm:$0xff] }
 0x463   :  { %v7630_v33 = vmov 46  }
 0x464   :  { %v5794_v47 = vadd.f32 %v2359_v38, %v2002_v24  ;;  %v5796_v41 = vadd.f32 %v2311_v48, %v1954_v12  ;;  %v5798_v63 = vadd.f32 %v2407_v28, %v2050_v35  ;;  %v5800_v51 = vadd.f32 %v2263_v9, %v1906_v46  ;;  %3876 = vset.pattern.permute.xlu0 %v7630_v33  ;;  %v7999_v48 = vld [vmem:[#allocation45_spill] sm:$0xff] }
 0x465   :  { %2659 = vperm.xlu0 %3876, %v5693_v42   ;;  %v8000_v28 = vmov 42  }
 0x466   :  { %7980 = vst [vmem:[#allocation275_spill] sm:$0xff] %v5794_v47 }
 0x467   :  { %7981 = vst [vmem:[#allocation276_spill] sm:$0xff] %v5796_v41  ;;  %v5802_v36 = vpop.permute.xlu2 %2110  ;;  %v5804_v14 = vpop.permute.xlu1 %2066 }
 0x468   :  { %7982 = vst [vmem:[#allocation277_spill] sm:$0xff] %v5798_v63 }
 0x469   :  { %7983 = vst [vmem:[#allocation278_spill] sm:$0xff] %v5800_v51  ;;  %2294 = vperm.xlu2 %3847, %v5693_v42   ;;  %2290 = vperm.xlu1 %3846, %v5701_v49  }
 0x46d   :  { %2647 = vperm.xlu0 %3876, %v5682_v17  }
 0x46f   :  { %v5810_v16 = vpop.permute.xlu1 %2086 }
 0x470   :  { %7984 = vst [vmem:[#allocation279_spill] sm:$0xff] %v5810_v16  ;;  %v5812_v23 = vpop.permute.xlu2 %2138  ;;  %v8027_v16 = vld [vmem:[#allocation110_spill] sm:$0xff] }
 0x471   :  { %7985 = vst [vmem:[#allocation280_spill] sm:$0xff] %v5812_v23  ;;  %2302 = vperm.xlu2 %3847, %v5711_v7   ;;  %2298 = vperm.xlu1 %3846, %v5670_v30  }
 0x475   :  { %3885 = vset.pattern.permute.xlu0 %v7628_v60 }
 0x476   :  { %2755 = vperm.xlu0 %3885, %v5693_v42  }
 0x477   :  { %v5817_v22 = vpop.permute.xlu1 %2098 }
 0x478   :  { %7986 = vst [vmem:[#allocation281_spill] sm:$0xff] %v5817_v22  ;;  %v5819_v59 = vpop.permute.xlu2 %2150 }
 0x479   :  { %7987 = vst [vmem:[#allocation282_spill] sm:$0xff] %v5819_v59  ;;  %3850 = vset.pattern.permute.xlu2 %v7988_v34  ;;  %3849 = vset.pattern.permute.xlu1 %v7988_v34  ;;  %v8056_v59 = vld [vmem:[#allocation131_spill] sm:$0xff] }
 0x47a   :  { %2330 = vperm.xlu2 %3850, %v5682_v17   ;;  %2326 = vperm.xlu1 %3849, %v5653_v25  }
 0x47e   :  { %2739 = vperm.xlu0 %3885, %v5653_v25  }
 0x47f   :  { %v5826_v58 = vpop.permute.xlu1 %2106 }
 0x480   :  { %v5829_v4 = vpop.permute.xlu2 %2158 }
 0x482   :  { %2342 = vperm.xlu2 %3850, %v5693_v42   ;;  %2338 = vperm.xlu1 %3849, %v5701_v49  }
 0x488   :  { %v5834_v8 = vpop.permute.xlu1 %2134 }
 0x489   :  { %7989 = vst [vmem:[#allocation283_spill] sm:$0xff] %v5834_v8  ;;  %v5836_v13 = vpop.permute.xlu2 %2186 }
 0x48a   :  { %7990 = vst [vmem:[#allocation284_spill] sm:$0xff] %v5836_v13  ;;  %2350 = vperm.xlu2 %3850, %v5711_v7   ;;  %2346 = vperm.xlu1 %3849, %v5670_v30  }
 0x490   :  { %v5840_v2 = vpop.permute.xlu1 %2146 }
 0x491   :  { %7991 = vst [vmem:[#allocation285_spill] sm:$0xff] %v5840_v2  ;;  %v5842_v55 = vpop.permute.xlu2 %2198 }
 0x492   :  { %7992 = vst [vmem:[#allocation286_spill] sm:$0xff] %v5842_v55  ;;  %3853 = vset.pattern.permute.xlu2 %v7993_v54  ;;  %3852 = vset.pattern.permute.xlu1 %v7993_v54  ;;  %v8003_v54 = vld [vmem:[#allocation54_spill] sm:$0xff]  ;;  %v8045_v55 = vmov 48  }
 0x493   :  { %2378 = vperm.xlu2 %3853, %v5682_v17   ;;  %2374 = vperm.xlu1 %3852, %v5653_v25  }
 0x498   :  { %v5848_v1 = vpop.permute.xlu1 %2154 }
 0x499   :  { %7994 = vst [vmem:[#allocation287_spill] sm:$0xff] %v5848_v1  ;;  %v5850_v46 = vpop.permute.xlu2 %2206 }
 0x49b   :  { %2390 = vperm.xlu2 %3853, %v5693_v42   ;;  %2386 = vperm.xlu1 %3852, %v5701_v49  }
 0x4a1   :  { %v5854_v12 = vpop.permute.xlu1 %2182 }
 0x4a2   :  { %7995 = vst [vmem:[#allocation288_spill] sm:$0xff] %v5854_v12  ;;  %v5856_v24 = vpop.permute.xlu2 %2234 }
 0x4a3   :  { %7996 = vst [vmem:[#allocation289_spill] sm:$0xff] %v5856_v24  ;;  %2398 = vperm.xlu2 %3853, %v5711_v7   ;;  %2394 = vperm.xlu1 %3852, %v5670_v30   ;;  %v5891_v24 = vld [vmem:[%s7500_s6 + $0x10] sm:$0xff] }
 0x4a9   :  { %v5860_v35 = vpop.permute.xlu1 %2194 }
 0x4aa   :  { %7997 = vst [vmem:[#allocation290_spill] sm:$0xff] %v5860_v35  ;;  %v5862_v38 = vpop.permute.xlu2 %2246 }
 0x4ab   :  { %7998 = vst [vmem:[#allocation291_spill] sm:$0xff] %v5862_v38  ;;  %2423 = vrot.lane.b32.xlu2 %v7999_v48, %s4025_s1  ;;  %2421 = vrot.lane.b32.xlu1 %v7826_v57, %s4025_s1 }
 0x4ac   :  { %3857 = vset.pattern.permute.xlu2 %v8000_v28  ;;  %3856 = vset.pattern.permute.xlu1 %v8000_v28 }
 0x4b1   :  { %v5870_v9 = vpop.permute.xlu1 %2202 }
 0x4b2   :  { %8001 = vst [vmem:[#allocation292_spill] sm:$0xff] %v5870_v9  ;;  %v5872_v34 = vpop.permute.xlu2 %2254 }
 0x4b3   :  { %8002 = vst [vmem:[#allocation293_spill] sm:$0xff] %v5872_v34  ;;  %2429 = vrot.lane.b32.xlu2 %v8003_v54, %s4025_s1  ;;  %2427 = vrot.lane.b32.xlu1 %v7831_v61, %s4025_s1 }
 0x4ba   :  { %v5878_v60 = vpop.permute.xlu1 %2230 }
 0x4bb   :  { %8004 = vst [vmem:[#allocation294_spill] sm:$0xff] %v5878_v60  ;;  %2435 = vrot.lane.b32.xlu2 %v7885_v31, %s4025_s1  ;;  %v5882_v33 = vpop.permute.xlu2 %2282  ;;  %2433 = vrot.lane.b32.xlu1 %v7835_v10, %s4025_s1 }
 0x4bc   :  { %8005 = vst [vmem:[#allocation295_spill] sm:$0xff] %v5882_v33 }
 0x4c2   :  { %v5886_v28 = vpop.permute.xlu1 %2242 }
 0x4c3   :  { %8006 = vst [vmem:[#allocation296_spill] sm:$0xff] %v5886_v28  ;;  %2459 = vperm.xlu2 %3857, %v5891_v24   ;;  %v5894_v51 = vpop.permute.xlu2 %2294  ;;  %2455 = vperm.xlu1 %3856, %v5682_v17   ;;  %v5906_v28 = vld [vmem:[%s7500_s6 + $0x38] sm:$0xff] }
 0x4c4   :  { %8007 = vst [vmem:[#allocation297_spill] sm:$0xff] %v5894_v51  ;;  %v8021_v51 = vld [vmem:[#allocation122_spill] sm:$0xff] }
 0x4c5   :  { %8010 = vst [vmem:[#allocation300_spill] sm:$0xff] %v5906_v28 }
 0x4ca   :  { %v5897_v60 = vpop.permute.xlu1 %2250 }
 0x4cb   :  { %8008 = vst [vmem:[#allocation298_spill] sm:$0xff] %v5897_v60  ;;  %2467 = vperm.xlu2 %3857, %v5693_v42   ;;  %v5900_v33 = vpop.permute.xlu2 %2302  ;;  %2463 = vperm.xlu1 %3856, %v5701_v49   ;;  %v8013_v60 = vmov 43  }
 0x4cc   :  { %8009 = vst [vmem:[#allocation299_spill] sm:$0xff] %v5900_v33 }
 0x4d3   :  { %2479 = vperm.xlu2 %3857, %v5906_v28   ;;  %2475 = vperm.xlu1 %3856, %v5711_v7   ;;  %v5910_v34 = vpop.permute.xlu1 %2278 }
 0x4d4   :  { %8011 = vst [vmem:[#allocation301_spill] sm:$0xff] %v5910_v34  ;;  %v5912_v41 = vpop.permute.xlu2 %2330  ;;  %v5937_v34 = vmul.f32 %v5410_v37, %v8021_v51  ;;  %v8026_v51 = vld [vmem:[#allocation221_spill] sm:$0xff] }
 0x4d5   :  { %8012 = vst [vmem:[#allocation302_spill] sm:$0xff] %v5912_v41  ;;  %v8018_v41 = vmov 44   ;;  %v1681_v48 = vmul.f32 %v8026_v51, %v7835_v10  ;;  %v8039_v51 = vld [vmem:[#allocation189_spill] sm:$0xff] }
 0x4db   :  { %3859 = vset.pattern.permute.xlu2 %v8013_v60  ;;  %3858 = vset.pattern.permute.xlu1 %v8013_v60  ;;  %v5916_v38 = vpop.permute.xlu1 %2290 }
 0x4dc   :  { %8014 = vst [vmem:[#allocation303_spill] sm:$0xff] %v5916_v38  ;;  %2507 = vperm.xlu2 %3859, %v5891_v24   ;;  %v5919_v12 = vpop.permute.xlu2 %2342  ;;  %2503 = vperm.xlu1 %3858, %v5682_v17   ;;  %v8029_v38 = vmov 46  }
 0x4dd   :  { %8015 = vst [vmem:[#allocation304_spill] sm:$0xff] %v5919_v12  ;;  %v8057_v12 = vld [vmem:[#allocation182_spill] sm:$0xff] }
 0x4e3   :  { %v5922_v63 = vpop.permute.xlu1 %2298 }
 0x4e4   :  { %8016 = vst [vmem:[#allocation305_spill] sm:$0xff] %v5922_v63  ;;  %2527 = vperm.xlu2 %3859, %v5906_v28   ;;  %v5925_v8 = vpop.permute.xlu2 %2350  ;;  %2523 = vperm.xlu1 %3858, %v5711_v7  }
 0x4e5   :  { %8017 = vst [vmem:[#allocation306_spill] sm:$0xff] %v5925_v8 }
 0x4ec   :  { %2515 = vperm.xlu2 %3859, %v5693_v42   ;;  %3861 = vset.pattern.permute.xlu1 %v8018_v41  ;;  %v5930_v35 = vpop.permute.xlu1 %2326 }
 0x4ed   :  { %8019 = vst [vmem:[#allocation307_spill] sm:$0xff] %v5930_v35  ;;  %v5932_v13 = vpop.permute.xlu2 %2378  ;;  %2575 = vperm.xlu1 %3861, %v5906_v28   ;;  %v8024_v35 = vld [vmem:[#allocation172_spill] sm:$0xff] }
 0x4ee   :  { %8020 = vst [vmem:[#allocation308_spill] sm:$0xff] %v5932_v13  ;;  %v1345_v23 = vmul.f32 %v8024_v35, %v5937_v34  ;;  %v8025_v13 = vld [vmem:[#allocation196_spill] sm:$0xff] }
 0x4ef   :  { %v5951_v8 = vmul.f32 %v5442_v50, %v8025_v13 }
 0x4f1   :  { %v2046_v22 = vmul.f32 %v5468_v27, %v5951_v8 }
 0x4f4   :  { %3863 = vset.pattern.permute.xlu2 %v8018_v41  ;;  %v5940_v47 = vpop.permute.xlu1 %2338 }
 0x4f5   :  { %8022 = vst [vmem:[#allocation122_spill] sm:$0xff] %v5940_v47  ;;  %2563 = vperm.xlu2 %3863, %v5693_v42   ;;  %v5943_v2 = vpop.permute.xlu2 %2390  ;;  %3862 = vset.pattern.permute.xlu1 %v8013_v60  ;;  %v1353_v47 = vadd.f32 %v1345_v23, %v8027_v16  ;;  %v5960_v60 = vmul.f32 %v5625_v3, %v5725_v15  ;;  %v8033_v16 = vmov 47  }
 0x4f6   :  { %8023 = vst [vmem:[#allocation309_spill] sm:$0xff] %v5943_v2  ;;  %2519 = vperm.xlu1 %3862, %v5670_v30  }
 0x4f7   :  { %v1689_v2 = vadd.f32 %v1681_v48, %v1353_v47 }
 0x4f9   :  { %v2054_v13 = vadd.f32 %v2046_v22, %v1689_v2  ;;  %v8038_v2 = vld [vmem:[#allocation152_spill] sm:$0xff] }
 0x4fc   :  { %v5962_v35 = vpop.permute.xlu1 %2346 }
 0x4fd   :  { %8028 = vst [vmem:[#allocation172_spill] sm:$0xff] %v5962_v35  ;;  %3866 = vset.pattern.permute.xlu2 %v8029_v38  ;;  %v2399_v63 = vpop.permute.xlu2 %2398 }
 0x4fe   :  { %v2411_v33 = vmul.f32 %v2399_v63, %v5960_v60  ;;  %2671 = vperm.xlu2 %3866, %v5906_v28   ;;  %3865 = vset.pattern.permute.xlu1 %v8029_v38  ;;  %v8034_v63 = vld [vmem:[#allocation114_spill] sm:$0xff] }
 0x4ff   :  { %2667 = vperm.xlu1 %3865, %v5711_v7   ;;  %v5981_v23 = vmul.f32 %v5410_v37, %v8034_v63  ;;  %v8042_v63 = vld [vmem:[#allocation113_spill] sm:$0xff]  ;;  %v8071_v37 = vld [vmem:[#allocation207_spill] sm:$0xff] }
 0x500   :  { %v5969_v27 = vadd.f32 %v2411_v33, %v2054_v13  ;;  %v1680_v13 = vmul.f32 %v8039_v51, %v7882_v18 }
 0x501   :  { %8035 = vst [vmem:[#allocation114_spill] sm:$0xff] %v5981_v23  ;;  %v1344_v48 = vmul.f32 %v8038_v2, %v5981_v23 }
 0x502   :  { %8030 = vst [vmem:[#allocation196_spill] sm:$0xff] %v5969_v27 }
 0x503   :  { %v1352_v27 = vadd.f32 %v1344_v48, %v8042_v63 }
 0x505   :  { %v5971_v47 = vpop.permute.xlu2 %2423  ;;  %v5973_v15 = vpop.permute.xlu1 %2374 }
 0x506   :  { %8031 = vst [vmem:[#allocation221_spill] sm:$0xff] %v5971_v47  ;;  %3868 = vset.pattern.permute.xlu2 %v8033_v16  ;;  %v6004_v47 = vmul.f32 %v5625_v3, %v5804_v14  ;;  %v8063_v3 = vld [vmem:[#allocation103_spill] sm:$0xff] }
 0x507   :  { %8032 = vst [vmem:[#allocation110_spill] sm:$0xff] %v5973_v15  ;;  %2719 = vperm.xlu2 %3868, %v5906_v28   ;;  %3867 = vset.pattern.permute.xlu1 %v8033_v16  ;;  %v8040_v15 = vld [vmem:[#allocation72_spill] sm:$0xff] }
 0x508   :  { %2715 = vperm.xlu1 %3867, %v5711_v7   ;;  %v5994_v35 = vmul.f32 %v5442_v50, %v8040_v15  ;;  %8043 = vst [vmem:[#allocation189_spill] sm:$0xff] %v6004_v47 }
 0x50a   :  { %8041 = vst [vmem:[#allocation152_spill] sm:$0xff] %v5994_v35  ;;  %v2045_v2 = vmul.f32 %v5696_v52, %v5994_v35  ;;  %v6013_v52 = vpop.permute.xlu0 %2425 }
 0x50d   :  { %v5983_v22 = vpop.permute.xlu2 %2429  ;;  %v5985_v33 = vpop.permute.xlu1 %2386 }
 0x50e   :  { %8036 = vst [vmem:[#allocation310_spill] sm:$0xff] %v5983_v22 }
 0x50f   :  { %8037 = vst [vmem:[#allocation311_spill] sm:$0xff] %v5985_v33  ;;  %3870 = vset.pattern.permute.xlu2 %v8018_v41  ;;  %v1688_v33 = vadd.f32 %v1680_v13, %v1352_v27 }
 0x510   :  { %2559 = vperm.xlu2 %3870, %v5701_v49   ;;  %3869 = vset.pattern.permute.xlu1 %v8018_v41 }
 0x511   :  { %2555 = vperm.xlu1 %3869, %v5891_v24   ;;  %v2053_v15 = vadd.f32 %v2045_v2, %v1688_v33  ;;  %v8052_v2 = vld [vmem:[#allocation102_spill] sm:$0xff] }
 0x512   :  { %v6027_v33 = vpop.permute.xlu0 %2431 }
 0x515   :  { %v2436_v51 = vpop.permute.xlu2 %2435  ;;  %v2395_v9 = vpop.permute.xlu1 %2394 }
 0x516   :  { %v2410_v61 = vmul.f32 %v2395_v9, %v6004_v47 }
 0x518   :  { %v6007_v57 = vadd.f32 %v2410_v61, %v2053_v15  ;;  %3872 = vset.pattern.permute.xlu2 %v8045_v55  ;;  %v8053_v15 = vld [vmem:[#allocation62_spill] sm:$0xff] }
 0x519   :  { %2763 = vperm.xlu2 %3872, %v5711_v7   ;;  %3871 = vset.pattern.permute.xlu1 %v8029_v38  ;;  %v6058_v7 = vsel %vm2439_vm4, 1.0, %v7910_v29  ;;  %v8065_v29 = vld [vmem:[#allocation147_spill] sm:$0xff] }
 0x51a   :  { %8044 = vst [vmem:[#allocation72_spill] sm:$0xff] %v6007_v57  ;;  %2663 = vperm.xlu1 %3871, %v5670_v30   ;;  %v6035_v63 = vpop.permute.xlu0 %2451  ;;  %v741_v57 = vmul.f32 %v8053_v15, %v8052_v2  ;;  %v1442_v15 = vmul.f32 %v8057_v12, %v7885_v31  ;;  %v6063_v56 = vperm.slane %v6058_v7, 0 }
 0x51b   :  { %8051 = vst [vmem:[#allocation316_spill] sm:$0xff] %v6035_v63 }
 0x51d   :  { %v6015_v27 = vpop.permute.xlu2 %2459  ;;  %v6017_v14 = vpop.permute.xlu1 %2421 }
 0x51e   :  { %8046 = vst [vmem:[#allocation113_spill] sm:$0xff] %v6015_v27  ;;  %v8054_v27 = vld [vmem:[#allocation99_spill] sm:$0xff] }
 0x51f   :  { %8047 = vst [vmem:[#allocation312_spill] sm:$0xff] %v6017_v14  ;;  %v8055_v14 = vld [vmem:[#allocation17_spill] sm:$0xff] }
 0x520   :  { %8060 = vst [vmem:[#allocation99_spill] sm:$0xff] %v6058_v7  ;;  %v8070_v7 = vld [vmem:[#allocation46_spill] sm:$0xff] }
 0x521   :  { %3874 = vset.pattern.permute.xlu2 %v8033_v16 }
 0x522   :  { %2707 = vperm.xlu2 %3874, %v5693_v42   ;;  %3873 = vset.pattern.permute.xlu1 %v8045_v55 }
 0x523   :  { %2767 = vperm.xlu1 %3873, %v5906_v28   ;;  %v2472_v28 = vpop.permute.xlu0 %2471 }
 0x525   :  { %v6023_v61 = vpop.permute.xlu2 %2467  ;;  %v6025_v9 = vpop.permute.xlu1 %2427 }
 0x526   :  { %8048 = vst [vmem:[#allocation313_spill] sm:$0xff] %v6023_v61 }
 0x527   :  { %8049 = vst [vmem:[#allocation314_spill] sm:$0xff] %v6025_v9  ;;  %v424_v9 = vmul.f32 %v8055_v14, %v8054_v27 }
 0x529   :  { %v749_v63 = vadd.f32 %v741_v57, %v424_v9  ;;  %v8061_v57 = vld [vmem:[#allocation104_spill] sm:$0xff]  ;;  %v8062_v9 = vld [vmem:[#allocation34_spill] sm:$0xff] }
 0x52a   :  { %3878 = vset.pattern.permute.xlu2 %v8018_v41  ;;  %v463_v22 = vmul.f32 %v8062_v9, %v8061_v57 }
 0x52b   :  { %2551 = vperm.xlu2 %3878, %v5682_v17   ;;  %3877 = vset.pattern.permute.xlu1 %v8018_v41  ;;  %v1106_v41 = vmul.f32 %v8056_v59, %v5610_v43  ;;  %v1807_v59 = vmul.f32 %v5551_v39, %v5629_v0  ;;  %v1153_v39 = vmul.f32 %v8065_v29, %v5937_v34 }
 0x52c   :  { %2547 = vperm.xlu1 %3877, %v5653_v25  }
 0x52d   :  { %v6033_v48 = vpop.permute.xlu2 %2479  ;;  %v2434_v13 = vpop.permute.xlu1 %2433  ;;  %v1114_v14 = vadd.f32 %v1106_v41, %v749_v63  ;;  %v7640_v63 = vmov 45   ;;  %v2172_v41 = vmul.f32 %v5561_v5, %v5633_v19  ;;  %v8069_v5 = vld [vmem:[#allocation96_spill] sm:$0xff] }
 0x52e   :  { %8050 = vst [vmem:[#allocation315_spill] sm:$0xff] %v6033_v48  ;;  %3893 = vset.pattern.permute.xlu0 %v7640_v63  ;;  %v6089_v48 = vmul.f32 %v6063_v56, %v2434_v13 }
 0x52f   :  { %v1450_v61 = vadd.f32 %v1442_v15, %v1114_v14  ;;  %v6074_v15 = vmul.f32 %v6063_v56, %v2436_v51  ;;  %v691_v51 = vmul.f32 %v8070_v7, %v8069_v5  ;;  %v2572_v7 = vpop.permute.xlu0 %2571 }
 0x531   :  { %v1815_v12 = vadd.f32 %v1807_v59, %v1450_v61  ;;  %8066 = vst [vmem:[#allocation17_spill] sm:$0xff] %v6074_v15  ;;  %v8068_v59 = vld [vmem:[#allocation48_spill] sm:$0xff] }
 0x532   :  { %v1489_v9 = vmul.f32 %v8068_v59, %v7835_v10 }
 0x533   :  { %3880 = vset.pattern.permute.xlu2 %v8029_v38  ;;  %v2180_v29 = vadd.f32 %v2172_v41, %v1815_v12  ;;  %v2219_v41 = vmul.f32 %v5850_v46, %v5960_v60 }
 0x534   :  { %2655 = vperm.xlu2 %3880, %v5701_v49   ;;  %3879 = vset.pattern.permute.xlu1 %v8029_v38 }
 0x535   :  { %2651 = vperm.xlu1 %3879, %v5891_v24   ;;  %v6051_v40 = vpop.permute.xlu1 %2455 }
 0x536   :  { %8058 = vst [vmem:[#allocation102_spill] sm:$0xff] %v6051_v40  ;;  %v6053_v1 = vpop.permute.xlu2 %2507  ;;  %v8064_v40 = vld [vmem:[#allocation53_spill] sm:$0xff] }
 0x537   :  { %8059 = vst [vmem:[#allocation62_spill] sm:$0xff] %v6053_v1  ;;  %v788_v50 = vmul.f32 %v8064_v40, %v8063_v3  ;;  %v1854_v1 = vmul.f32 %v8071_v37, %v5951_v8  ;;  %v8075_v37 = vld [vmem:[#allocation156_spill] sm:$0xff] }
 0x538   :  { %v1392_v13 = vmul.f32 %v8075_v37, %v7882_v18  ;;  %v8125_v18 = vld [vmem:[#allocation60_spill] sm:$0xff] }
 0x539   :  { %v796_v14 = vadd.f32 %v788_v50, %v463_v22  ;;  %v8074_v22 = vld [vmem:[#allocation120_spill] sm:$0xff] }
 0x53a   :  { %v1056_v59 = vmul.f32 %v8074_v22, %v5981_v23  ;;  %v8126_v23 = vld [vmem:[#allocation65_spill] sm:$0xff] }
 0x53b   :  { %v1161_v54 = vadd.f32 %v1153_v39, %v796_v14  ;;  %v2584_v14 = vmul.f32 %v2572_v7, %v6089_v48 }
 0x53c   :  { %3882 = vset.pattern.permute.xlu2 %v8033_v16 }
 0x53d   :  { %2699 = vperm.xlu2 %3882, %v5891_v24   ;;  %3881 = vset.pattern.permute.xlu1 %v8045_v55  ;;  %v6078_v61 = vpop.permute.xlu1 %2463  ;;  %v1497_v12 = vadd.f32 %v1489_v9, %v1161_v54 }
 0x53e   :  { %8067 = vst [vmem:[#allocation131_spill] sm:$0xff] %v6078_v61  ;;  %v2528_v40 = vpop.permute.xlu2 %2527  ;;  %2759 = vperm.xlu1 %3881, %v5670_v30   ;;  %v8073_v30 = vld [vmem:[#allocation6_spill] sm:$0xff] }
 0x53f   :  { %v2537_v63 = vmul.f32 %v2528_v40, %v6074_v15  ;;  %v382_v50 = vmul.f32 %v8073_v30, %v8072_v11  ;;  %v1862_v40 = vadd.f32 %v1854_v1, %v1497_v12  ;;  %v8078_v30 = vld [vmem:[#allocation78_spill] sm:$0xff]  ;;  %v8081_v12 = vld [vmem:[#allocation77_spill] sm:$0xff] }
 0x541   :  { %v2545_v61 = vadd.f32 %v2537_v63, %v2180_v29  ;;  %v699_v39 = vadd.f32 %v691_v51, %v382_v50  ;;  %v2227_v9 = vadd.f32 %v2219_v41, %v1862_v40  ;;  %v8077_v51 = vld [vmem:[#allocation80_spill] sm:$0xff]  ;;  %v8087_v40 = vld [vmem:[#allocation22_spill] sm:$0xff] }
 0x542   :  { %v6115_v50 = vmul.f32 %v8078_v30, %v8077_v51  ;;  %v8092_v51 = vld [vmem:[#allocation23_spill] sm:$0xff] }
 0x543   :  { %2825 = vrot.lane.b32.xlu0 %v2545_v61, %s4033_s24  ;;  %v1064_v46 = vadd.f32 %v1056_v59, %v699_v39  ;;  %v1757_v61 = vmul.f32 %v5481_v44, %v5994_v35  ;;  %v2592_v29 = vadd.f32 %v2584_v14, %v2227_v9  ;;  %v8080_v59 = vld [vmem:[#allocation70_spill] sm:$0xff]  ;;  %v6124_v44 = vmul.f32 %v6063_v56, %v6027_v33  ;;  %v8084_v39 = vld [vmem:[#allocation79_spill] sm:$0xff] }
 0x544   :  { %8079 = vst [vmem:[#allocation104_spill] sm:$0xff] %v6115_v50  ;;  %v6120_v7 = vmul.f32 %v8081_v12, %v8080_v59  ;;  %v377_v14 = vmul.f32 %v8087_v40, %v6115_v50  ;;  %v8089_v33 = vld [vmem:[#allocation26_spill] sm:$0xff]  ;;  %v537_v30 = vmul.f32 %v8092_v51, %v6115_v50  ;;  %v8095_v12 = vld [vmem:[#allocation73_spill] sm:$0xff] }
 0x545   :  { %3884 = vset.pattern.permute.xlu2 %v8029_v38  ;;  %v6101_v63 = vpop.permute.xlu1 %2475  ;;  %v1400_v1 = vadd.f32 %v1392_v13, %v1064_v46  ;;  %v2122_v38 = vmul.f32 %v5826_v58, %v6004_v47  ;;  %8083 = vst [vmem:[#allocation103_spill] sm:$0xff] %v6124_v44  ;;  %v8085_v58 = vld [vmem:[#allocation39_spill] sm:$0xff]  ;;  %v2487_v46 = vmul.f32 %v2472_v28, %v6124_v44  ;;  %v8099_v51 = vld [vmem:[#allocation130_spill] sm:$0xff] }
 0x546   :  { %2643 = vperm.xlu2 %3884, %v5653_v25   ;;  %v6105_v54 = vpop.permute.xlu2 %2515  ;;  %3883 = vset.pattern.permute.xlu1 %v8033_v16  ;;  %8082 = vst [vmem:[#allocation34_spill] sm:$0xff] %v6120_v7  ;;  %v735_v37 = vmul.f32 %v8085_v58, %v8084_v39  ;;  %v383_v9 = vmul.f32 %v8089_v33, %v8061_v57  ;;  %v8096_v39 = vld [vmem:[#allocation87_spill] sm:$0xff]  ;;  %v8097_v33 = vld [vmem:[#allocation42_spill] sm:$0xff] }
 0x547   :  { %8076 = vst [vmem:[#allocation182_spill] sm:$0xff] %v6105_v54  ;;  %2703 = vperm.xlu1 %3883, %v5701_v49   ;;  %v1765_v22 = vadd.f32 %v1757_v61, %v1400_v1  ;;  %v8090_v1 = vld [vmem:[#allocation81_spill] sm:$0xff]  ;;  %v885_v58 = vmul.f32 %v8095_v12, %v8052_v2  ;;  %v8104_v12 = vld [vmem:[#allocation154_spill] sm:$0xff]  ;;  %v8112_v54 = vld [vmem:[#allocation84_spill] sm:$0xff] }
 0x549   :  { %v2130_v41 = vadd.f32 %v2122_v38, %v1765_v22  ;;  %v8091_v38 = vld [vmem:[#allocation28_spill] sm:$0xff] }
 0x54a   :  { %v8093_v22 = vld [vmem:[#allocation40_spill] sm:$0xff] }
 0x54b   :  { %2856 = vrot.lane.b32.xlu0 %v2592_v29, %s4034_s25  ;;  %v418_v29 = vmul.f32 %v8091_v38, %v8090_v1  ;;  %v686_v28 = vmul.f32 %v8093_v22, %v6120_v7  ;;  %v2495_v40 = vadd.f32 %v2487_v46, %v2130_v41  ;;  %v8098_v38 = vld [vmem:[#allocation38_spill] sm:$0xff]  ;;  %v8103_v41 = vld [vmem:[#allocation32_spill] sm:$0xff] }
 0x54c   :  { %v692_v1 = vmul.f32 %v8098_v38, %v8063_v3  ;;  %v544_v46 = vmul.f32 %v8103_v41, %v8054_v27  ;;  %v8105_v38 = vld [vmem:[#allocation82_spill] sm:$0xff]  ;;  %v8110_v41 = vld [vmem:[#allocation19_spill] sm:$0xff] }
 0x54d   :  { %v6159_v50 = vadd.f32 %v735_v37, %v418_v29  ;;  %v6161_v22 = vadd.f32 %v686_v28, %v377_v14  ;;  %v8108_v29 = vld [vmem:[#allocation181_spill] sm:$0xff] }
 0x54e   :  { %3887 = vset.pattern.permute.xlu2 %v8045_v55  ;;  %v6129_v13 = vpop.permute.xlu1 %2503  ;;  %v700_v37 = vadd.f32 %v692_v1, %v383_v9  ;;  %v1393_v28 = vmul.f32 %v8108_v29, %v7835_v10  ;;  %v8114_v9 = vld [vmem:[#allocation16_spill] sm:$0xff] }
 0x54f   :  { %8086 = vst [vmem:[#allocation53_spill] sm:$0xff] %v6129_v13  ;;  %2751 = vperm.xlu2 %3887, %v5701_v49   ;;  %v6135_v61 = vpop.permute.xlu2 %2563  ;;  %3886 = vset.pattern.permute.xlu1 %v8045_v55  ;;  %v8094_v49 = vld [vmem:[#allocation69_spill] sm:$0xff]  ;;  %v6153_v13 = vmul.f32 %v8097_v33, %v8096_v39  ;;  %v1250_v33 = vmul.f32 %v8104_v12, %v5610_v43 }
 0x550   :  { %8088 = vst [vmem:[#allocation147_spill] sm:$0xff] %v6135_v61  ;;  %2747 = vperm.xlu1 %3886, %v5891_v24   ;;  %v878_v59 = vmul.f32 %v8094_v49, %v6120_v7  ;;  %v1057_v24 = vmul.f32 %v8099_v51, %v5937_v34  ;;  %v8102_v49 = vld [vmem:[#allocation52_spill] sm:$0xff]  ;;  %v8106_v61 = vld [vmem:[#allocation5_spill] sm:$0xff]  ;;  %v893_v12 = vadd.f32 %v885_v58, %v544_v46 }
 0x551   :  { %8100 = vst [vmem:[#allocation48_spill] sm:$0xff] %v6159_v50  ;;  %v6165_v7 = vmul.f32 %v8102_v49, %v8096_v39  ;;  %v6174_v51 = vmul.f32 %v8106_v61, %v8105_v38  ;;  %v8109_v49 = vld [vmem:[#allocation14_spill] sm:$0xff]  ;;  %v6184_v50 = vmul.f32 %v8110_v41, %v8105_v38  ;;  %v6194_v1 = vmul.f32 %v8114_v9, %v8112_v54  ;;  %v8117_v58 = vld [vmem:[#allocation20_spill] sm:$0xff]  ;;  %v8118_v9 = vld [vmem:[#allocation29_spill] sm:$0xff] }
 0x552   :  { %8101 = vst [vmem:[#allocation96_spill] sm:$0xff] %v6161_v22  ;;  %v6176_v14 = vadd.f32 %v878_v59, %v537_v30  ;;  %v419_v39 = vmul.f32 %v8109_v49, %v8105_v38  ;;  %v8113_v61 = vld [vmem:[#allocation10_spill] sm:$0xff]  ;;  %v1065_v30 = vadd.f32 %v1057_v24, %v700_v37  ;;  %v8115_v59 = vld [vmem:[#allocation199_spill] sm:$0xff]  ;;  %v8116_v38 = vld [vmem:[#allocation57_spill] sm:$0xff]  ;;  %v6202_v46 = vmul.f32 %v8117_v58, %v8112_v54 }
 0x553   :  { %2796 = vrot.lane.b32.xlu0 %v2495_v40, %s4035_s26  ;;  %v8111_v40 = vld [vmem:[#allocation204_spill] sm:$0xff]  ;;  %v6190_v44 = vmul.f32 %v8113_v61, %v8112_v54  ;;  %v1758_v29 = vmul.f32 %v8115_v59, %v5951_v8  ;;  %v693_v41 = vmul.f32 %v8116_v38, %v8052_v2  ;;  %v1951_v61 = vmul.f32 %v5664_v32, %v5629_v0  ;;  %v8119_v58 = vld [vmem:[#allocation83_spill] sm:$0xff] }
 0x554   :  { %8107 = vst [vmem:[#allocation46_spill] sm:$0xff] %v6176_v14  ;;  %v1586_v22 = vmul.f32 %v8111_v40, %v7885_v31  ;;  %v1258_v40 = vadd.f32 %v1250_v33, %v893_v12  ;;  %v423_v24 = vmul.f32 %v8118_v9, %v8061_v57  ;;  %v1401_v37 = vadd.f32 %v1393_v28, %v1065_v30  ;;  %v8120_v54 = vld [vmem:[#allocation51_spill] sm:$0xff]  ;;  %v8121_v32 = vld [vmem:[#allocation12_spill] sm:$0xff]  ;;  %v8122_v14 = vld [vmem:[#allocation121_spill] sm:$0xff] }
 0x555   :  { %v2123_v59 = vmul.f32 %v5802_v36, %v5960_v60  ;;  %v6215_v33 = vmul.f32 %v8120_v54, %v8119_v58  ;;  %v384_v12 = vmul.f32 %v8121_v32, %v8054_v27  ;;  %v1058_v47 = vmul.f32 %v8122_v14, %v5610_v43  ;;  %v8123_v36 = vld [vmem:[#allocation44_spill] sm:$0xff]  ;;  %v8124_v30 = vld [vmem:[#allocation139_spill] sm:$0xff] }
 0x556   :  { %v2524_v49 = vpop.permute.xlu1 %2523  ;;  %v1594_v57 = vadd.f32 %v1586_v22, %v1258_v40  ;;  %v740_v28 = vmul.f32 %v8123_v36, %v8063_v3  ;;  %v1105_v9 = vmul.f32 %v8124_v30, %v5937_v34  ;;  %v2488_v54 = vmul.f32 %v6101_v63, %v6089_v48  ;;  %v8127_v3 = vld [vmem:[#allocation173_spill] sm:$0xff]  ;;  %v8128_v36 = vld [vmem:[#allocation190_spill] sm:$0xff] }
 0x557   :  { %3889 = vset.pattern.permute.xlu2 %v8033_v16  ;;  %v701_v35 = vadd.f32 %v693_v41, %v384_v12  ;;  %v736_v32 = vmul.f32 %v8125_v18, %v8119_v58  ;;  %v784_v14 = vmul.f32 %v8126_v23, %v8119_v58  ;;  %v1394_v40 = vmul.f32 %v8127_v3, %v7885_v31  ;;  %v8129_v63 = vld [vmem:[#allocation125_spill] sm:$0xff] }
 0x558   :  { %2695 = vperm.xlu2 %3889, %v5682_v17   ;;  %v2672_v38 = vpop.permute.xlu2 %2671  ;;  %3888 = vset.pattern.permute.xlu1 %v8033_v16  ;;  %v1766_v16 = vadd.f32 %v1758_v29, %v1401_v37  ;;  %v1959_v22 = vadd.f32 %v1951_v61, %v1594_v57  ;;  %v1441_v29 = vmul.f32 %v8128_v36, %v7835_v10 }
 0x559   :  { %2691 = vperm.xlu1 %3888, %v5653_v25   ;;  %v748_v25 = vadd.f32 %v740_v28, %v423_v24  ;;  %v1066_v30 = vadd.f32 %v1058_v47, %v701_v35  ;;  %v1101_v41 = vmul.f32 %v8129_v63, %v5738_v53  ;;  %v2316_v18 = vmul.f32 %v5675_v6, %v5633_v19  ;;  %v8132_v47 = vld [vmem:[#allocation177_spill] sm:$0xff]  ;;  %v8133_v6 = vld [vmem:[#allocation94_spill] sm:$0xff] }
 0x55a   :  { %v2131_v37 = vadd.f32 %v2123_v59, %v1766_v16  ;;  %v2681_v23 = vmul.f32 %v2672_v38, %v6074_v15  ;;  %v1759_v58 = vmul.f32 %v5520_v20, %v5629_v0  ;;  %v744_v57 = vadd.f32 %v736_v32, %v419_v39  ;;  %v8131_v59 = vld [vmem:[#allocation35_spill] sm:$0xff] }
 0x55b   :  { %2611 = vperm.xlu0 %3893, %v5693_v42   ;;  %v1113_v61 = vadd.f32 %v1105_v9, %v748_v25  ;;  %v8130_v42 = vld [vmem:[#allocation203_spill] sm:$0xff]  ;;  %v584_v35 = vmul.f32 %v8131_v59, %v8054_v27  ;;  %v1437_v28 = vmul.f32 %v8132_v47, %v7877_v62  ;;  %v2324_v16 = vadd.f32 %v2316_v18, %v1959_v22  ;;  %v8137_v18 = vld [vmem:[#allocation244_spill] sm:$0xff] }
 0x55c   :  { %v1806_v24 = vmul.f32 %v8130_v42, %v5951_v8  ;;  %v2496_v12 = vadd.f32 %v2488_v54, %v2131_v37  ;;  %v933_v38 = vmul.f32 %v8133_v6, %v8052_v2  ;;  %v1402_v9 = vadd.f32 %v1394_v40, %v1066_v30  ;;  %v8144_v6 = vld [vmem:[#allocation88_spill] sm:$0xff] }
 0x55d   :  { %v1449_v25 = vadd.f32 %v1441_v29, %v1113_v61  ;;  %v2171_v36 = vmul.f32 %v5829_v4, %v5960_v60  ;;  %v1109_v20 = vadd.f32 %v1101_v41, %v744_v57  ;;  %v1802_v39 = vmul.f32 %v5531_v45, %v5764_v21  ;;  %v8135_v4 = vld [vmem:[#allocation161_spill] sm:$0xff] }
 0x55e   :  { %v2689_v54 = vadd.f32 %v2681_v23, %v2324_v16  ;;  %v8134_v22 = vmov 45   ;;  %v1767_v63 = vadd.f32 %v1759_v58, %v1402_v9  ;;  %v2124_v40 = vmul.f32 %v5538_v26, %v5633_v19  ;;  %v8138_v61 = vld [vmem:[#allocation85_spill] sm:$0xff]  ;;  %v8141_v58 = vld [vmem:[#allocation315_spill] sm:$0xff]  ;;  %v8145_v9 = vld [vmem:[#allocation24_spill] sm:$0xff] }
 0x55f   :  { %v6250_v3 = vpop.permute.xlu1 %2575  ;;  %v1814_v37 = vadd.f32 %v1806_v24, %v1449_v25  ;;  %v2536_v29 = vmul.f32 %v2524_v49, %v6089_v48  ;;  %v1298_v30 = vmul.f32 %v8135_v4, %v5610_v43  ;;  %v1445_v41 = vadd.f32 %v1437_v28, %v1109_v20  ;;  %v8139_v26 = vld [vmem:[#allocation37_spill] sm:$0xff]  ;;  %v8143_v28 = vld [vmem:[#allocation62_spill] sm:$0xff] }
 0x560   :  { %2798 = vrot.lane.b32.xlu2 %v2496_v12, %s4035_s26  ;;  %v6269_v45 = vmul.f32 %v6063_v56, %v6013_v52  ;;  %v690_v42 = vmul.f32 %v8139_v26, %v8138_v61  ;;  %v8140_v49 = vld [vmem:[#allocation41_spill] sm:$0xff]  ;;  %v2489_v12 = vmul.f32 %v8141_v58, %v6074_v15  ;;  %v941_v57 = vadd.f32 %v933_v38, %v584_v35  ;;  %v8142_v52 = vld [vmem:[#allocation210_spill] sm:$0xff]  ;;  %v8149_v38 = vld [vmem:[#allocation267_spill] sm:$0xff] }
 0x561   :  { %v2720_v32 = vpop.permute.xlu2 %2719  ;;  %3890 = vset.pattern.permute.xlu1 %v8045_v55  ;;  %3892 = vset.pattern.permute.xlu2 %v8134_v22  ;;  %v8136_v55 = vld [vmem:[#allocation109_spill] sm:$0xff]  ;;  %v2179_v24 = vadd.f32 %v2171_v36, %v1814_v37  ;;  %v1634_v59 = vmul.f32 %v8142_v52, %v7885_v31  ;;  %v1810_v47 = vadd.f32 %v1802_v39, %v1445_v41  ;;  %v8146_v20 = vld [vmem:[#allocation50_spill] sm:$0xff]  ;;  %v8147_v36 = vld [vmem:[#allocation111_spill] sm:$0xff] }
 0x562   :  { %2743 = vperm.xlu1 %3890, %v5682_v17   ;;  %v2167_v23 = vmul.f32 %v8137_v18, %v8136_v55  ;;  %v738_v17 = vmul.f32 %v8140_v49, %v8138_v61  ;;  %v2532_v16 = vmul.f32 %v8143_v28, %v6269_v45  ;;  %v380_v25 = vmul.f32 %v8145_v9, %v8144_v6  ;;  %v8148_v37 = vld [vmem:[#allocation219_spill] sm:$0xff]  ;;  %v8150_v52 = vld [vmem:[#allocation68_spill] sm:$0xff] }
 0x563   :  { %2899 = vrot.lane.b32.xlu0 %v2689_v54, %s4036_s27  ;;  %v786_v54 = vmul.f32 %v8146_v20, %v8138_v61  ;;  %v2132_v4 = vadd.f32 %v2124_v40, %v1767_v63  ;;  %v2544_v18 = vadd.f32 %v2536_v29, %v2179_v24  ;;  %v6290_v26 = vmul.f32 %v8148_v37, %v8147_v36  ;;  %v8151_v24 = vld [vmem:[#allocation118_spill] sm:$0xff] }
 0x564   :  { %v1306_v35 = vadd.f32 %v1298_v30, %v941_v57  ;;  %v1999_v49 = vmul.f32 %v8149_v38, %v5629_v0  ;;  %v2175_v39 = vadd.f32 %v2167_v23, %v1810_v47  ;;  %v6296_v41 = vadd.f32 %v6215_v33, %v6174_v51  ;;  %v6341_v38 = vpop.permute.xlu0 %2567 }
 0x565   :  { %v6299_v58 = vadd.f32 %v784_v14, %v6184_v50  ;;  %v789_v63 = vmul.f32 %v8150_v52, %v8052_v2  ;;  %v2497_v40 = vadd.f32 %v2489_v12, %v2132_v4  ;;  %v698_v30 = vadd.f32 %v690_v42, %v6190_v44  ;;  %v8152_v50 = vld [vmem:[#allocation9_spill] sm:$0xff]  ;;  %v8154_v12 = vld [vmem:[#allocation140_spill] sm:$0xff]  ;;  %v8159_v4 = vld [vmem:[#allocation231_spill] sm:$0xff] }
 0x566   :  { %v1055_v23 = vmul.f32 %v8151_v24, %v6290_v26  ;;  %v1642_v57 = vadd.f32 %v1634_v59, %v1306_v35  ;;  %v2540_v47 = vadd.f32 %v2532_v16, %v2175_v39  ;;  %v6310_v51 = vadd.f32 %v738_v17, %v6194_v1  ;;  %v8153_v2 = vld [vmem:[#allocation21_spill] sm:$0xff]  ;;  %v8157_v59 = vld [vmem:[#allocation171_spill] sm:$0xff]  ;;  %v8164_v52 = vld [vmem:[#allocation258_spill] sm:$0xff] }
 0x567   :  { %v420_v33 = vmul.f32 %v8152_v50, %v8144_v6  ;;  %v464_v14 = vmul.f32 %v8153_v2, %v8054_v27  ;;  %v1154_v28 = vmul.f32 %v8154_v12, %v5610_v43  ;;  %v6322_v44 = vadd.f32 %v6153_v13, %v380_v25  ;;  %v8156_v27 = vld [vmem:[#allocation54_spill] sm:$0xff]  ;;  %v8158_v43 = vld [vmem:[#allocation191_spill] sm:$0xff] }
 0x568   :  { %2823 = vrot.lane.b32.xlu2 %v2544_v18, %s4033_s24  ;;  %v6304_v29 = vpop.permute.xlu1 %2519  ;;  %v6325_v42 = vadd.f32 %v786_v54, %v6202_v46  ;;  %v2007_v1 = vadd.f32 %v1999_v49, %v1642_v57  ;;  %v1391_v16 = vmul.f32 %v8157_v59, %v8156_v27  ;;  %v1490_v20 = vmul.f32 %v8158_v43, %v7885_v31  ;;  %v8160_v18 = vld [vmem:[#allocation224_spill] sm:$0xff]  ;;  %v8162_v54 = vld [vmem:[#allocation270_spill] sm:$0xff]  ;;  %v8163_v39 = vld [vmem:[#allocation235_spill] sm:$0xff] }
 0x569   :  { %v797_v17 = vadd.f32 %v789_v63, %v464_v14  ;;  %v6335_v36 = vmul.f32 %v8160_v18, %v8159_v4  ;;  %v1063_v13 = vadd.f32 %v1055_v23, %v698_v30  ;;  %v8161_v46 = vld [vmem:[#allocation56_spill] sm:$0xff]  ;;  %v2364_v35 = vmul.f32 %v8162_v54, %v5633_v19  ;;  %v8165_v31 = vld [vmem:[#allocation237_spill] sm:$0xff]  ;;  %v8166_v30 = vld [vmem:[#allocation251_spill] sm:$0xff] }
 0x56a   :  { %v6318_v9 = vpop.permute.xlu2 %2559  ;;  %2800 = vrot.lane.b32.xlu1 %v2497_v40, %s4035_s26  ;;  %v739_v25 = vmul.f32 %v8161_v46, %v8069_v5  ;;  %v6346_v63 = vmul.f32 %v8164_v52, %v8163_v39  ;;  %v1855_v24 = vmul.f32 %v8166_v30, %v5629_v0  ;;  %v8167_v23 = vld [vmem:[#allocation11_spill] sm:$0xff]  ;;  %v8170_v59 = vld [vmem:[#allocation310_spill] sm:$0xff]  ;;  %v8171_v0 = vld [vmem:[#allocation300_spill] sm:$0xff] }
 0x56b   :  { %8155 = vst [vmem:[#allocation207_spill] sm:$0xff] %v6318_v9  ;;  %2815 = vrot.lane.b32.xlu0 %v2540_v47, %s4033_s24  ;;  %3891 = vset.pattern.permute.xlu1 %v8134_v22  ;;  %v2729_v22 = vmul.f32 %v2720_v32, %v6074_v15  ;;  %v1162_v49 = vadd.f32 %v1154_v28, %v797_v17  ;;  %v8168_v50 = vld [vmem:[#allocation71_spill] sm:$0xff]  ;;  %v8169_v28 = vld [vmem:[#allocation86_spill] sm:$0xff]  ;;  %v8176_v39 = vld [vmem:[#allocation313_spill] sm:$0xff] }
 0x56c   :  { %v1756_v40 = vmul.f32 %v8165_v31, %v6335_v36  ;;  %v422_v57 = vmul.f32 %v8167_v23, %v8072_v11  ;;  %v6355_v47 = vadd.f32 %v6165_v7, %v420_v33  ;;  %v883_v32 = vmul.f32 %v8168_v50, %v8069_v5  ;;  %v8172_v4 = vld [vmem:[#allocation115_spill] sm:$0xff]  ;;  %v8173_v7 = vld [vmem:[#allocation114_spill] sm:$0xff]  ;;  %v8175_v5 = vld [vmem:[#allocation25_spill] sm:$0xff] }
 0x56d   :  { %v2372_v2 = vadd.f32 %v2364_v35, %v2007_v1  ;;  %v1399_v14 = vadd.f32 %v1391_v16, %v1063_v13  ;;  %v1498_v12 = vadd.f32 %v1490_v20, %v1162_v49  ;;  %v2121_v17 = vmul.f32 %v8169_v28, %v6346_v63  ;;  %v8174_v33 = vld [vmem:[#allocation126_spill] sm:$0xff]  ;;  %v8177_v30 = vld [vmem:[#allocation268_spill] sm:$0xff] }
 0x56e   :  { %v6363_v43 = vmul.f32 %v6063_v56, %v8170_v59  ;;  %v1053_v46 = vmul.f32 %v8172_v4, %v5738_v53  ;;  %v1104_v54 = vmul.f32 %v8174_v33, %v8173_v7  ;;  %v542_v1 = vmul.f32 %v8175_v5, %v8072_v11  ;;  %v8178_v23 = vld [vmem:[#allocation116_spill] sm:$0xff]  ;;  %v8180_v11 = vld [vmem:[#allocation158_spill] sm:$0xff]  ;;  %v8185_v33 = vld [vmem:[#allocation117_spill] sm:$0xff] }
 0x56f   :  { %v2737_v16 = vadd.f32 %v2729_v22, %v2372_v2  ;;  %v747_v13 = vadd.f32 %v739_v25, %v422_v57  ;;  %v1764_v35 = vadd.f32 %v1756_v40, %v1399_v14  ;;  %v1863_v49 = vadd.f32 %v1855_v24, %v1498_v12  ;;  %v8179_v28 = vld [vmem:[#allocation128_spill] sm:$0xff]  ;;  %v8182_v40 = vld [vmem:[#allocation58_spill] sm:$0xff]  ;;  %v8184_v2 = vld [vmem:[#allocation253_spill] sm:$0xff] }
 0x570   :  { %2623 = vperm.xlu2 %3892, %v8171_v0   ;;  %v2486_v31 = vmul.f32 %v8176_v39, %v6363_v43  ;;  %v6379_v50 = vmul.f32 %v8148_v37, %v8178_v23  ;;  %v1103_v59 = vmul.f32 %v8179_v28, %v6290_v26  ;;  %v6383_v0 = vadd.f32 %v883_v32, %v542_v1  ;;  %v8183_v24 = vld [vmem:[#allocation64_spill] sm:$0xff]  ;;  %v8188_v23 = vld [vmem:[#allocation179_spill] sm:$0xff]  ;;  %v8207_v9 = vld [vmem:[#allocation246_spill] sm:$0xff] }
 0x571   :  { %v6372_v20 = vpop.permute.xlu1 %2667  ;;  %v1295_v22 = vmul.f32 %v8180_v11, %v6290_v26  ;;  %v1440_v57 = vmul.f32 %v8183_v24, %v8182_v40  ;;  %v2220_v14 = vmul.f32 %v8184_v2, %v5633_v19  ;;  %v2129_v12 = vadd.f32 %v2121_v17, %v1764_v35  ;;  %v8186_v39 = vld [vmem:[#allocation208_spill] sm:$0xff]  ;;  %v8190_v17 = vld [vmem:[#allocation238_spill] sm:$0xff]  ;;  %v8191_v24 = vld [vmem:[#allocation119_spill] sm:$0xff] }
 0x572   :  { %2619 = vperm.xlu1 %3891, %v8177_v30   ;;  %v2585_v4 = vmul.f32 %v6250_v3, %v6074_v15  ;;  %v6397_v32 = vadd.f32 %v1053_v46, %v6296_v41  ;;  %v1051_v5 = vmul.f32 %v8185_v33, %v6379_v50  ;;  %v1112_v1 = vadd.f32 %v1104_v54, %v747_v13  ;;  %v6403_v30 = vpop.permute.xlu0 %2499  ;;  %v8189_v19 = vld [vmem:[#allocation152_spill] sm:$0xff]  ;;  %v8193_v2 = vld [vmem:[#allocation266_spill] sm:$0xff]  ;;  %v8196_v15 = vld [vmem:[#allocation287_spill] sm:$0xff] }
 0x573   :  { %v6387_v25 = vpop.permute.xlu2 %2763  ;;  %2932 = vrot.lane.b32.xlu0 %v2737_v16, %s4037_s4  ;;  %v1631_v16 = vmul.f32 %v8186_v39, %v8156_v27  ;;  %8187 = vst [vmem:[#allocation6_spill] sm:$0xff] %v6403_v30  ;;  %v1439_v28 = vmul.f32 %v8188_v23, %v8156_v27  ;;  %v1805_v35 = vmul.f32 %v8190_v17, %v8189_v19  ;;  %v8192_v54 = vld [vmem:[#allocation92_spill] sm:$0xff]  ;;  %v8194_v30 = vld [vmem:[#allocation242_spill] sm:$0xff] }
 0x574   :  { %8181 = vst [vmem:[#allocation95_spill] sm:$0xff] %v6387_v25  ;;  %v2494_v11 = vadd.f32 %v2486_v31, %v2129_v12  ;;  %v2228_v3 = vadd.f32 %v2220_v14, %v1863_v49  ;;  %v6411_v41 = vmul.f32 %v8148_v37, %v8191_v24  ;;  %v1111_v46 = vadd.f32 %v1103_v59, %v6310_v51  ;;  %v8195_v25 = vld [vmem:[#allocation189_spill] sm:$0xff]  ;;  %v8197_v37 = vld [vmem:[#allocation134_spill] sm:$0xff]  ;;  %v8199_v14 = vld [vmem:[#allocation304_spill] sm:$0xff] }
 0x575   :  { %v1303_v13 = vadd.f32 %v1295_v22, %v8192_v54  ;;  %v1996_v33 = vmul.f32 %v8193_v2, %v6335_v36  ;;  %v1448_v39 = vadd.f32 %v1440_v57, %v1112_v1  ;;  %v1804_v23 = vmul.f32 %v8194_v30, %v6335_v36  ;;  %v8198_v51 = vld [vmem:[#allocation137_spill] sm:$0xff]  ;;  %v8200_v30 = vld [vmem:[#allocation282_spill] sm:$0xff]  ;;  %v8201_v54 = vld [vmem:[#allocation103_spill] sm:$0xff] }
 0x576   :  { %v2170_v17 = vmul.f32 %v8196_v15, %v8195_v25  ;;  %v2593_v31 = vadd.f32 %v2585_v4, %v2228_v3  ;;  %v1149_v49 = vmul.f32 %v8197_v37, %v5738_v53  ;;  %v1151_v59 = vmul.f32 %v8198_v51, %v6290_v26  ;;  %v8202_v53 = vld [vmem:[#allocation127_spill] sm:$0xff] }
 0x577   :  { %v1639_v22 = vadd.f32 %v1631_v16, %v1303_v13  ;;  %v2361_v12 = vmul.f32 %v8199_v14, %v6346_v63  ;;  %v1447_v57 = vadd.f32 %v1439_v28, %v1111_v46  ;;  %v1813_v1 = vadd.f32 %v1805_v35, %v1448_v39  ;;  %v8203_v16 = vld [vmem:[#allocation132_spill] sm:$0xff]  ;;  %v8204_v13 = vld [vmem:[#allocation185_spill] sm:$0xff] }
 0x578   :  { %2794 = vrot.lane.b32.xlu2 %v2494_v11, %s4035_s26  ;;  %v2169_v24 = vmul.f32 %v8200_v30, %v6346_v63  ;;  %v2535_v15 = vmul.f32 %v6304_v29, %v8201_v54  ;;  %v1054_v11 = vmul.f32 %v8202_v53, %v6411_v41  ;;  %v1152_v3 = vmul.f32 %v8203_v16, %v8173_v7  ;;  %v8205_v46 = vld [vmem:[#allocation188_spill] sm:$0xff]  ;;  %v8206_v29 = vld [vmem:[#allocation182_spill] sm:$0xff] }
 0x579   :  { %v1485_v28 = vmul.f32 %v8204_v13, %v7877_v62  ;;  %v2004_v35 = vadd.f32 %v1996_v33, %v1639_v22  ;;  %v1487_v2 = vmul.f32 %v8205_v46, %v8156_v27  ;;  %v1812_v39 = vadd.f32 %v1804_v23, %v1447_v57  ;;  %v8208_v33 = vld [vmem:[#allocation248_spill] sm:$0xff]  ;;  %v8210_v57 = vld [vmem:[#allocation133_spill] sm:$0xff] }
 0x57a   :  { %2858 = vrot.lane.b32.xlu1 %v2593_v31, %s4034_s25  ;;  %v6433_v4 = vpop.permute.xlu1 %2715  ;;  %v2178_v37 = vadd.f32 %v2170_v17, %v1813_v1  ;;  %v2534_v31 = vmul.f32 %v8206_v29, %v6363_v43  ;;  %v1157_v14 = vadd.f32 %v1149_v49, %v6299_v58  ;;  %v1159_v30 = vadd.f32 %v1151_v59, %v6325_v42  ;;  %v8209_v17 = vld [vmem:[#allocation222_spill] sm:$0xff]  ;;  %v8211_v29 = vld [vmem:[#allocation143_spill] sm:$0xff]  ;;  %v6456_v49 = vpop.permute.xlu0 %2511 }
 0x57b   :  { %v2369_v53 = vadd.f32 %v2361_v12, %v2004_v35  ;;  %v1850_v13 = vmul.f32 %v8207_v9, %v5764_v21  ;;  %v1852_v22 = vmul.f32 %v8208_v33, %v6335_v36  ;;  %v2177_v46 = vadd.f32 %v2169_v24, %v1812_v39  ;;  %v8213_v12 = vld [vmem:[#allocation286_spill] sm:$0xff]  ;;  %v8215_v39 = vld [vmem:[#allocation96_spill] sm:$0xff] }
 0x57c   :  { %v2708_v51 = vpop.permute.xlu2 %2707  ;;  %v2543_v23 = vadd.f32 %v2535_v15, %v2178_v37  ;;  %v1100_v1 = vmul.f32 %v8210_v57, %v8209_v17  ;;  %v1248_v27 = vmul.f32 %v8211_v29, %v8173_v7  ;;  %v1493_v58 = vadd.f32 %v1485_v28, %v1157_v14  ;;  %v8214_v24 = vld [vmem:[#allocation250_spill] sm:$0xff]  ;;  %v8216_v28 = vld [vmem:[#allocation157_spill] sm:$0xff]  ;;  %v8236_v7 = vld [vmem:[#allocation292_spill] sm:$0xff] }
 0x57d   :  { %v2726_v16 = vmul.f32 %v2708_v51, %v6363_v43  ;;  %v1495_v59 = vadd.f32 %v1487_v2, %v1159_v30  ;;  %v2217_v9 = vmul.f32 %v8213_v12, %v6346_v63  ;;  %v2542_v35 = vadd.f32 %v2534_v31, %v2177_v46  ;;  %v8217_v2 = vld [vmem:[#allocation159_spill] sm:$0xff]  ;;  %v8222_v12 = vld [vmem:[#allocation166_spill] sm:$0xff] }
 0x57e   :  { %v2215_v15 = vmul.f32 %v8214_v24, %v8136_v55  ;;  %v6466_v37 = vadd.f32 %v1051_v5, %v8215_v39  ;;  %v6469_v51 = vadd.f32 %v1054_v11, %v6322_v44  ;;  %v1246_v14 = vmul.f32 %v8216_v28, %v6411_v41  ;;  %v8219_v46 = vld [vmem:[#allocation147_spill] sm:$0xff]  ;;  %v8220_v5 = vld [vmem:[#allocation48_spill] sm:$0xff] }
 0x57f   :  { %v6458_v42 = vadd.f32 %v2726_v16, %v2369_v53  ;;  %v1249_v30 = vmul.f32 %v8217_v2, %v5937_v34  ;;  %v8218_v53 = vld [vmem:[#allocation98_spill] sm:$0xff]  ;;  %v1858_v31 = vadd.f32 %v1850_v13, %v1493_v58  ;;  %v1860_v33 = vadd.f32 %v1852_v22, %v1495_v59  ;;  %v8221_v44 = vld [vmem:[#allocation136_spill] sm:$0xff]  ;;  %v8223_v13 = vld [vmem:[#allocation209_spill] sm:$0xff] }
 0x580   :  { %2821 = vrot.lane.b32.xlu2 %v2543_v23, %s4033_s24  ;;  %v1160_v16 = vadd.f32 %v1152_v3, %v8218_v53  ;;  %v2582_v23 = vmul.f32 %v8219_v46, %v6363_v43  ;;  %v6480_v57 = vadd.f32 %v1100_v1, %v8220_v5  ;;  %v6484_v11 = vmul.f32 %v8221_v44, %v6411_v41  ;;  %v8224_v39 = vld [vmem:[#allocation43_spill] sm:$0xff] }
 0x581   :  { %8212 = vst [vmem:[#allocation120_spill] sm:$0xff] %v6458_v42  ;;  %v1256_v29 = vadd.f32 %v1248_v27, %v6383_v0  ;;  %v1488_v24 = vmul.f32 %v8222_v12, %v8182_v40  ;;  %v1585_v22 = vmul.f32 %v8223_v13, %v7835_v10  ;;  %v2225_v58 = vadd.f32 %v2217_v9, %v1860_v33  ;;  %v8225_v1 = vld [vmem:[#allocation155_spill] sm:$0xff]  ;;  %v8228_v27 = vld [vmem:[#allocation176_spill] sm:$0xff]  ;;  %v8232_v13 = vld [vmem:[#allocation194_spill] sm:$0xff] }
 0x582   :  { %2819 = vrot.lane.b32.xlu1 %v2542_v35, %s4033_s24  ;;  %v2223_v59 = vadd.f32 %v2215_v15, %v1858_v31  ;;  %v1387_v28 = vmul.f32 %v8225_v1, %v8224_v39  ;;  %v8226_v2 = vld [vmem:[#allocation91_spill] sm:$0xff]  ;;  %v1584_v0 = vmul.f32 %v8228_v27, %v8182_v40  ;;  %v6506_v1 = vmul.f32 %v8160_v18, %v8232_v13 }
 0x583   :  { %v2556_v3 = vpop.permute.xlu1 %2555  ;;  %v1254_v53 = vadd.f32 %v1246_v14, %v8226_v2  ;;  %v8227_v46 = vld [vmem:[#allocation107_spill] sm:$0xff]  ;;  %v2590_v31 = vadd.f32 %v2582_v23, %v2225_v58  ;;  %v8238_v23 = vld [vmem:[#allocation254_spill] sm:$0xff] }
 0x584   :  { %v2580_v35 = vmul.f32 %v2556_v3, %v6269_v45  ;;  %v1257_v5 = vadd.f32 %v1249_v30, %v8227_v46  ;;  %v8230_v12 = vld [vmem:[#allocation215_spill] sm:$0xff]  ;;  %v1496_v3 = vadd.f32 %v1488_v24, %v1160_v16  ;;  %v8234_v30 = vld [vmem:[#allocation206_spill] sm:$0xff]  ;;  %v8235_v46 = vld [vmem:[#allocation256_spill] sm:$0xff]  ;;  %v1592_v16 = vadd.f32 %v1584_v0, %v1256_v29 }
 0x585   :  { %v6498_v44 = vpop.permute.xlu2 %2551  ;;  %v1950_v42 = vmul.f32 %v8230_v12, %v5951_v8  ;;  %v8231_v9 = vld [vmem:[#allocation243_spill] sm:$0xff]  ;;  %v1949_v27 = vmul.f32 %v8235_v46, %v8189_v19  ;;  %v2218_v12 = vmul.f32 %v8236_v7, %v8195_v25  ;;  %v1947_v24 = vmul.f32 %v8238_v23, %v6506_v1  ;;  %v3946_v0 = vld [vmem:[%s7500_s6 + $0x28] sm:$0xff] }
 0x586   :  { %8229 = vst [vmem:[#allocation156_spill] sm:$0xff] %v6498_v44  ;;  %v1853_v15 = vmul.f32 %v8231_v9, %v8189_v19  ;;  %v2588_v33 = vadd.f32 %v2580_v35, %v2223_v59  ;;  %v8233_v14 = vld [vmem:[#allocation55_spill] sm:$0xff]  ;;  %v1593_v40 = vadd.f32 %v1585_v22, %v1257_v5  ;;  %v6524_v35 = vpop.permute.xlu0 %2711  ;;  %v8241_v22 = vld [vmem:[#allocation305_spill] sm:$0xff]  ;;  %v8242_v5 = vld [vmem:[#allocation192_spill] sm:$0xff]  ;;  %v2680_v29 = vmul.f32 %v6372_v20, %v6089_v48 }
 0x587   :  { %v1582_v2 = vmul.f32 %v8234_v30, %v8233_v14  ;;  %v8237_v44 = vld [vmem:[#allocation299_spill] sm:$0xff]  ;;  %8240 = vst [vmem:[#allocation80_spill] sm:$0xff] %v6524_v35  ;;  %v2314_v7 = vmul.f32 %v8241_v22, %v8195_v25  ;;  %v1957_v23 = vadd.f32 %v1949_v27, %v1592_v16  ;;  %v8249_v27 = vld [vmem:[#allocation269_spill] sm:$0xff] }
 0x588   :  { %v2315_v9 = vmul.f32 %v8237_v44, %v5960_v60  ;;  %2852 = vrot.lane.b32.xlu2 %v2590_v31, %s4034_s25  ;;  %2848 = vrot.lane.b32.xlu0 %v2588_v33, %s4034_s25  ;;  %v8239_v58 = vld [vmem:[#allocation271_spill] sm:$0xff]  ;;  %v6530_v44 = vmul.f32 %v8160_v18, %v8242_v5  ;;  %v1958_v31 = vadd.f32 %v1950_v42, %v1593_v40  ;;  %v8243_v33 = vld [vmem:[#allocation168_spill] sm:$0xff]  ;;  %v8245_v18 = vld [vmem:[#allocation178_spill] sm:$0xff] }
 0x589   :  { %v6522_v59 = vmul.f32 %v8164_v52, %v8239_v58  ;;  %v1861_v13 = vadd.f32 %v1853_v15, %v1496_v3  ;;  %v1389_v30 = vmul.f32 %v8243_v33, %v7877_v62  ;;  %v1590_v46 = vadd.f32 %v1582_v2, %v1254_v53  ;;  %v8244_v58 = vld [vmem:[#allocation303_spill] sm:$0xff]  ;;  %v8246_v42 = vld [vmem:[#allocation220_spill] sm:$0xff]  ;;  %v8248_v53 = vld [vmem:[#allocation225_spill] sm:$0xff] }
 0x58a   :  { %2615 = vperm.xlu1 %3891, %v3946_v0   ;;  %v1390_v40 = vmul.f32 %v8245_v18, %v8233_v14  ;;  %v1752_v15 = vmul.f32 %v8246_v42, %v6530_v44  ;;  %v2323_v3 = vadd.f32 %v2315_v9, %v1958_v31  ;;  %v2322_v25 = vadd.f32 %v2314_v7, %v1957_v23  ;;  %v8247_v0 = vld [vmem:[#allocation314_spill] sm:$0xff]  ;;  %v8250_v7 = vld [vmem:[#allocation312_spill] sm:$0xff]  ;;  %v8252_v42 = vld [vmem:[#allocation281_spill] sm:$0xff] }
 0x58b   :  { %v2312_v22 = vmul.f32 %v8244_v58, %v6522_v59  ;;  %v2226_v20 = vadd.f32 %v2218_v12, %v1861_v13  ;;  %v1955_v35 = vadd.f32 %v1947_v24, %v1590_v46  ;;  %v6547_v19 = vmul.f32 %v6063_v56, %v8247_v0  ;;  %v8251_v58 = vld [vmem:[#allocation234_spill] sm:$0xff] }
 0x58c   :  { %v2664_v5 = vpop.permute.xlu1 %2663  ;;  %v1755_v2 = vmul.f32 %v8248_v53, %v6506_v1  ;;  %v6554_v16 = vmul.f32 %v8164_v52, %v8249_v27  ;;  %v2583_v12 = vmul.f32 %v6341_v38, %v8201_v54  ;;  %v2688_v9 = vadd.f32 %v2680_v29, %v2323_v3  ;;  %v8257_v27 = vld [vmem:[#allocation214_spill] sm:$0xff] }
 0x58d   :  { %v2679_v62 = vmul.f32 %v2664_v5, %v8201_v54  ;;  %v2320_v24 = vadd.f32 %v2312_v22, %v1955_v35  ;;  %v6560_v13 = vmul.f32 %v6063_v56, %v8250_v7  ;;  %v1398_v23 = vadd.f32 %v1390_v40, %v6469_v51  ;;  %v8253_v35 = vld [vmem:[#allocation165_spill] sm:$0xff] }
 0x58e   :  { %v2656_v31 = vpop.permute.xlu2 %2655  ;;  %v1754_v18 = vmul.f32 %v8251_v58, %v5764_v21  ;;  %v2120_v5 = vmul.f32 %v8252_v42, %v6522_v59  ;;  %v2591_v0 = vadd.f32 %v2583_v12, %v2226_v20  ;;  %v1395_v38 = vadd.f32 %v1387_v28, %v6466_v37  ;;  %v6574_v3 = vpop.permute.xlu0 %2659  ;;  %v8255_v20 = vld [vmem:[#allocation240_spill] sm:$0xff]  ;;  %v8256_v37 = vld [vmem:[#allocation131_spill] sm:$0xff]  ;;  %v8260_v7 = vld [vmem:[#allocation113_spill] sm:$0xff] }
 0x58f   :  { %v2687_v33 = vadd.f32 %v2679_v62, %v2322_v25  ;;  %v2677_v46 = vmul.f32 %v2656_v31, %v6547_v19  ;;  %v1297_v29 = vmul.f32 %v8253_v35, %v5937_v34  ;;  %v8254_v25 = vld [vmem:[#allocation279_spill] sm:$0xff]  ;;  %v1397_v21 = vadd.f32 %v1389_v30, %v6397_v32  ;;  %v8258_v31 = vld [vmem:[#allocation316_spill] sm:$0xff]  ;;  %v8259_v32 = vld [vmem:[#allocation141_spill] sm:$0xff] }
 0x590   :  { %2897 = vrot.lane.b32.xlu2 %v2688_v9, %s4036_s27  ;;  %v2117_v22 = vmul.f32 %v8254_v25, %v6554_v16  ;;  %v1763_v40 = vadd.f32 %v1755_v2, %v1398_v23  ;;  %v2119_v62 = vmul.f32 %v8255_v20, %v8136_v55  ;;  %v2485_v28 = vmul.f32 %v8256_v37, %v6547_v19  ;;  %v8262_v58 = vld [vmem:[#allocation45_spill] sm:$0xff]  ;;  %v8263_v42 = vld [vmem:[#allocation184_spill] sm:$0xff]  ;;  %v8265_v35 = vld [vmem:[#allocation174_spill] sm:$0xff] }
 0x591   :  { %v6576_v51 = vadd.f32 %v2677_v46, %v2320_v24  ;;  %2895 = vrot.lane.b32.xlu0 %v2687_v33, %s4036_s27  ;;  %v1110_v53 = vadd.f32 %v6484_v11, %v6355_v47  ;;  %v1633_v12 = vmul.f32 %v8257_v27, %v7835_v10  ;;  %v1760_v9 = vadd.f32 %v1752_v15, %v1395_v38  ;;  %v8261_v46 = vld [vmem:[#allocation108_spill] sm:$0xff]  ;;  %v8264_v11 = vld [vmem:[#allocation187_spill] sm:$0xff]  ;;  %v8268_v27 = vld [vmem:[#allocation226_spill] sm:$0xff] }
 0x592   :  { %2854 = vrot.lane.b32.xlu1 %v2591_v0, %s4034_s25  ;;  %v2482_v24 = vmul.f32 %v8258_v31, %v6560_v13  ;;  %v1243_v30 = vmul.f32 %v8259_v32, %v6379_v50  ;;  %v1762_v2 = vadd.f32 %v1754_v18, %v1397_v21  ;;  %v2128_v55 = vadd.f32 %v2120_v5, %v1763_v40  ;;  %v8266_v18 = vld [vmem:[#allocation217_spill] sm:$0xff]  ;;  %v8267_v37 = vld [vmem:[#allocation232_spill] sm:$0xff] }
 0x593   :  { %v2484_v33 = vmul.f32 %v8260_v7, %v6269_v45  ;;  %v1305_v23 = vadd.f32 %v1297_v29, %v8261_v46  ;;  %v1436_v47 = vmul.f32 %v8263_v42, %v8262_v58  ;;  %v1438_v0 = vmul.f32 %v8264_v11, %v8233_v14  ;;  %v8269_v31 = vld [vmem:[#allocation200_spill] sm:$0xff]  ;;  %v8271_v42 = vld [vmem:[#allocation306_spill] sm:$0xff] }
 0x594   :  { %v2125_v15 = vadd.f32 %v2117_v22, %v1760_v9  ;;  %v1579_v25 = vmul.f32 %v8265_v35, %v8224_v39  ;;  %v1998_v5 = vmul.f32 %v8266_v18, %v5951_v8  ;;  %v2127_v21 = vadd.f32 %v2119_v62, %v1762_v2  ;;  %v8270_v9 = vld [vmem:[#allocation236_spill] sm:$0xff] }
 0x595   :  { %v6600_v38 = vpop.permute.xlu1 %2767  ;;  %v2493_v40 = vadd.f32 %v2485_v28, %v2128_v55  ;;  %v1641_v20 = vadd.f32 %v1633_v12, %v1305_v23  ;;  %v6608_v29 = vmul.f32 %v8164_v52, %v8267_v37  ;;  %v1801_v32 = vmul.f32 %v8269_v31, %v8268_v27  ;;  %v8272_v12 = vld [vmem:[#allocation280_spill] sm:$0xff]  ;;  %v8273_v55 = vld [vmem:[#allocation221_spill] sm:$0xff] }
 0x596   :  { %v2490_v22 = vadd.f32 %v2482_v24, %v2125_v15  ;;  %v1803_v46 = vmul.f32 %v8270_v9, %v6506_v1  ;;  %v2363_v11 = vmul.f32 %v8271_v42, %v5960_v60  ;;  %v2492_v35 = vadd.f32 %v2484_v33, %v2127_v21  ;;  %v8274_v15 = vld [vmem:[#allocation285_spill] sm:$0xff]  ;;  %v8275_v21 = vld [vmem:[#allocation275_spill] sm:$0xff]  ;;  %v6637_v37 = vpop.permute.xlu0 %2647 }
 0x597   :  { %v2700_v7 = vpop.permute.xlu2 %2699  ;;  %v1444_v28 = vadd.f32 %v1436_v47, %v6480_v57  ;;  %v1446_v52 = vadd.f32 %v1438_v0, %v1110_v53  ;;  %v2166_v2 = vmul.f32 %v8272_v12, %v6608_v29  ;;  %v6623_v24 = vmul.f32 %v6063_v56, %v8273_v55  ;;  %v8277_v57 = vld [vmem:[#allocation46_spill] sm:$0xff]  ;;  %v8278_v47 = vld [vmem:[#allocation252_spill] sm:$0xff]  ;;  %8279 = vst [vmem:[#allocation70_spill] sm:$0xff] %v6637_v37  ;;  %v8281_v42 = vld [vmem:[#allocation301_spill] sm:$0xff] }
 0x598   :  { %v2724_v62 = vmul.f32 %v2700_v7, %v6269_v45  ;;  %2792 = vrot.lane.b32.xlu2 %v2493_v40, %s4035_s26  ;;  %v2006_v23 = vadd.f32 %v1998_v5, %v1641_v20  ;;  %v2168_v33 = vmul.f32 %v8274_v15, %v6522_v59  ;;  %v2728_v18 = vmul.f32 %v6433_v4, %v6089_v48  ;;  %v8280_v5 = vld [vmem:[#allocation53_spill] sm:$0xff]  ;;  %v8283_v55 = vld [vmem:[#allocation79_spill] sm:$0xff] }
 0x599   :  { %2786 = vrot.lane.b32.xlu0 %v2490_v22, %s4035_s26  ;;  %v1251_v53 = vadd.f32 %v1243_v30, %v8277_v57  ;;  %v1944_v56 = vmul.f32 %v8278_v47, %v6530_v44  ;;  %v1809_v0 = vadd.f32 %v1801_v32, %v1444_v28  ;;  %v2531_v20 = vmul.f32 %v8280_v5, %v6623_v24  ;;  %v8282_v30 = vld [vmem:[#allocation67_spill] sm:$0xff]  ;;  %v8288_v57 = vld [vmem:[#allocation169_spill] sm:$0xff] }
 0x59a   :  { %v6631_v40 = vadd.f32 %v2724_v62, %v8275_v21  ;;  %2790 = vrot.lane.b32.xlu1 %v2492_v35, %s4035_s26  ;;  %v1811_v31 = vadd.f32 %v1803_v46, %v1446_v52  ;;  %v2371_v7 = vadd.f32 %v2363_v11, %v2006_v23  ;;  %v2533_v4 = vmul.f32 %v6456_v49, %v6547_v19  ;;  %v8284_v15 = vld [vmem:[#allocation47_spill] sm:$0xff]  ;;  %v8290_v5 = vld [vmem:[#allocation81_spill] sm:$0xff] }
 0x59b   :  { %v1587_v22 = vadd.f32 %v1579_v25, %v1251_v53  ;;  %v2174_v9 = vadd.f32 %v2166_v2, %v1809_v0  ;;  %v2309_v35 = vmul.f32 %v8281_v42, %v6554_v16  ;;  %v882_v62 = vmul.f32 %v8282_v30, %v8138_v61  ;;  %v8285_v52 = vld [vmem:[#allocation15_spill] sm:$0xff]  ;;  %v8286_v25 = vld [vmem:[#allocation84_spill] sm:$0xff]  ;;  %v8287_v2 = vld [vmem:[#allocation30_spill] sm:$0xff] }
 0x59c   :  { %8276 = vst [vmem:[#allocation78_spill] sm:$0xff] %v6631_v40  ;;  %v2176_v12 = vadd.f32 %v2168_v33, %v1811_v31  ;;  %v2736_v32 = vadd.f32 %v2728_v18, %v2371_v7  ;;  %v783_v21 = vmul.f32 %v8284_v15, %v8283_v55  ;;  %v460_v49 = vmul.f32 %v8285_v52, %v8144_v6  ;;  %v8289_v33 = vld [vmem:[#allocation151_spill] sm:$0xff]  ;;  %v8293_v7 = vld [vmem:[#allocation61_spill] sm:$0xff]  ;;  %v8294_v42 = vld [vmem:[#allocation216_spill] sm:$0xff] }
 0x59d   :  { %v1952_v46 = vadd.f32 %v1944_v56, %v1587_v22  ;;  %v2539_v11 = vadd.f32 %v2531_v20, %v2174_v9  ;;  %v541_v23 = vmul.f32 %v8287_v2, %v8286_v25  ;;  %v1342_v53 = vmul.f32 %v8288_v57, %v6411_v41  ;;  %v8291_v6 = vld [vmem:[#allocation31_spill] sm:$0xff]  ;;  %v8297_v15 = vld [vmem:[#allocation54_spill] sm:$0xff]  ;;  %v8300_v57 = vld [vmem:[#allocation112_spill] sm:$0xff] }
 0x59e   :  { %v6647_v28 = vpop.permute.xlu1 %2547  ;;  %v2541_v61 = vadd.f32 %v2533_v4, %v2176_v12  ;;  %v1247_v18 = vmul.f32 %v8289_v33, %v6290_v26  ;;  %v458_v20 = vmul.f32 %v8291_v6, %v8290_v5  ;;  %v8292_v31 = vld [vmem:[#allocation87_spill] sm:$0xff]  ;;  %v1678_v30 = vmul.f32 %v8294_v42, %v8233_v14  ;;  %v8295_v4 = vld [vmem:[#allocation142_spill] sm:$0xff] }
 0x59f   :  { %v2317_v0 = vadd.f32 %v2309_v35, %v1952_v46  ;;  %v785_v22 = vmul.f32 %v8293_v7, %v8292_v31  ;;  %v890_v9 = vadd.f32 %v882_v62, %v541_v23  ;;  %v1148_v12 = vmul.f32 %v8295_v4, %v8209_v17  ;;  %v8296_v35 = vld [vmem:[#allocation144_spill] sm:$0xff]  ;;  %v8298_v46 = vld [vmem:[#allocation201_spill] sm:$0xff]  ;;  %v8303_v31 = vld [vmem:[#allocation195_spill] sm:$0xff] }
 0x5a0   :  { %v2644_v47 = vpop.permute.xlu2 %2643  ;;  %2930 = vrot.lane.b32.xlu2 %v2736_v32, %s4037_s4  ;;  %v1150_v32 = vmul.f32 %v8296_v35, %v6411_v41  ;;  %v791_v25 = vadd.f32 %v783_v21, %v458_v20  ;;  %v1350_v62 = vadd.f32 %v1342_v53, %v8300_v57  ;;  %v8301_v23 = vld [vmem:[#allocation265_spill] sm:$0xff]  ;;  %v1486_v7 = vmul.f32 %v8303_v31, %v8233_v14  ;;  %v8304_v42 = vld [vmem:[#allocation262_spill] sm:$0xff]  ;;  %v2756_v35 = vpop.permute.xlu0 %2755  ;;  %v8305_v21 = vld [vmem:[#allocation311_spill] sm:$0xff] }
 0x5a1   :  { %v2674_v56 = vmul.f32 %v2644_v47, %v6560_v13  ;;  %2813 = vrot.lane.b32.xlu0 %v2539_v11, %s4033_s24  ;;  %v1583_v11 = vmul.f32 %v8298_v46, %v8297_v15  ;;  %v793_v2 = vadd.f32 %v785_v22, %v460_v49  ;;  %v2043_v47 = vmul.f32 %v8301_v23, %v6506_v1  ;;  %v8306_v22 = vld [vmem:[#allocation205_spill] sm:$0xff] }
 0x5a2   :  { %2817 = vrot.lane.b32.xlu1 %v2541_v61, %s4033_s24  ;;  %v1255_v33 = vadd.f32 %v1247_v18, %v890_v9  ;;  %v8302_v61 = vld [vmem:[#allocation193_spill] sm:$0xff]  ;;  %v1948_v4 = vmul.f32 %v8304_v42, %v6335_v36  ;;  %v2408_v49 = vmul.f32 %v8305_v21, %v6522_v59  ;;  %v1849_v18 = vmul.f32 %v8306_v22, %v8268_v27 }
 0x5a3   :  { %v6675_v52 = vadd.f32 %v2674_v56, %v2317_v0  ;;  %v1484_v6 = vmul.f32 %v8302_v61, %v8262_v58  ;;  %v1686_v0 = vadd.f32 %v1678_v30, %v1350_v62  ;;  %v1156_v56 = vadd.f32 %v1148_v12, %v791_v25  ;;  %v8307_v46 = vld [vmem:[#allocation241_spill] sm:$0xff]  ;;  %v3947_v30 = vld [vmem:[%s7500_s6 + $0x18] sm:$0xff] }
 0x5a4   :  { %v1158_v53 = vadd.f32 %v1150_v32, %v793_v2  ;;  %v1591_v20 = vadd.f32 %v1583_v11, %v1255_v33  ;;  %v1851_v57 = vmul.f32 %v8307_v46, %v6506_v1  ;;  %v8308_v61 = vld [vmem:[#allocation297_spill] sm:$0xff]  ;;  %v8309_v25 = vld [vmem:[#allocation284_spill] sm:$0xff] }
 0x5a5   :  { %8299 = vst [vmem:[#allocation77_spill] sm:$0xff] %v6675_v52  ;;  %v2051_v23 = vadd.f32 %v2043_v47, %v1686_v0  ;;  %v2313_v31 = vmul.f32 %v8308_v61, %v6346_v63  ;;  %v1492_v12 = vadd.f32 %v1484_v6, %v1156_v56  ;;  %v2214_v2 = vmul.f32 %v8309_v25, %v6608_v29  ;;  %v3948_v33 = vld [vmem:[%s7500_s6] sm:$0xff]  ;;  %v8310_v47 = vld [vmem:[#allocation290_spill] sm:$0xff]  ;;  %v3949_v6 = vld [vmem:[%s7500_s6 + $0x10] sm:$0xff] }
 0x5a6   :  { %v1494_v32 = vadd.f32 %v1486_v7, %v1158_v53  ;;  %v1956_v11 = vadd.f32 %v1948_v4, %v1591_v20  ;;  %v2216_v42 = vmul.f32 %v8310_v47, %v6522_v59  ;;  %v2678_v7 = vmul.f32 %v6574_v3, %v6363_v43  ;;  %v8311_v4 = vld [vmem:[#allocation164_spill] sm:$0xff]  ;;  %v8315_v25 = vld [vmem:[#allocation213_spill] sm:$0xff] }
 0x5a7   :  { %v6690_v9 = vpop.permute.xlu1 %2651  ;;  %v2416_v0 = vadd.f32 %v2408_v49, %v2051_v23  ;;  %v1343_v56 = vmul.f32 %v8311_v4, %v6290_v26  ;;  %v1857_v53 = vadd.f32 %v1849_v18, %v1492_v12  ;;  %v8312_v20 = vld [vmem:[#allocation156_spill] sm:$0xff]  ;;  %v8313_v49 = vld [vmem:[#allocation207_spill] sm:$0xff]  ;;  %v8316_v4 = vld [vmem:[#allocation97_spill] sm:$0xff] }
 0x5a8   :  { %2607 = vperm.xlu2 %3892, %v3947_v30   ;;  %v2579_v22 = vmul.f32 %v8312_v20, %v6623_v24  ;;  %v1859_v46 = vadd.f32 %v1851_v57, %v1494_v32  ;;  %v2321_v61 = vadd.f32 %v2313_v31, %v1956_v11  ;;  %v2581_v23 = vmul.f32 %v8313_v49, %v6547_v19  ;;  %v6722_v47 = vpop.permute.xlu0 %2739  ;;  %v8317_v12 = vld [vmem:[#allocation272_spill] sm:$0xff]  ;;  %v8318_v57 = vld [vmem:[#allocation302_spill] sm:$0xff] }
 0x5a9   :  { %v2752_v62 = vpop.permute.xlu2 %2751  ;;  %2595 = vperm.xlu0 %3893, %v3948_v33   ;;  %v2222_v33 = vadd.f32 %v2214_v2, %v1857_v53  ;;  %v1351_v18 = vadd.f32 %v1343_v56, %v8316_v4  ;;  %v2044_v20 = vmul.f32 %v8317_v12, %v6335_v36  ;;  %v2358_v31 = vmul.f32 %v8318_v57, %v6608_v29  ;;  %v8319_v11 = vld [vmem:[#allocation104_spill] sm:$0xff]  ;;  %v8321_v49 = vld [vmem:[#allocation34_spill] sm:$0xff] }
 0x5aa   :  { %v2773_v21 = vmul.f32 %v2752_v62, %v6547_v19  ;;  %2603 = vperm.xlu1 %3891, %v3949_v6   ;;  %v1679_v62 = vmul.f32 %v8315_v25, %v8297_v15  ;;  %v2224_v3 = vadd.f32 %v2216_v42, %v1859_v46  ;;  %v2686_v6 = vadd.f32 %v2678_v7, %v2321_v61  ;;  %v8323_v2 = vld [vmem:[#allocation8_spill] sm:$0xff] }
 0x5ab   :  { %v2587_v32 = vadd.f32 %v2579_v22, %v2222_v33  ;;  %v378_v53 = vmul.f32 %v8323_v2, %v8290_v5  ;;  %v8324_v56 = vld [vmem:[#allocation36_spill] sm:$0xff]  ;;  %v8325_v22 = vld [vmem:[#allocation309_spill] sm:$0xff]  ;;  %v8326_v4 = vmov 0  }
 0x5ac   :  { %v6718_v30 = vadd.f32 %v2773_v21, %v2416_v0  ;;  %v8320_v0 = vld [vmem:[#allocation7_spill] sm:$0xff]  ;;  %v2589_v42 = vadd.f32 %v2581_v23, %v2224_v3  ;;  %v687_v46 = vmul.f32 %v8324_v56, %v8283_v55  ;;  %v1687_v61 = vadd.f32 %v1679_v62, %v1351_v18  ;;  %v8328_v5 = vld [vmem:[#allocation124_spill] sm:$0xff]  ;;  %v8329_v3 = vld [vmem:[#allocation17_spill] sm:$0xff] }
 0x5ad   :  { %v417_v21 = vmul.f32 %v8320_v0, %v8319_v11  ;;  %v2409_v33 = vmul.f32 %v8325_v22, %v6346_v63  ;;  %v1052_v23 = vmul.f32 %v8328_v5, %v8209_v17  ;;  %v8330_v62 = vld [vmem:[#allocation229_spill] sm:$0xff]  ;;  %v8331_v56 = vld [vmem:[#allocation160_spill] sm:$0xff]  ;;  %v8332_v17 = vld [vmem:[#allocation95_spill] sm:$0xff] }
 0x5ae   :  { %8314 = vst [vmem:[#allocation39_spill] sm:$0xff] %v6718_v30  ;;  %v8322_v30 = vld [vmem:[#allocation49_spill] sm:$0xff]  ;;  %v2052_v55 = vadd.f32 %v2044_v20, %v1687_v61  ;;  %v2366_v18 = vadd.f32 %v2358_v31, %v8330_v62  ;;  %v1435_v22 = vmul.f32 %v8331_v56, %v8224_v39  ;;  %v8333_v5 = vld [vmem:[#allocation175_spill] sm:$0xff]  ;;  %v8337_v62 = vld [vmem:[#allocation114_spill] sm:$0xff] }
 0x5af   :  { %v734_v25 = vmul.f32 %v8322_v30, %v8321_v49  ;;  %v8327_v30 = vld [vmem:[#allocation123_spill] sm:$0xff]  ;;  %v8338_v56 = vld [vmem:[#allocation148_spill] sm:$0xff] }
 0x5b0   :  { %2893 = vrot.lane.b32.xlu2 %v2686_v6, %s4036_s27  ;;  %v6736_v7 = vpop.permute.xlu1 %2759  ;;  %v1099_v12 = vmul.f32 %v8327_v30, %v6379_v50  ;;  %v2777_v6 = vmul.f32 %v6600_v38, %v8329_v3  ;;  %v2776_v30 = vmul.f32 %v8332_v17, %v6089_v48  ;;  %v695_v38 = vadd.f32 %v687_v46, %v378_v53  ;;  %v8339_v46 = vld [vmem:[#allocation198_spill] sm:$0xff] }
 0x5b1   :  { %2846 = vrot.lane.b32.xlu0 %v2587_v32, %s4034_s25  ;;  %3894 = vset.pattern.permute.xlu2 %v8326_v4  ;;  %v2774_v32 = vmul.f32 %v2756_v35, %v6363_v43  ;;  %v742_v2 = vadd.f32 %v734_v25, %v417_v21  ;;  %v2417_v52 = vadd.f32 %v2409_v33, %v2052_v55  ;;  %v8335_v35 = vld [vmem:[#allocation233_spill] sm:$0xff]  ;;  %v8336_v21 = vld [vmem:[#allocation274_spill] sm:$0xff]  ;;  %v8340_v33 = vld [vmem:[#allocation283_spill] sm:$0xff] }
 0x5b2   :  { %v2696_v57 = vpop.permute.xlu2 %2695  ;;  %2850 = vrot.lane.b32.xlu1 %v2589_v42, %s4034_s25  ;;  %3895 = vset.pattern.permute.xlu0 %v8326_v4  ;;  %v1388_v42 = vmul.f32 %v8333_v5, %v8262_v58  ;;  %v1800_v61 = vmul.f32 %v8335_v35, %v6530_v44  ;;  %v2785_v25 = vadd.f32 %v2777_v6, %v8336_v21  ;;  %v8343_v6 = vld [vmem:[#allocation183_spill] sm:$0xff] }
 0x5b3   :  { %v2723_v0 = vmul.f32 %v2696_v57, %v6623_v24  ;;  %v1107_v31 = vadd.f32 %v1099_v12, %v742_v2  ;;  %v1060_v57 = vadd.f32 %v1052_v23, %v695_v38  ;;  %v1296_v37 = vmul.f32 %v8338_v56, %v8337_v62  ;;  %v8342_v23 = vld [vmem:[#allocation58_spill] sm:$0xff]  ;;  %v8348_v21 = vld [vmem:[#allocation263_spill] sm:$0xff] }
 0x5b4   :  { %v2782_v17 = vadd.f32 %v2774_v32, %v2417_v52  ;;  %v1753_v58 = vmul.f32 %v8339_v46, %v8268_v27  ;;  %v2165_v55 = vmul.f32 %v8340_v33, %v6554_v16  ;;  %v1632_v52 = vmul.f32 %v8343_v6, %v8342_v23  ;;  %v8351_v6 = vld [vmem:[#allocation172_spill] sm:$0xff] }
 0x5b5   :  { %v6761_v40 = vadd.f32 %v2723_v0, %v2366_v18  ;;  %v6763_v20 = vpop.permute.xlu0 %2825  ;;  %v1443_v53 = vadd.f32 %v1435_v22, %v1107_v31  ;;  %v8341_v18 = vld [vmem:[#allocation196_spill] sm:$0xff]  ;;  %v1396_v12 = vadd.f32 %v1388_v42, %v1060_v57  ;;  %v8344_v22 = vld [vmem:[#allocation273_spill] sm:$0xff] }
 0x5b6   :  { %v2784_v0 = vadd.f32 %v2776_v30, %v8341_v18  ;;  %v2118_v27 = vmul.f32 %v8344_v22, %v6608_v29  ;;  %v8345_v30 = vld [vmem:[#allocation6_spill] sm:$0xff]  ;;  %v8346_v31 = vld [vmem:[#allocation101_spill] sm:$0xff]  ;;  %v8347_v42 = vld [vmem:[#allocation152_spill] sm:$0xff] }
 0x5b7   :  { %8334 = vst [vmem:[#allocation22_spill] sm:$0xff] %v6761_v40  ;;  %v1808_v32 = vadd.f32 %v1800_v61, %v1443_v53  ;;  %v2530_v5 = vmul.f32 %v8345_v30, %v6560_v13  ;;  %v1304_v35 = vadd.f32 %v1296_v37, %v8346_v31  ;;  %v1761_v57 = vadd.f32 %v1753_v58, %v1396_v12  ;;  %v8350_v18 = vld [vmem:[#allocation189_spill] sm:$0xff]  ;;  %v2991_v30 = vld [vmem:[%s7501_s7 + $0x38] sm:$0xff] }
 0x5b8   :  { %2965 = vrot.lane.b32.xlu2 %v2785_v25, %s4038_s16  ;;  %v1997_v25 = vmul.f32 %v8348_v21, %v8347_v42  ;;  %v2362_v22 = vmul.f32 %v8351_v6, %v8350_v18  ;;  %v8352_v37 = vld [vmem:[#allocation76_spill] sm:$0xff]  ;;  %v8353_v58 = vld [vmem:[#allocation13_spill] sm:$0xff] }
 0x5b9   :  { %v6776_v2 = vpop.permute.xlu1 %2703  ;;  %2959 = vrot.lane.b32.xlu0 %v2782_v17, %s4038_s16  ;;  %v2173_v56 = vadd.f32 %v2165_v55, %v1808_v32  ;;  %v8349_v17 = vld [vmem:[#allocation102_spill] sm:$0xff]  ;;  %v1640_v53 = vadd.f32 %v1632_v52, %v1304_v35  ;;  %v2126_v33 = vadd.f32 %v2118_v27, %v1761_v57  ;;  %v6797_v31 = vperm.slane %v8352_v37, 1  ;;  %v8354_v52 = vld [vmem:[#allocation75_spill] sm:$0xff] }
 0x5ba   :  { %v2799_v38 = vpop.permute.xlu2 %2798  ;;  %2963 = vrot.lane.b32.xlu1 %v2784_v0, %s4038_s16  ;;  %v2483_v46 = vmul.f32 %v8349_v17, %v6623_v24  ;;  %v457_v55 = vmul.f32 %v8353_v58, %v8319_v11  ;;  %v6803_v27 = vperm.slane %v8354_v52, 1  ;;  %v8355_v35 = vld [vmem:[#allocation218_spill] sm:$0xff]  ;;  %v8359_v52 = vld [vmem:[#allocation163_spill] sm:$0xff] }
 0x5bb   :  { %v2538_v0 = vadd.f32 %v2530_v5, %v2173_v56  ;;  %v2005_v12 = vadd.f32 %v1997_v25, %v1640_v53  ;;  %v6806_v21 = vperm.slane %v8355_v35, 1  ;;  %v8356_v5 = vld [vmem:[#allocation59_spill] sm:$0xff]  ;;  %v8357_v56 = vld [vmem:[#allocation129_spill] sm:$0xff]  ;;  %v1483_v35 = vmul.f32 %v8359_v52, %v8224_v39 }
 0x5bc   :  { %v2491_v32 = vadd.f32 %v2483_v46, %v2126_v33  ;;  %v782_v57 = vmul.f32 %v8356_v5, %v8321_v49  ;;  %v1147_v17 = vmul.f32 %v8357_v56, %v6379_v50  ;;  %v2809_v46 = vmul.f32 %v6797_v31, %v2799_v38  ;;  %v8360_v5 = vld [vmem:[#allocation80_spill] sm:$0xff]  ;;  %v8361_v38 = vld [vmem:[#allocation197_spill] sm:$0xff] }
 0x5bd   :  { %v2857_v61 = vpop.permute.xlu0 %2856  ;;  %v2370_v6 = vadd.f32 %v2362_v22, %v2005_v12  ;;  %v2727_v22 = vmul.f32 %v8360_v5, %v8201_v54  ;;  %v8364_v52 = vld [vmem:[#allocation89_spill] sm:$0xff]  ;;  %v8365_v5 = vld [vmem:[#allocation255_spill] sm:$0xff] }
 0x5be   :  { %v2867_v12 = vmul.f32 %v6806_v21, %v2857_v61  ;;  %v1900_v61 = vmul.f32 %v8365_v5, %v6335_v36  ;;  %v8369_v36 = vld [vmem:[#allocation120_spill] sm:$0xff] }
 0x5c0   :  { %2811 = vrot.lane.b32.xlu2 %v2538_v0, %s4033_s24  ;;  %v790_v0 = vadd.f32 %v782_v57, %v457_v55  ;;  %v2735_v57 = vadd.f32 %v2727_v22, %v2370_v6 }
 0x5c1   :  { %3029 = vperm.xlu0 %3895, %v2991_v30   ;;  %v8358_v30 = vld [vmem:[#allocation145_spill] sm:$0xff] }
 0x5c2   :  { %v2824_v37 = vpop.permute.xlu2 %2823  ;;  %2788 = vrot.lane.b32.xlu1 %v2491_v32, %s4035_s26  ;;  %v2748_v25 = vpop.permute.xlu1 %2747  ;;  %v1199_v58 = vmul.f32 %v8358_v30, %v6290_v26  ;;  %v1155_v40 = vadd.f32 %v1147_v17, %v790_v0  ;;  %v8363_v26 = vld [vmem:[#allocation277_spill] sm:$0xff] }
 0x5c3   :  { %v2834_v53 = vmul.f32 %v6803_v27, %v2824_v37  ;;  %v2772_v33 = vmul.f32 %v2748_v25, %v6269_v45  ;;  %v1535_v37 = vmul.f32 %v8361_v38, %v8297_v15  ;;  %v8362_v25 = vld [vmem:[#allocation239_spill] sm:$0xff]  ;;  %v8367_v15 = vld [vmem:[#allocation106_spill] sm:$0xff] }
 0x5c4   :  { %v1848_v55 = vmul.f32 %v8362_v25, %v6530_v44  ;;  %v1207_v42 = vadd.f32 %v1199_v58, %v8364_v52  ;;  %v1491_v23 = vadd.f32 %v1483_v35, %v1155_v40  ;;  %v2578_v40 = vmul.f32 %v6647_v28, %v6560_v13  ;;  %v8370_v35 = vld [vmem:[#allocation33_spill] sm:$0xff] }
 0x5c5   :  { %v2842_v32 = vadd.f32 %v2834_v53, %v2809_v46  ;;  %v2797_v56 = vpop.permute.xlu0 %2796  ;;  %v2780_v30 = vadd.f32 %v2772_v33, %v8363_v26  ;;  %v8366_v46 = vld [vmem:[#allocation288_spill] sm:$0xff]  ;;  %v974_v53 = vmul.f32 %v8367_v15, %v8321_v49  ;;  %v8368_v33 = vld [vmem:[#allocation291_spill] sm:$0xff] }
 0x5c6   :  { %v2213_v17 = vmul.f32 %v8366_v46, %v6554_v16  ;;  %v1543_v6 = vadd.f32 %v1535_v37, %v1207_v42  ;;  %v1856_v0 = vadd.f32 %v1848_v55, %v1491_v23  ;;  %v2265_v22 = vmul.f32 %v8368_v33, %v6346_v63  ;;  %v8372_v55 = vld [vmem:[#allocation186_spill] sm:$0xff] }
 0x5c7   :  { %v6827_v18 = vadd.f32 %v2867_v12, %v2842_v32  ;;  %v617_v12 = vmul.f32 %v8370_v35, %v8319_v11  ;;  %v8371_v32 = vld [vmem:[#allocation149_spill] sm:$0xff]  ;;  %v1675_v28 = vmul.f32 %v8372_v55, %v8224_v39  ;;  %v2808_v55 = vmul.f32 %v6797_v31, %v2797_v56 }
 0x5c8   :  { %2928 = vrot.lane.b32.xlu2 %v2735_v57, %s4037_s4  ;;  %v1339_v38 = vmul.f32 %v8371_v32, %v6379_v50  ;;  %v1908_v23 = vadd.f32 %v1900_v61, %v1543_v6  ;;  %v2221_v37 = vadd.f32 %v2213_v17, %v1856_v0  ;;  %v8373_v57 = vld [vmem:[#allocation260_spill] sm:$0xff]  ;;  %v8375_v0 = vld [vmem:[#allocation110_spill] sm:$0xff] }
 0x5c9   :  { %2955 = vrot.lane.b32.xlu0 %v2780_v30, %s4038_s16  ;;  %v982_v63 = vadd.f32 %v974_v53, %v617_v12  ;;  %v8374_v61 = vld [vmem:[#allocation264_spill] sm:$0xff]  ;;  %v2405_v33 = vmul.f32 %v8375_v0, %v6554_v16  ;;  %v8383_v0 = vld [vmem:[#allocation105_spill] sm:$0xff] }
 0x5ca   :  { %v2624_v58 = vpop.permute.xlu2 %2623  ;;  %2926 = vrot.lane.b32.xlu1 %v8369_v36, %s4037_s4  ;;  %v2273_v52 = vadd.f32 %v2265_v22, %v1908_v23  ;;  %v2586_v5 = vadd.f32 %v2578_v40, %v2221_v37  ;;  %v2040_v17 = vmul.f32 %v8374_v61, %v6530_v44  ;;  %v2676_v36 = vmul.f32 %v6690_v9, %v6269_v45  ;;  %v8377_v23 = vld [vmem:[#allocation162_spill] sm:$0xff] }
 0x5cb   :  { %v2633_v25 = vmul.f32 %v2624_v58, %v8329_v3  ;;  %v6850_v42 = vpop.permute.xlu1 %2691  ;;  %v2989_v3 = vld [vmem:[%s7501_s7 + $0x28] sm:$0xff]  ;;  %v1347_v15 = vadd.f32 %v1339_v38, %v982_v63  ;;  %v2770_v58 = vmul.f32 %v6722_v47, %v6560_v13  ;;  %v8376_v38 = vld [vmem:[#allocation276_spill] sm:$0xff]  ;;  %v1294_v37 = vmul.f32 %v8377_v23, %v6411_v41  ;;  %v8378_v47 = vld [vmem:[#allocation153_spill] sm:$0xff] }
 0x5cc   :  { %v1201_v9 = vmul.f32 %v8378_v47, %v5937_v34  ;;  %v8387_v23 = vld [vmem:[#allocation293_spill] sm:$0xff]  ;;  %v2725_v47 = vmul.f32 %v6776_v2, %v6547_v19  ;;  %v8389_v2 = vld [vmem:[#allocation223_spill] sm:$0xff] }
 0x5cd   :  { %v6855_v26 = vadd.f32 %v2633_v25, %v8373_v57  ;;  %v2612_v30 = vpop.permute.xlu0 %2611  ;;  %v1683_v6 = vadd.f32 %v1675_v28, %v1347_v15  ;;  %v2684_v25 = vadd.f32 %v2676_v36, %v8376_v38  ;;  %v8379_v57 = vld [vmem:[#allocation212_spill] sm:$0xff]  ;;  %v8381_v15 = vld [vmem:[#allocation93_spill] sm:$0xff]  ;;  %v8385_v36 = vld [vmem:[#allocation122_spill] sm:$0xff] }
 0x5ce   :  { %v2630_v46 = vmul.f32 %v2612_v30, %v6363_v43  ;;  %v3950_v43 = vld [vmem:[%s7500_s6 + $0x8] sm:$0xff]  ;;  %v2775_v30 = vmul.f32 %v6736_v7, %v8201_v54  ;;  %v1302_v61 = vadd.f32 %v1294_v37, %v8381_v15  ;;  %v2267_v37 = vmul.f32 %v8387_v23, %v5960_v60 }
 0x5cf   :  { %v2048_v40 = vadd.f32 %v2040_v17, %v1683_v6  ;;  %v8382_v17 = vld [vmem:[#allocation261_spill] sm:$0xff] }
 0x5d0   :  { %v6863_v53 = vadd.f32 %v2630_v46, %v2273_v52  ;;  %2844 = vrot.lane.b32.xlu2 %v2586_v5, %s4034_s25  ;;  %v8380_v5 = vld [vmem:[#allocation202_spill] sm:$0xff]  ;;  %v1995_v7 = vmul.f32 %v8382_v17, %v6506_v1 }
 0x5d1   :  { %3019 = vperm.xlu0 %3895, %v2989_v3   ;;  %v2413_v12 = vadd.f32 %v2405_v33, %v2048_v40  ;;  %v1537_v46 = vmul.f32 %v8380_v5, %v7835_v10  ;;  %v2835_v3 = vmul.f32 %v6803_v27, %v6763_v20  ;;  %v2987_v10 = vld [vmem:[%s7501_s7 + $0x18] sm:$0xff]  ;;  %v1209_v20 = vadd.f32 %v1201_v9, %v8383_v0  ;;  %v8384_v33 = vld [vmem:[#allocation211_spill] sm:$0xff]  ;;  %v8391_v17 = vld [vmem:[#allocation78_spill] sm:$0xff] }
 0x5d2   :  { %v6868_v22 = vpop.permute.xlu2 %2794  ;;  %2599 = vperm.xlu1 %3891, %v3950_v43   ;;  %v1902_v43 = vmul.f32 %v8384_v33, %v5951_v8  ;;  %v8388_v5 = vld [vmem:[#allocation295_spill] sm:$0xff] }
 0x5d3   :  { %v2778_v32 = vadd.f32 %v2770_v58, %v2413_v12  ;;  %v2360_v12 = vmul.f32 %v8385_v36, %v6522_v59 }
 0x5d4   :  { %v6877_v35 = vpop.permute.xlu1 %2743 }
 0x5d5   :  { %v2900_v6 = vpop.permute.xlu0 %2899 }
 0x5d8   :  { %2891 = vrot.lane.b32.xlu2 %v6576_v51, %s4036_s27  ;;  %v1630_v51 = vmul.f32 %v8379_v57, %v8233_v14 }
 0x5d9   :  { %2951 = vrot.lane.b32.xlu0 %v2778_v32, %s4038_s16  ;;  %v8386_v32 = vld [vmem:[#allocation72_spill] sm:$0xff] }
 0x5da   :  { %v2822_v63 = vpop.permute.xlu2 %2821  ;;  %2889 = vrot.lane.b32.xlu1 %v2684_v25, %s4036_s27  ;;  %v1638_v58 = vadd.f32 %v1630_v51, %v1302_v61  ;;  %v2783_v38 = vadd.f32 %v2775_v30, %v8386_v32  ;;  %v1545_v25 = vadd.f32 %v1537_v46, %v1209_v20  ;;  %v2310_v46 = vmul.f32 %v8388_v5, %v6608_v29 }
 0x5db   :  { %v2833_v28 = vmul.f32 %v6803_v27, %v2822_v63  ;;  %3896 = vset.pattern.permute.xlu1 %v8326_v4  ;;  %v2990_v4 = vld [vmem:[%s7501_s7 + $0x30] sm:$0xff] }
 0x5dc   :  { %v2801_v52 = vpop.permute.xlu1 %2800  ;;  %v2003_v63 = vadd.f32 %v1995_v7, %v1638_v58  ;;  %v1910_v8 = vadd.f32 %v1902_v43, %v1545_v25 }
 0x5dd   :  { %v6899_v34 = vadd.f32 %v2833_v28, %v2808_v55  ;;  %v2810_v56 = vmul.f32 %v6797_v31, %v2801_v52  ;;  %v3058_v52 = vld [vmem:[%s7503_s9 + $0x30] sm:$0xff] }
 0x5de   :  { %v2368_v55 = vadd.f32 %v2360_v12, %v2003_v63  ;;  %v2275_v57 = vadd.f32 %v2267_v37, %v1910_v8  ;;  %v8394_v63 = vld [vmem:[#allocation77_spill] sm:$0xff] }
 0x5df   :  { %v2843_v40 = vadd.f32 %v2835_v3, %v2810_v56  ;;  %v6928_v3 = vpop.permute.xlu0 %2815  ;;  %v6932_v56 = vperm.slane %v8389_v2, 1  ;;  %v8400_v2 = vld [vmem:[#allocation180_spill] sm:$0xff] }
 0x5e0   :  { %3024 = vperm.xlu2 %3894, %v2990_v4   ;;  %v2733_v30 = vadd.f32 %v2725_v47, %v2368_v55  ;;  %v8395_v47 = vld [vmem:[#allocation138_spill] sm:$0xff] }
 0x5e1   :  { %3009 = vperm.xlu0 %3895, %v2987_v10   ;;  %v8392_v10 = vld [vmem:[#allocation228_spill] sm:$0xff]  ;;  %v2909_v12 = vmul.f32 %v6932_v56, %v2900_v6  ;;  %v8396_v6 = vld [vmem:[#allocation74_spill] sm:$0xff] }
 0x5e2   :  { %v2853_v9 = vpop.permute.xlu2 %2852  ;;  %2961 = vrot.lane.b32.xlu1 %v2783_v38, %s4038_s16  ;;  %v2318_v0 = vadd.f32 %v2310_v46, %v8392_v10  ;;  %v8393_v38 = vld [vmem:[#allocation27_spill] sm:$0xff]  ;;  %v926_v55 = vmul.f32 %v8396_v6, %v8321_v49 }
 0x5e3   :  { %v577_v25 = vmul.f32 %v8393_v38, %v8319_v11  ;;  %v8407_v38 = vld [vmem:[#allocation298_spill] sm:$0xff] }
 0x5e4   :  { %v2620_v28 = vpop.permute.xlu1 %2619 }
 0x5e5   :  { %v2632_v51 = vmul.f32 %v2620_v28, %v6089_v48  ;;  %v8390_v48 = vld [vmem:[#allocation70_spill] sm:$0xff]  ;;  %v934_v46 = vadd.f32 %v926_v55, %v577_v25 }
 0x5e6   :  { %v2675_v15 = vmul.f32 %v8390_v48, %v6623_v24  ;;  %v3052_v48 = vld [vmem:[%s7503_s9] sm:$0xff] }
 0x5e7   :  { %v2640_v60 = vadd.f32 %v2632_v51, %v2275_v57  ;;  %v6952_v23 = vpop.permute.xlu0 %2932  ;;  %v8398_v51 = vld [vmem:[#allocation58_spill] sm:$0xff] }
 0x5e8   :  { %2924 = vrot.lane.b32.xlu2 %v2733_v30, %s4037_s4  ;;  %v2683_v58 = vadd.f32 %v2675_v15, %v2318_v0  ;;  %v8399_v30 = vld [vmem:[#allocation170_spill] sm:$0xff]  ;;  %v8401_v15 = vld [vmem:[#allocation100_spill] sm:$0xff] }
 0x5e9   :  { %3092 = vperm.xlu0 %3895, %v3058_v52   ;;  %v2883_v4 = vadd.f32 %v6827_v18, %v2640_v60  ;;  %v3057_v18 = vld [vmem:[%s7503_s9 + $0x28] sm:$0xff]  ;;  %v1536_v52 = vmul.f32 %v8399_v30, %v8398_v51  ;;  %v2807_v60 = vmul.f32 %v6797_v31, %v6868_v22  ;;  %v2865_v22 = vmul.f32 %v6806_v21, %v2853_v9 }
 0x5ea   :  { %v2898_v61 = vpop.permute.xlu2 %2897  ;;  %2922 = vrot.lane.b32.xlu1 %v8391_v17, %s4037_s4  ;;  %v8402_v17 = vld [vmem:[#allocation152_spill] sm:$0xff] }
 0x5eb   :  { %v2908_v7 = vmul.f32 %v6932_v56, %v2898_v61 }
 0x5ec   :  { %v2859_v20 = vpop.permute.xlu1 %2858 }
 0x5ed   :  { %v6941_v33 = vadd.f32 %v2908_v7, %v2883_v4  ;;  %v2868_v43 = vmul.f32 %v6806_v21, %v2859_v20  ;;  %v1627_v4 = vmul.f32 %v8400_v2, %v8224_v39  ;;  %v8403_v7 = vld [vmem:[#allocation249_spill] sm:$0xff] }
 0x5ee   :  { %v1901_v10 = vmul.f32 %v8403_v7, %v8402_v17 }
 0x5ef   :  { %v2876_v36 = vadd.f32 %v2868_v43, %v2843_v40  ;;  %v1200_v40 = vmul.f32 %v8395_v47, %v8337_v62  ;;  %v2988_v62 = vld [vmem:[%s7501_s7 + $0x20] sm:$0xff]  ;;  %v8404_v43 = vld [vmem:[#allocation259_spill] sm:$0xff] }
 0x5f0   :  { %2887 = vrot.lane.b32.xlu2 %v2683_v58, %s4036_s27  ;;  %v1992_v58 = vmul.f32 %v8404_v43, %v6530_v44 }
 0x5f1   :  { %v2884_v32 = vadd.f32 %v2876_v36, %v6855_v26  ;;  %3087 = vperm.xlu0 %3895, %v3057_v18   ;;  %v8397_v26 = vld [vmem:[#allocation146_spill] sm:$0xff]  ;;  %v1208_v61 = vadd.f32 %v1200_v40, %v8401_v15  ;;  %v8408_v40 = vld [vmem:[#allocation307_spill] sm:$0xff] }
 0x5f2   :  { %v6954_v37 = vpop.permute.xlu2 %2792  ;;  %2885 = vrot.lane.b32.xlu1 %v8394_v63, %s4036_s27  ;;  %v1291_v28 = vmul.f32 %v8397_v26, %v6379_v50  ;;  %v8405_v18 = vld [vmem:[#allocation150_spill] sm:$0xff]  ;;  %v2357_v6 = vmul.f32 %v8408_v40, %v6554_v16  ;;  %v8409_v26 = vld [vmem:[#allocation39_spill] sm:$0xff] }
 0x5f3   :  { %v6960_v8 = vadd.f32 %v2909_v12, %v2884_v32  ;;  %v1198_v36 = vmul.f32 %v8405_v18, %v6411_v41  ;;  %v1544_v12 = vadd.f32 %v1536_v52, %v1208_v61  ;;  %v8406_v32 = vld [vmem:[#allocation189_spill] sm:$0xff]  ;;  %v2722_v52 = vmul.f32 %v6850_v42, %v6560_v13 }
 0x5f4   :  { %v2820_v57 = vpop.permute.xlu1 %2819  ;;  %v1299_v20 = vadd.f32 %v1291_v28, %v934_v46  ;;  %v2266_v25 = vmul.f32 %v8407_v38, %v8406_v32  ;;  %v8410_v28 = vld [vmem:[#allocation63_spill] sm:$0xff]  ;;  %v8416_v38 = vld [vmem:[#allocation230_spill] sm:$0xff] }
 0x5f5   :  { %v2832_v5 = vmul.f32 %v6803_v27, %v2820_v57  ;;  %v1534_v57 = vmul.f32 %v8410_v28, %v8233_v14  ;;  %v1909_v41 = vadd.f32 %v1901_v10, %v1544_v12  ;;  %v8412_v46 = vld [vmem:[#allocation247_spill] sm:$0xff]  ;;  %v3490_v14 = vld [vmem:[%s7505_s11 + $0x8] sm:$0xff] }
 0x5f6   :  { %v1635_v47 = vadd.f32 %v1627_v4, %v1299_v20  ;;  %v1899_v2 = vmul.f32 %v8412_v46, %v6506_v1  ;;  %v8414_v10 = vld [vmem:[#allocation22_spill] sm:$0xff]  ;;  %v8415_v1 = vld [vmem:[#allocation308_spill] sm:$0xff]  ;;  %v2986_v32 = vld [vmem:[%s7501_s7 + $0x10] sm:$0xff] }
 0x5f7   :  { %v2840_v0 = vadd.f32 %v2832_v5, %v2807_v60  ;;  %v8411_v5 = vld [vmem:[#allocation90_spill] sm:$0xff]  ;;  %v2274_v4 = vadd.f32 %v2266_v25, %v1909_v41  ;;  %v2830_v41 = vmul.f32 %v6803_v27, %v6928_v3 }
 0x5f8   :  { %3014 = vperm.xlu2 %3894, %v2988_v62   ;;  %v2000_v30 = vadd.f32 %v1992_v58, %v1635_v47  ;;  %v1206_v62 = vadd.f32 %v1198_v36, %v8411_v5  ;;  %v8417_v46 = vld [vmem:[#allocation18_spill] sm:$0xff] }
 0x5f9   :  { %v2873_v63 = vadd.f32 %v2865_v22, %v2840_v0  ;;  %3062 = vperm.xlu0 %3895, %v3052_v48   ;;  %v2406_v0 = vmul.f32 %v8415_v1, %v6608_v29 }
 0x5fa   :  { %v6991_v9 = vpop.permute.xlu2 %2930  ;;  %v2849_v55 = vpop.permute.xlu0 %2848  ;;  %2957 = vrot.lane.b32.xlu1 %v8409_v26, %s4038_s16  ;;  %v2365_v15 = vadd.f32 %v2357_v6, %v2000_v30  ;;  %v1542_v61 = vadd.f32 %v1534_v57, %v1206_v62  ;;  %v2984_v62 = vld [vmem:[%s7501_s7] sm:$0xff] }
 0x5fb   :  { %v2881_v51 = vadd.f32 %v2873_v63, %v6863_v53  ;;  %v8413_v53 = vld [vmem:[#allocation296_spill] sm:$0xff]  ;;  %v2414_v25 = vadd.f32 %v2406_v0, %v8416_v38 }
 0x5fc   :  { %v2616_v60 = vpop.permute.xlu1 %2615  ;;  %v2264_v17 = vmul.f32 %v8413_v53, %v6522_v59  ;;  %v2730_v42 = vadd.f32 %v2722_v52, %v2365_v15  ;;  %v1907_v22 = vadd.f32 %v1899_v2, %v1542_v61  ;;  %v2771_v59 = vmul.f32 %v6877_v35, %v6623_v24  ;;  %v2985_v52 = vld [vmem:[%s7501_s7 + $0x8] sm:$0xff]  ;;  %v8420_v53 = vld [vmem:[#allocation167_spill] sm:$0xff]  ;;  %v3059_v0 = vld [vmem:[%s7503_s9 + $0x38] sm:$0xff] }
 0x5fd   :  { %v2631_v48 = vmul.f32 %v2616_v60, %v8201_v54  ;;  %v2863_v60 = vmul.f32 %v6806_v21, %v2849_v55  ;;  %v497_v2 = vmul.f32 %v8417_v46, %v8319_v11 }
 0x5fe   :  { %v2272_v20 = vadd.f32 %v2264_v17, %v1907_v22  ;;  %v2779_v47 = vadd.f32 %v2771_v59, %v2414_v25  ;;  %v1531_v17 = vmul.f32 %v8420_v53, %v8224_v39 }
 0x5ff   :  { %v2639_v7 = vadd.f32 %v2631_v48, %v2274_v4  ;;  %v8419_v48 = vld [vmem:[#allocation135_spill] sm:$0xff] }
 0x600   :  { %2920 = vrot.lane.b32.xlu2 %v8414_v10, %s4037_s4  ;;  %v1195_v15 = vmul.f32 %v8419_v48, %v6379_v50  ;;  %v8421_v50 = vld [vmem:[#allocation245_spill] sm:$0xff] }
 0x601   :  { %3500 = vperm.xlu0 %3895, %v3490_v14   ;;  %v1896_v22 = vmul.f32 %v8421_v50, %v6530_v44  ;;  %v8424_v48 = vld [vmem:[#allocation257_spill] sm:$0xff] }
 0x602   :  { %v2608_v54 = vpop.permute.xlu2 %2607  ;;  %2918 = vrot.lane.b32.xlu1 %v2730_v42, %s4037_s4  ;;  %v2806_v42 = vmul.f32 %v6797_v31, %v6954_v37 }
 0x603   :  { %v2629_v43 = vmul.f32 %v2608_v54, %v6547_v19  ;;  %v2896_v58 = vpop.permute.xlu0 %2895  ;;  %v8422_v54 = vld [vmem:[#allocation294_spill] sm:$0xff] }
 0x604   :  { %v2855_v18 = vpop.permute.xlu1 %2854  ;;  %v2907_v19 = vmul.f32 %v6932_v56, %v2896_v58 }
 0x605   :  { %v7017_v36 = vadd.f32 %v2629_v43, %v2272_v20  ;;  %v2866_v12 = vmul.f32 %v6806_v21, %v2855_v18  ;;  %v2261_v20 = vmul.f32 %v8422_v54, %v6554_v16  ;;  %v3055_v16 = vld [vmem:[%s7503_s9 + $0x18] sm:$0xff] }
 0x607   :  { %v2874_v63 = vadd.f32 %v2866_v12, %v6899_v34 }
 0x608   :  { %3004 = vperm.xlu2 %3894, %v2986_v32  }
 0x609   :  { %v2882_v40 = vadd.f32 %v2874_v63, %v2639_v7 }
 0x60a   :  { %v2894_v6 = vpop.permute.xlu2 %2893  ;;  %2953 = vrot.lane.b32.xlu1 %v2779_v47, %s4038_s16  ;;  %v8423_v47 = vld [vmem:[#allocation278_spill] sm:$0xff] }
 0x60b   :  { %v2906_v35 = vmul.f32 %v6932_v56, %v2894_v6  ;;  %v2787_v26 = vpop.permute.xlu0 %2786  ;;  %v7028_v28 = vadd.f32 %v2907_v19, %v2882_v40  ;;  %v3054_v40 = vld [vmem:[%s7503_s9 + $0x10] sm:$0xff] }
 0x60c   :  { %v2791_v57 = vpop.permute.xlu1 %2790  ;;  %v2803_v58 = vmul.f32 %v6797_v31, %v2787_v26 }
 0x60d   :  { %v7032_v30 = vadd.f32 %v2906_v35, %v2881_v51  ;;  %v2805_v34 = vmul.f32 %v6797_v31, %v2791_v57  ;;  %v8418_v51 = vld [vmem:[#allocation66_spill] sm:$0xff]  ;;  %v3489_v57 = vld [vmem:[%s7505_s11] sm:$0xff] }
 0x60e   :  { %v830_v4 = vmul.f32 %v8418_v51, %v8321_v49  ;;  %v3056_v49 = vld [vmem:[%s7503_s9 + $0x20] sm:$0xff]  ;;  %v3491_v51 = vld [vmem:[%s7505_s11 + $0x10] sm:$0xff] }
 0x60f   :  { %v2838_v5 = vadd.f32 %v2830_v41, %v2805_v34  ;;  %v3053_v34 = vld [vmem:[%s7503_s9 + $0x8] sm:$0xff] }
 0x610   :  { %2999 = vperm.xlu2 %3894, %v2985_v52   ;;  %v838_v55 = vadd.f32 %v830_v4, %v497_v2  ;;  %v3492_v2 = vld [vmem:[%s7505_s11 + $0x18] sm:$0xff] }
 0x611   :  { %v2871_v3 = vadd.f32 %v2863_v60, %v2838_v5 }
 0x612   :  { %v2966_v14 = vpop.permute.xlu2 %2965  ;;  %2994 = vperm.xlu1 %3896, %v2984_v62   ;;  %v1203_v10 = vadd.f32 %v1195_v15, %v838_v55  ;;  %v8425_v15 = vld [vmem:[#allocation99_spill] sm:$0xff] }
 0x613   :  { %v2814_v61 = vpop.permute.xlu0 %2813  ;;  %v7099_v55 = vperm.slane %v8425_v15, 1 }
 0x614   :  { %v2818_v7 = vpop.permute.xlu1 %2817  ;;  %v1539_v39 = vadd.f32 %v1531_v17, %v1203_v10 }
 0x615   :  { %v2831_v11 = vmul.f32 %v6803_v27, %v2818_v7 }
 0x616   :  { %v1904_v37 = vadd.f32 %v1896_v22, %v1539_v39 }
 0x617   :  { %v2839_v1 = vadd.f32 %v2831_v11, %v2806_v42  ;;  %v2975_v11 = vmul.f32 %v7099_v55, %v2966_v14 }
 0x618   :  { %3082 = vperm.xlu2 %3894, %v3056_v49   ;;  %v2269_v12 = vadd.f32 %v2261_v20, %v1904_v37  ;;  %v2829_v49 = vmul.f32 %v6803_v27, %v2814_v61  ;;  %v8426_v61 = vld [vmem:[#allocation289_spill] sm:$0xff] }
 0x61a   :  { %3097 = vperm.xlu1 %3896, %v3059_v0   ;;  %v2812_v43 = vpop.permute.xlu2 %2811 }
 0x61b   :  { %v2828_v59 = vmul.f32 %v6803_v27, %v2812_v43  ;;  %v2596_v18 = vpop.permute.xlu0 %2595 }
 0x61c   :  { %v2626_v44 = vmul.f32 %v2596_v18, %v6560_v13  ;;  %v2604_v32 = vpop.permute.xlu1 %2603  ;;  %v8427_v18 = vld [vmem:[#allocation227_spill] sm:$0xff] }
 0x61d   :  { %v2836_v38 = vadd.f32 %v2828_v59, %v2803_v58  ;;  %v2628_v25 = vmul.f32 %v2604_v32, %v6269_v45 }
 0x61e   :  { %v2634_v63 = vadd.f32 %v2626_v44, %v2269_v12 }
 0x61f   :  { %v2636_v19 = vadd.f32 %v2628_v25, %v8423_v47 }
 0x620   :  { %3077 = vperm.xlu2 %3894, %v3055_v16  }
 0x621   :  { %v7074_v6 = vadd.f32 %v2871_v3, %v2636_v19 }
 0x622   :  { %3072 = vperm.xlu1 %3896, %v3054_v40   ;;  %v2929_v13 = vpop.permute.xlu2 %2928 }
 0x623   :  { %v2847_v35 = vpop.permute.xlu0 %2846 }
 0x624   :  { %v2851_v26 = vpop.permute.xlu1 %2850 }
 0x625   :  { %v2864_v45 = vmul.f32 %v6806_v21, %v2851_v26 }
 0x627   :  { %v2872_v41 = vadd.f32 %v2864_v45, %v2839_v1  ;;  %v2862_v1 = vmul.f32 %v6806_v21, %v2847_v35 }
 0x628   :  { %3495 = vperm.xlu2 %3894, %v3489_v57  }
 0x629   :  { %v7084_v52 = vadd.f32 %v2872_v41, %v7017_v36  ;;  %v7096_v36 = vperm.slane %v8424_v48, 1 }
 0x62a   :  { %3067 = vperm.xlu1 %3896, %v3053_v34   ;;  %v2845_v60 = vpop.permute.xlu2 %2844 }
 0x62b   :  { %v2861_v5 = vmul.f32 %v6806_v21, %v2845_v60  ;;  %v2960_v3 = vpop.permute.xlu0 %2959  ;;  %v2941_v17 = vmul.f32 %v7096_v36, %v6991_v9  ;;  %v2942_v7 = vmul.f32 %v7096_v36, %v6952_v23 }
 0x62c   :  { %v2964_v62 = vpop.permute.xlu1 %2963  ;;  %v2972_v40 = vmul.f32 %v7099_v55, %v2960_v3 }
 0x62d   :  { %v2869_v46 = vadd.f32 %v2861_v5, %v2836_v38  ;;  %v2974_v10 = vmul.f32 %v7099_v55, %v2964_v62  ;;  %v2949_v22 = vadd.f32 %v2941_v17, %v6941_v33  ;;  %v2950_v0 = vadd.f32 %v2942_v7, %v6960_v8 }
 0x62f   :  { %v7093_v4 = vadd.f32 %v2869_v46, %v2634_v63  ;;  %v2983_v54 = vadd.f32 %v2975_v11, %v2950_v0  ;;  %v2982_v23 = vadd.f32 %v2974_v10, %v2949_v22  ;;  %v2940_v63 = vmul.f32 %v7096_v36, %v2929_v13 }
 0x630   :  { %3510 = vperm.xlu2 %3894, %v3492_v2  }
 0x632   :  { %3505 = vperm.xlu1 %3896, %v3491_v51   ;;  %v2892_v53 = vpop.permute.xlu2 %2891 }
 0x633   :  { %v3030_v9 = vpop.permute.xlu0 %3029  ;;  %v2905_v2 = vmul.f32 %v6932_v56, %v2892_v53 }
 0x634   :  { %v2789_v42 = vpop.permute.xlu1 %2788  ;;  %v3039_v43 = vadd.f32 %v3030_v9, %v2983_v54 }
 0x635   :  { %v2804_v50 = vmul.f32 %v6797_v31, %v2789_v42  ;;  %v2262_v31 = vmul.f32 %v8426_v61, %v6608_v29  ;;  %v2948_v29 = vadd.f32 %v2940_v63, %v7028_v28  ;;  %v2913_v15 = vadd.f32 %v2905_v2, %v7084_v52 }
 0x637   :  { %v2837_v39 = vadd.f32 %v2829_v49, %v2804_v50  ;;  %v2270_v21 = vadd.f32 %v2262_v31, %v8427_v18 }
 0x639   :  { %v2870_v20 = vadd.f32 %v2862_v1, %v2837_v39 }
 0x63a   :  { %v3025_v37 = vpop.permute.xlu2 %3024 }
 0x63b   :  { %v3038_v14 = vadd.f32 %v3025_v37, %v2982_v23  ;;  %v2956_v25 = vpop.permute.xlu0 %2955 }
 0x63c   :  { %v2927_v58 = vpop.permute.xlu1 %2926  ;;  %v2970_v17 = vmul.f32 %v7099_v55, %v2956_v25 }
 0x63d   :  { %v3051_v27 = vpack.c.bf16 %v3039_v43, %v3038_v14  ;;  %v2939_v16 = vmul.f32 %v7096_v36, %v2927_v58 }
 0x63f   :  { %3136 = vmatpush.bf16.msra.mxu2 %v3051_v27  ;;  %v2947_v47 = vadd.f32 %v2939_v16, %v7032_v30 }
 0x642   :  { %v2925_v59 = vpop.permute.xlu2 %2924 }
 0x643   :  { %v3020_v57 = vpop.permute.xlu0 %3019  ;;  %v2938_v51 = vmul.f32 %v7096_v36, %v2925_v59 }
 0x644   :  { %v2600_v33 = vpop.permute.xlu1 %2599 }
 0x645   :  { %v2627_v8 = vmul.f32 %v2600_v33, %v6623_v24  ;;  %v2980_v24 = vadd.f32 %v2972_v40, %v2947_v47  ;;  %v2946_v42 = vadd.f32 %v2938_v51, %v2913_v15 }
 0x647   :  { %v2635_v12 = vadd.f32 %v2627_v8, %v2270_v21  ;;  %v3661_v8 = vld [vmem:[%s7502_s8 + $0x18] sm:$0xff] }
 0x649   :  { %v2878_v44 = vadd.f32 %v2870_v20, %v2635_v12 }
 0x64a   :  { %v2888_v32 = vpop.permute.xlu2 %2887 }
 0x64b   :  { %v2952_v28 = vpop.permute.xlu0 %2951 }
 0x64c   :  { %v2890_v38 = vpop.permute.xlu1 %2889  ;;  %v2968_v27 = vmul.f32 %v7099_v55, %v2952_v28 }
 0x64d   :  { %v2904_v13 = vmul.f32 %v6932_v56, %v2890_v38 }
 0x64f   :  { %v2912_v3 = vadd.f32 %v2904_v13, %v7074_v6  ;;  %v2903_v6 = vmul.f32 %v6932_v56, %v2888_v32 }
 0x651   :  { %v2911_v23 = vadd.f32 %v2903_v6, %v2878_v44 }
 0x652   :  { %v3015_v26 = vpop.permute.xlu2 %3014 }
 0x653   :  { %v3036_v41 = vadd.f32 %v3015_v26, %v2980_v24  ;;  %v3010_v22 = vpop.permute.xlu0 %3009 }
 0x654   :  { %v2962_v19 = vpop.permute.xlu1 %2961 }
 0x655   :  { %v2973_v35 = vmul.f32 %v7099_v55, %v2962_v19 }
 0x657   :  { %v2981_v45 = vadd.f32 %v2973_v35, %v2948_v29 }
 0x659   :  { %v3037_v34 = vadd.f32 %v3020_v57, %v2981_v45 }
 0x65a   :  { %v2921_v62 = vpop.permute.xlu2 %2920 }
 0x65b   :  { %v3050_v60 = vpack.c.bf16 %v3037_v34, %v3036_v41  ;;  %v2936_v52 = vmul.f32 %v7096_v36, %v2921_v62  ;;  %v7153_v12 = vpop.permute.xlu0 %3092 }
 0x65c   :  { %v2923_v5 = vpop.permute.xlu1 %2922 }
 0x65d   :  { %3137 = vmatpush.bf16.msra.mxu2 %v3050_v60  ;;  %v2937_v46 = vmul.f32 %v7096_v36, %v2923_v5  ;;  %v2944_v14 = vadd.f32 %v2936_v52, %v2911_v23 }
 0x65f   :  { %v2945_v48 = vadd.f32 %v2937_v46, %v2912_v3 }
 0x661   :  { %v2978_v11 = vadd.f32 %v2970_v17, %v2945_v48 }
 0x662   :  { %v3005_v10 = vpop.permute.xlu2 %3004 }
 0x663   :  { %v3034_v1 = vadd.f32 %v3005_v10, %v2978_v11  ;;  %v3088_v32 = vpop.permute.xlu0 %3087 }
 0x664   :  { %v2886_v30 = vpop.permute.xlu1 %2885 }
 0x665   :  { %v2902_v9 = vmul.f32 %v6932_v56, %v2886_v30 }
 0x667   :  { %v2910_v37 = vadd.f32 %v2902_v9, %v7093_v4  ;;  %v3659_v4 = vld [vmem:[%s7502_s8 + $0x8] sm:$0xff] }
 0x66a   :  { %v3000_v59 = vpop.permute.xlu2 %2999 }
 0x66b   :  { %v3063_v63 = vpop.permute.xlu0 %3062 }
 0x66c   :  { %v2958_v7 = vpop.permute.xlu1 %2957 }
 0x66d   :  { %v2971_v49 = vmul.f32 %v7099_v55, %v2958_v7 }
 0x66f   :  { %v2979_v50 = vadd.f32 %v2971_v49, %v2946_v42 }
 0x671   :  { %v3035_v0 = vadd.f32 %v3010_v22, %v2979_v50 }
 0x672   :  { %v3083_v40 = vpop.permute.xlu2 %3082 }
 0x673   :  { %v3049_v53 = vpack.c.bf16 %v3035_v0, %v3034_v1 }
 0x674   :  { %v2919_v39 = vpop.permute.xlu1 %2918 }
 0x675   :  { %3138 = vmatpush.bf16.msra.mxu2 %v3049_v53  ;;  %v2935_v54 = vmul.f32 %v7096_v36, %v2919_v39  ;;  %v3658_v36 = vld [vmem:[%s7502_s8] sm:$0xff] }
 0x677   :  { %v2943_v58 = vadd.f32 %v2935_v54, %v2910_v37 }
 0x679   :  { %v2976_v31 = vadd.f32 %v2968_v27, %v2943_v58 }
 0x67a   :  { %v3078_v13 = vpop.permute.xlu2 %3077 }
 0x67c   :  { %v2954_v20 = vpop.permute.xlu1 %2953 }
 0x67d   :  { %v2969_v43 = vmul.f32 %v7099_v55, %v2954_v20  ;;  %v3660_v55 = vld [vmem:[%s7502_s8 + $0x10] sm:$0xff] }
 0x67f   :  { %v2977_v61 = vadd.f32 %v2969_v43, %v2944_v14 }
 0x681   :  { %v3033_v56 = vadd.f32 %v3000_v59, %v2977_v61 }
 0x684   :  { %v2995_v33 = vpop.permute.xlu1 %2994 }
 0x685   :  { %v3032_v18 = vadd.f32 %v2995_v33, %v2976_v31 }
 0x687   :  { %v3048_v21 = vpack.c.bf16 %v3033_v56, %v3032_v18 }
 0x689   :  { %3139 = vmatpush.bf16.msra.mxu2 %v3048_v21 }
 0x68c   :  { %3634 = vmatmul.msk.bf16.vlgmr.msra.gmra.mxu2 %vm257_vm1, %v3658_v36  ;;  %v7155_v44 = vpop.permute.xlu1 %3097 }
 0x694   :  { %v3073_v25 = vpop.permute.xlu1 %3072 }
 0x69c   :  { %3635 = vmatmul.msk.bf16.gmra.mxu2 %vm257_vm1, %v3659_v4  ;;  %v3068_v19 = vpop.permute.xlu1 %3067 }
 0x6ac   :  { %3636 = vmatmul.msk.bf16.gmra.mxu2 %vm257_vm1, %v3660_v55 }
 0x6bc   :  { %3637 = vmatmul.msk.bf16.gmra.mxu2 %vm257_vm1, %v3661_v8 }
 0x70f   :  { %v3141_v38 = vpop.f32.mrf.mxu2 }
 0x710   :  { %v7157_v47 = vadd.f32 %v3141_v38, %v3063_v63 }
 0x712   :  { %v7162_v35 = vmul.f32 0.70710677, %v7157_v47 }
 0x714   :  { %v3193_v57 = vand.u32 2147483647, %v7162_v35 }
 0x716   :  { %v3201_v5 = vmul.f32 0.3275911, %v3193_v57  ;;  %v3409_v39 = vsub.f32 0.0, %v3193_v57 }
 0x717   :  { %v3143_v16 = vpop.f32.mrf.mxu2 }
 0x718   :  { %v7159_v29 = vadd.f32 %v3143_v16, %v3068_v19  ;;  %v7183_v2 = vadd.f32 1.0, %v3201_v5  ;;  %v3417_v14 = vmul.f32 %v3409_v39, %v3193_v57 }
 0x71a   :  { %v7165_v26 = vmul.f32 0.70710677, %v7159_v29  ;;  %3897 = vrcp.f32 %v7183_v2  ;;  %v3228_v27 = vand.u32 2147483648, %v7183_v2  ;;  %vm3222_vm5 = vweird.f32 %v7183_v2 }
 0x71b   :  { %v7241_v56 = vmul.f32 1.442695, %v3417_v14  ;;  %v3226_v4 = vand.u32 2147483647, %v7183_v2 }
 0x71c   :  { %v7174_v34 = vand.u32 2147483647, %v7165_v26 }
 0x71d   :  { %vm7289_vm14 = vcmp.eq.f32.partialorder %v3226_v4, 8.507059e+37 }
 0x71e   :  { %v3202_v62 = vmul.f32 0.3275911, %v7174_v34 }
 0x71f   :  { %v3146_v24 = vpop.f32.mrf.mxu2 }
 0x720   :  { %v7167_v45 = vadd.f32 %v3146_v24, %v3073_v25  ;;  %v7185_v3 = vadd.f32 1.0, %v3202_v62  ;;  %v7206_v10 = vpop.eup %3897 }
 0x721   :  { %v3218_v0 = vmul.f32 %v7206_v10, %v7183_v2  ;;  %vm3223_vm6 = vweird.f32 %v7206_v10 }
 0x722   :  { %v7171_v41 = vmul.f32 0.70710677, %v7167_v45  ;;  %3899 = vrcp.f32 %v7185_v3  ;;  %v3241_v38 = vand.u32 2147483647, %v7185_v3  ;;  %vm3237_vm7 = vweird.f32 %v7185_v3  ;;  %vm7285_vm13 = vmor %vm3222_vm5, %vm3223_vm6 }
 0x723   :  { %v3219_v37 = vsub.f32 1.0, %v3218_v0  ;;  %v3243_v57 = vand.u32 2147483648, %v7185_v3 }
 0x724   :  { %v7177_v60 = vand.u32 2147483647, %v7171_v41  ;;  %vm7293_vm15 = vcmp.eq.f32.partialorder %v3241_v38, 8.507059e+37 }
 0x725   :  { %v3220_v33 = vmul.f32 %v7206_v10, %v3219_v37 }
 0x726   :  { %v3203_v46 = vmul.f32 0.3275911, %v7177_v60 }
 0x727   :  { %v3148_v30 = vpop.f32.mrf.mxu2  ;;  %v7263_v24 = vadd.f32 %v7206_v10, %v3220_v33 }
 0x728   :  { %v7181_v28 = vadd.f32 %v3148_v30, %v3078_v13  ;;  %v7190_v48 = vadd.f32 1.0, %v3203_v46  ;;  %v7212_v22 = vpop.eup %3899 }
 0x729   :  { %v3233_v20 = vmul.f32 %v7212_v22, %v7185_v3  ;;  %vm3238_vm10 = vweird.f32 %v7212_v22 }
 0x72a   :  { %v7188_v51 = vmul.f32 0.70710677, %v7181_v28  ;;  %3901 = vrcp.f32 %v7190_v48  ;;  %vm3252_vm8 = vweird.f32 %v7190_v48  ;;  %v3256_v13 = vand.u32 2147483647, %v7190_v48 }
 0x72b   :  { %v3234_v61 = vsub.f32 1.0, %v3233_v20  ;;  %v3258_v30 = vand.u32 2147483648, %v7190_v48 }
 0x72c   :  { %v7194_v15 = vand.u32 2147483647, %v7188_v51  ;;  %vm7325_vm5 = vcmp.eq.f32.partialorder %v3256_v13, 8.507059e+37  ;;  %v3244_v13 = vor.u32 1.1754944e-38, %v3243_v57 }
 0x72d   :  { %v3235_v25 = vmul.f32 %v7212_v22, %v3234_v61 }
 0x72e   :  { %v3204_v17 = vmul.f32 0.3275911, %v7194_v15 }
 0x72f   :  { %v3151_v7 = vpop.f32.mrf.mxu2 }
 0x730   :  { %v7199_v42 = vadd.f32 %v3151_v7, %v3083_v40  ;;  %v7201_v11 = vadd.f32 1.0, %v3204_v17  ;;  %v7214_v1 = vpop.eup %3901  ;;  %v3236_v7 = vadd.f32 %v7212_v22, %v3235_v25  ;;  %v3259_v25 = vor.u32 1.1754944e-38, %v3258_v30 }
 0x731   :  { %v3248_v23 = vmul.f32 %v7214_v1, %v7190_v48  ;;  %vm3253_vm9 = vweird.f32 %v7214_v1 }
 0x732   :  { %v7204_v49 = vmul.f32 0.70710677, %v7199_v42  ;;  %3903 = vrcp.f32 %v7201_v11  ;;  %vm7303_vm2 = vmor %vm3252_vm8, %vm3253_vm9  ;;  %vm3267_vm3 = vweird.f32 %v7201_v11  ;;  %v3271_v48 = vand.u32 2147483647, %v7201_v11 }
 0x733   :  { %v3249_v31 = vsub.f32 1.0, %v3248_v23  ;;  %vm7351_vm9 = vmor %vm3237_vm7, %vm3238_vm10 }
 0x734   :  { %v7210_v50 = vand.u32 2147483647, %v7204_v49 }
 0x735   :  { %v3250_v16 = vmul.f32 %v7214_v1, %v3249_v31 }
 0x736   :  { %v3205_v53 = vmul.f32 0.3275911, %v7210_v50 }
 0x737   :  { %v3153_v6 = vpop.f32.mrf.mxu2  ;;  %v3251_v17 = vadd.f32 %v7214_v1, %v3250_v16 }
 0x738   :  { %v7219_v9 = vadd.f32 1.0, %v3205_v53  ;;  %v7221_v52 = vadd.f32 %v3153_v6, %v3088_v32  ;;  %v7223_v54 = vpop.eup %3903  ;;  %v7249_v32 = vor.u32 1.1754944e-38, %v3228_v27  ;;  %v3273_v27 = vand.u32 2147483648, %v7201_v11 }
 0x739   :  { %v3263_v43 = vmul.f32 %v7223_v54, %v7201_v11  ;;  %vm3268_vm12 = vweird.f32 %v7223_v54  ;;  %v3225_v11 = vsel %vm7285_vm13, %v7206_v10, %v7263_v24 }
 0x73a   :  { %3905 = vrcp.f32 %v7219_v9  ;;  %v7233_v58 = vmul.f32 0.70710677, %v7221_v52  ;;  %v3288_v53 = vand.u32 2147483648, %v7219_v9  ;;  %vm3282_vm0 = vweird.f32 %v7219_v9  ;;  %vm7331_vm6 = vmor %vm3267_vm3, %vm3268_vm12 }
 0x73b   :  { %v3264_v18 = vsub.f32 1.0, %v3263_v43  ;;  %v3286_v14 = vand.u32 2147483647, %v7219_v9  ;;  %v3274_v16 = vor.u32 1.1754944e-38, %v3273_v27 }
 0x73c   :  { %v7237_v59 = vand.u32 2147483647, %v7233_v58 }
 0x73d   :  { %v3265_v40 = vmul.f32 %v7223_v54, %v3264_v18  ;;  %vm3287_vm8 = vcmp.eq.f32.partialorder %v3286_v14, 8.507059e+37  ;;  %v3411_v14 = vsub.f32 0.0, %v7177_v60 }
 0x73e   :  { %v3206_v21 = vmul.f32 0.3275911, %v7237_v59 }
 0x73f   :  { %v3156_v36 = vpop.f32.mrf.mxu2  ;;  %v3266_v39 = vadd.f32 %v7223_v54, %v3265_v40 }
 0x740   :  { %v3906_v55 = vpop.eup %3905  ;;  %v7246_v8 = vadd.f32 %v3156_v36, %v7153_v12  ;;  %v7255_v19 = vadd.f32 1.0, %v3206_v21  ;;  %v3255_v21 = vsel %vm7303_vm2, %v7214_v1, %v3251_v17  ;;  %v3289_v1 = vor.u32 1.1754944e-38, %v3288_v53 }
 0x741   :  { %v3278_v63 = vmul.f32 %v3906_v55, %v7219_v9  ;;  %vm3283_vm11 = vweird.f32 %v3906_v55 }
 0x742   :  { %v7260_v12 = vmul.f32 0.70710677, %v7246_v8  ;;  %3907 = vrcp.f32 %v7255_v19  ;;  %vm7315_vm4 = vmor %vm3282_vm0, %vm3283_vm11  ;;  %vm3272_vm11 = vcmp.eq.f32.partialorder %v3271_v48, 8.507059e+37  ;;  %vm3297_vm10 = vweird.f32 %v7255_v19 }
 0x743   :  { %v3279_v5 = vsub.f32 1.0, %v3278_v63 }
 0x744   :  { %v7270_v62 = vand.u32 2147483647, %v7260_v12 }
 0x745   :  { %v3280_v46 = vmul.f32 %v3906_v55, %v3279_v5  ;;  %v7365_v5 = vsel %vm7325_vm5, %v3259_v25, %v3255_v21 }
 0x746   :  { %v3207_v0 = vmul.f32 0.3275911, %v7270_v62  ;;  %v3339_v6 = vmul.f32 1.0614054, %v7365_v5 }
 0x747   :  { %v3158_v37 = vpop.f32.mrf.mxu2  ;;  %v3281_v43 = vadd.f32 %v3906_v55, %v3280_v46  ;;  %v3303_v46 = vand.u32 2147483648, %v7255_v19 }
 0x748   :  { %v7309_v61 = vadd.f32 1.0, %v3207_v0  ;;  %v7312_v31 = vadd.f32 %v3158_v37, %v7155_v44  ;;  %v3908_v33 = vpop.eup %3907  ;;  %v3347_v36 = vadd.f32 -1.4531521, %v3339_v6  ;;  %v3415_v6 = vsub.f32 0.0, %v7270_v62 }
 0x749   :  { %v3285_v18 = vsel %vm7315_vm4, %v3906_v55, %v3281_v43  ;;  %v3293_v4 = vmul.f32 %v3908_v33, %v7255_v19  ;;  %v3270_v55 = vsel %vm7331_vm6, %v7223_v54, %v3266_v39  ;;  %v3240_v54 = vsel %vm7351_vm9, %v7212_v22, %v3236_v7 }
 0x74a   :  { %3909 = vrcp.f32 %v7309_v61  ;;  %v7345_v38 = vmul.f32 0.70710677, %v7312_v31  ;;  %v7355_v40 = vsel %vm3287_vm8, %v3289_v1, %v3285_v18  ;;  %v7367_v3 = vsel %vm3272_vm11, %v3274_v16, %v3270_v55 }
 0x74b   :  { %v3294_v63 = vsub.f32 1.0, %v3293_v4  ;;  %vm3298_vm7 = vweird.f32 %v3908_v33  ;;  %v3341_v17 = vmul.f32 1.0614054, %v7355_v40  ;;  %v3301_v22 = vand.u32 2147483647, %v7255_v19 }
 0x74c   :  { %v7361_v24 = vand.u32 2147483647, %v7345_v38  ;;  %v7376_v7 = vsel %vm7289_vm14, %v7249_v32, %v3225_v11  ;;  %v7380_v53 = vsel %vm7293_vm15, %v3244_v13, %v3240_v54  ;;  %v3340_v37 = vmul.f32 1.0614054, %v7367_v3  ;;  %vm3299_vm12 = vmor %vm3297_vm10, %vm3298_vm7 }
 0x74d   :  { %v3295_v30 = vmul.f32 %v3908_v33, %v3294_v63  ;;  %v3410_v43 = vsub.f32 0.0, %v7174_v34  ;;  %v3304_v2 = vor.u32 1.1754944e-38, %v3303_v46  ;;  %v3349_v27 = vadd.f32 -1.4531521, %v3341_v17 }
 0x74e   :  { %v3208_v0 = vmul.f32 0.3275911, %v7361_v24  ;;  %v3337_v19 = vmul.f32 1.0614054, %v7376_v7  ;;  %vm3302_vm13 = vcmp.eq.f32.partialorder %v3301_v22, 8.507059e+37  ;;  %v3318_v18 = vand.u32 2147483648, %v7309_v61 }
 0x74f   :  { %v3296_v39 = vadd.f32 %v3908_v33, %v3295_v30  ;;  %v3338_v48 = vmul.f32 1.0614054, %v7380_v53  ;;  %v3348_v44 = vadd.f32 -1.4531521, %v3340_v37  ;;  %v7401_v1 = vmul.f32 %v3410_v43, %v7174_v34 }
 0x750   :  { %v3910_v57 = vpop.eup %3909  ;;  %v7388_v32 = vadd.f32 1.0, %v3208_v0  ;;  %v3357_v55 = vmul.f32 %v3349_v27, %v7355_v40  ;;  %v3345_v25 = vadd.f32 -1.4531521, %v3337_v19  ;;  %vm3312_vm15 = vweird.f32 %v7309_v61 }
 0x751   :  { %v3308_v20 = vmul.f32 %v3910_v57, %v7309_v61  ;;  %v3300_v23 = vsel %vm3299_vm12, %v3908_v33, %v3296_v39  ;;  %vm3313_vm14 = vweird.f32 %v3910_v57  ;;  %v3316_v33 = vand.u32 2147483647, %v7309_v61 }
 0x752   :  { %3911 = vrcp.f32 %v7388_v32  ;;  %v7395_v21 = vsel %vm3302_vm13, %v3304_v2, %v3300_v23  ;;  %v3346_v63 = vadd.f32 -1.4531521, %v3338_v48  ;;  %v3419_v54 = vmul.f32 %v3411_v14, %v7177_v60  ;;  %vm3314_vm0 = vmor %vm3312_vm15, %vm3313_vm14 }
 0x753   :  { %v3309_v9 = vsub.f32 1.0, %v3308_v20  ;;  %v3342_v4 = vmul.f32 1.0614054, %v7395_v21  ;;  %3913 = vpow2.f32 %v7241_v56  ;;  %v3412_v13 = vsub.f32 0.0, %v7194_v15 }
 0x754   :  { %v3319_v30 = vor.u32 1.1754944e-38, %v3318_v18  ;;  %v3356_v46 = vmul.f32 %v3348_v44, %v7367_v3  ;;  %vm3317_vm2 = vcmp.eq.f32.partialorder %v3316_v33, 8.507059e+37  ;;  %v3355_v0 = vmul.f32 %v3347_v36, %v7365_v5 }
 0x755   :  { %v3310_v11 = vmul.f32 %v3910_v57, %v3309_v9  ;;  %v3350_v10 = vadd.f32 -1.4531521, %v3342_v4  ;;  %v3365_v39 = vadd.f32 1.4214138, %v3357_v55  ;;  %v3353_v60 = vmul.f32 %v3345_v25, %v7376_v7 }
 0x756   :  { %v3354_v14 = vmul.f32 %v3346_v63, %v7380_v53  ;;  %v3413_v20 = vsub.f32 0.0, %v7210_v50  ;;  %v3414_v23 = vsub.f32 0.0, %v7237_v59  ;;  %v3364_v27 = vadd.f32 1.4214138, %v3356_v46 }
 0x757   :  { %v3311_v16 = vadd.f32 %v3910_v57, %v3310_v11  ;;  %v3358_v34 = vmul.f32 %v3350_v10, %v7395_v21  ;;  %v3333_v19 = vand.u32 2147483648, %v7388_v32  ;;  %v3363_v18 = vadd.f32 1.4214138, %v3355_v0 }
 0x758   :  { %v3912_v56 = vpop.eup %3911  ;;  %v3331_v44 = vand.u32 2147483647, %v7388_v32  ;;  %v3373_v11 = vmul.f32 %v3365_v39, %v7355_v40  ;;  %v3423_v33 = vmul.f32 %v3415_v6, %v7270_v62  ;;  %v3361_v55 = vadd.f32 1.4214138, %v3353_v60 }
 0x759   :  { %v3315_v17 = vsel %vm3314_vm0, %v3910_v57, %v3311_v16  ;;  %v3323_v22 = vmul.f32 %v3912_v56, %v7388_v32  ;;  %v3366_v43 = vadd.f32 1.4214138, %v3358_v34  ;;  %v7417_v57 = vpop.eup %3913  ;;  %vm3328_vm3 = vweird.f32 %v3912_v56 }
 0x75a   :  { %v7411_v61 = vsel %vm3317_vm2, %v3319_v30, %v3315_v17  ;;  %v3362_v25 = vadd.f32 1.4214138, %v3354_v14  ;;  %vm3327_vm4 = vweird.f32 %v7388_v32  ;;  %v3372_v63 = vmul.f32 %v3364_v27, %v7367_v3 }
 0x75b   :  { %v3343_v37 = vmul.f32 1.0614054, %v7411_v61  ;;  %v3324_v2 = vsub.f32 1.0, %v3323_v22  ;;  %v3374_v48 = vmul.f32 %v3366_v43, %v7395_v21  ;;  %v3421_v30 = vmul.f32 %v3413_v20, %v7210_v50  ;;  %vm3329_vm5 = vmor %vm3327_vm4, %vm3328_vm3 }
 0x75c   :  { %v3422_v46 = vmul.f32 %v3414_v23, %v7237_v59  ;;  %v3334_v17 = vor.u32 1.1754944e-38, %v3333_v19  ;;  %vm3332_vm6 = vcmp.eq.f32.partialorder %v3331_v44, 8.507059e+37  ;;  %v3381_v62 = vadd.f32 -0.28449672, %v3373_v11 }
 0x75d   :  { %v3351_v9 = vadd.f32 -1.4531521, %v3343_v37  ;;  %v3325_v36 = vmul.f32 %v3912_v56, %v3324_v2  ;;  %v3382_v10 = vadd.f32 -0.28449672, %v3374_v48  ;;  %v3371_v22 = vmul.f32 %v3363_v18, %v7365_v5 }
 0x75e   :  { %v3437_v39 = vmul.f32 1.442695, %v3423_v33  ;;  %v3416_v60 = vsub.f32 0.0, %v7361_v24  ;;  %v3380_v50 = vadd.f32 -0.28449672, %v3372_v63  ;;  %v3370_v59 = vmul.f32 %v3362_v25, %v7380_v53 }
 0x75f   :  { %v3359_v4 = vmul.f32 %v3351_v9, %v7411_v61  ;;  %v3326_v16 = vadd.f32 %v3912_v56, %v3325_v36  ;;  %v3390_v43 = vmul.f32 %v3382_v10, %v7395_v21  ;;  %v3420_v14 = vmul.f32 %v3412_v13, %v7194_v15 }
 0x760   :  { %v3435_v20 = vmul.f32 1.442695, %v3422_v46  ;;  %v3369_v23 = vmul.f32 %v3361_v55, %v7376_v7  ;;  %v3429_v2 = vmul.f32 1.442695, %v3419_v54  ;;  %v3389_v19 = vmul.f32 %v3381_v62, %v7355_v40 }
 0x761   :  { %v3367_v34 = vadd.f32 1.4214138, %v3359_v4  ;;  %v3330_v0 = vsel %vm3329_vm5, %v3912_v56, %v3326_v16  ;;  %v3379_v9 = vadd.f32 -0.28449672, %v3371_v22  ;;  %v3433_v48 = vmul.f32 1.442695, %v3421_v30 }
 0x762   :  { %v3335_v6 = vsel %vm3332_vm6, %v3334_v17, %v3330_v0  ;;  %3915 = vpow2.f32 %v3437_v39  ;;  %v3424_v18 = vmul.f32 %v3416_v60, %v7361_v24  ;;  %v3398_v11 = vadd.f32 0.2548296, %v3390_v43 }
 0x763   :  { %v3375_v32 = vmul.f32 %v3367_v34, %v7411_v61  ;;  %v3344_v37 = vmul.f32 1.0614054, %v3335_v6  ;;  %v3388_v33 = vmul.f32 %v3380_v50, %v7367_v3  ;;  %v3378_v15 = vadd.f32 -0.28449672, %v3370_v59 }
 0x764   :  { %v3431_v13 = vmul.f32 1.442695, %v3420_v14  ;;  %3917 = vpow2.f32 %v3435_v20  ;;  %v3377_v55 = vadd.f32 -0.28449672, %v3369_v23  ;;  %v3397_v25 = vadd.f32 0.2548296, %v3389_v19 }
 0x765   :  { %v3383_v56 = vadd.f32 -0.28449672, %v3375_v32  ;;  %v3352_v27 = vadd.f32 -1.4531521, %v3344_v37  ;;  %3919 = vpow2.f32 %v3429_v2  ;;  %v3387_v16 = vmul.f32 %v3379_v9, %v7365_v5 }
 0x766   :  { %3921 = vpow2.f32 %v3433_v48  ;;  %v3439_v10 = vmul.f32 1.442695, %v3424_v18  ;;  %v3406_v30 = vmul.f32 %v3398_v11, %v7395_v21  ;;  %v3396_v46 = vadd.f32 0.2548296, %v3388_v33 }
 0x767   :  { %v3391_v36 = vmul.f32 %v3383_v56, %v7411_v61  ;;  %v3360_v44 = vmul.f32 %v3352_v27, %v3335_v6  ;;  %v3386_v17 = vmul.f32 %v3378_v15, %v7380_v53  ;;  %v3427_v0 = vmul.f32 1.442695, %v7401_v1 }
 0x768   :  { %v3916_v34 = vpop.eup %3915  ;;  %3923 = vpow2.f32 %v3431_v13  ;;  %v3385_v62 = vmul.f32 %v3377_v55, %v7376_v7  ;;  %v3405_v60 = vmul.f32 %v3397_v25, %v7355_v40  ;;  %v3395_v32 = vadd.f32 0.2548296, %v3387_v16 }
 0x769   :  { %v3399_v4 = vadd.f32 0.2548296, %v3391_v36  ;;  %v3368_v54 = vadd.f32 1.4214138, %v3360_v44  ;;  %3925 = vpow2.f32 %v3439_v10  ;;  %v3404_v21 = vmul.f32 %v3396_v46, %v7367_v3 }
 0x76a   :  { %v3918_v37 = vpop.eup %3917  ;;  %v3394_v59 = vadd.f32 0.2548296, %v3386_v17  ;;  %3927 = vpow2.f32 %v3427_v0  ;;  %vm3183_vm8 = vcmp.ge.f32.partialorder %v7260_v12, 0.0  ;;  %v3393_v1 = vadd.f32 0.2548296, %v3385_v62 }
 0x76b   :  { %v3407_v24 = vmul.f32 %v3399_v4, %v7411_v61  ;;  %v3376_v63 = vmul.f32 %v3368_v54, %v3335_v6  ;;  %v3920_v61 = vpop.eup %3919  ;;  %v3446_v50 = vmul.f32 %v3918_v37, %v3406_v30  ;;  %v3403_v2 = vmul.f32 %v3395_v32, %v7365_v5 }
 0x76c   :  { %v3922_v14 = vpop.eup %3921  ;;  %vm3182_vm9 = vcmp.ge.f32.partialorder %v7233_v58, 0.0  ;;  %v3402_v48 = vmul.f32 %v3394_v59, %v7380_v53  ;;  %vm3181_vm11 = vcmp.ge.f32.partialorder %v7204_v49, 0.0  ;;  %vm3184_vm7 = vcmp.ge.f32.partialorder %v7345_v38, 0.0 }
 0x76d   :  { %v3384_v22 = vadd.f32 -0.28449672, %v3376_v63  ;;  %v3447_v39 = vmul.f32 %v3916_v34, %v3407_v24  ;;  %v3445_v23 = vmul.f32 %v3922_v14, %v3405_v60  ;;  %v3454_v19 = vsub.f32 1.0, %v3446_v50 }
 0x76e   :  { %v3924_v40 = vpop.eup %3923  ;;  %v4039_v18 = vmov -1.0   ;;  %v3401_v44 = vmul.f32 %v3393_v1, %v7376_v7  ;;  %v3443_v15 = vmul.f32 %v3920_v61, %v3403_v2  ;;  %vm3180_vm10 = vcmp.ge.f32.partialorder %v7188_v51, 0.0 }
 0x76f   :  { %v3392_v43 = vmul.f32 %v3384_v22, %v3335_v6  ;;  %v3455_v56 = vsub.f32 1.0, %v3447_v39  ;;  %v3444_v9 = vmul.f32 %v3924_v40, %v3404_v21  ;;  %v3926_v3 = vpop.eup %3925  ;;  %v3191_v36 = vsel %vm3183_vm8, 1.0, %v4039_v18 }
 0x770   :  { %v3453_v33 = vsub.f32 1.0, %v3445_v23  ;;  %v3190_v53 = vsel %vm3182_vm9, 1.0, %v4039_v18  ;;  %vm3179_vm12 = vcmp.ge.f32.partialorder %v7171_v41, 0.0  ;;  %v3189_v12 = vsel %vm3181_vm11, 1.0, %v4039_v18 }
 0x771   :  { %v3400_v20 = vadd.f32 0.2548296, %v3392_v43  ;;  %v3463_v11 = vmul.f32 %v3455_v56, %v3191_v36  ;;  %v3462_v4 = vmul.f32 %v3454_v19, %v3190_v53  ;;  %v3452_v55 = vsub.f32 1.0, %v3444_v9  ;;  %v3662_v19 = vld [vmem:[%s7504_s10] sm:$0xff]  ;;  %v3506_v36 = vpop.permute.xlu1 %3505 }
 0x772   :  { %v3192_v7 = vsel %vm3184_vm7, 1.0, %v4039_v18  ;;  %v3441_v25 = vmul.f32 %v7417_v57, %v3401_v44  ;;  %v3461_v51 = vmul.f32 %v3453_v33, %v3189_v12  ;;  %v3451_v24 = vsub.f32 1.0, %v3443_v15 }
 0x773   :  { %v3408_v27 = vmul.f32 %v3400_v20, %v3335_v6  ;;  %v3928_v6 = vpop.eup %3927  ;;  %v3471_v10 = vadd.f32 1.0, %v3463_v11  ;;  %vm3178_vm13 = vcmp.ge.f32.partialorder %v7165_v26, 0.0  ;;  %v3188_v58 = vsel %vm3180_vm10, 1.0, %v4039_v18 }
 0x774   :  { %v3442_v54 = vmul.f32 %v3928_v6, %v3402_v48  ;;  %v3167_v63 = vmul.f32 0.5, %v7246_v8  ;;  %v3168_v30 = vmul.f32 0.5, %v7312_v31  ;;  %v3470_v17 = vadd.f32 1.0, %v3462_v4  ;;  %v3501_v48 = vpop.permute.xlu0 %3500 }
 0x775   :  { %v3448_v5 = vmul.f32 %v3926_v3, %v3408_v27  ;;  %v3460_v49 = vmul.f32 %v3452_v55, %v3188_v58  ;;  %vm3177_vm14 = vcmp.ge.f32.partialorder %v7162_v35, 0.0  ;;  %v3187_v38 = vsel %vm3179_vm12, 1.0, %v4039_v18 }
 0x776   :  { %v3450_v34 = vsub.f32 1.0, %v3442_v54  ;;  %v3166_v57 = vmul.f32 0.5, %v7221_v52  ;;  %v3449_v0 = vsub.f32 1.0, %v3441_v25  ;;  %v3479_v62 = vmul.f32 %v3471_v10, %v3167_v63 }
 0x777   :  { %v3456_v13 = vsub.f32 1.0, %v3448_v5  ;;  %v3469_v39 = vadd.f32 1.0, %v3461_v51  ;;  %v3459_v60 = vmul.f32 %v3451_v24, %v3187_v38  ;;  %v3186_v8 = vsel %vm3178_vm13, 1.0, %v4039_v18 }
 0x778   :  { %v3165_v31 = vmul.f32 0.5, %v7199_v42  ;;  %v3478_v37 = vmul.f32 %v3470_v17, %v3166_v57  ;;  %v3468_v61 = vadd.f32 1.0, %v3460_v49  ;;  %v3458_v43 = vmul.f32 %v3450_v34, %v3186_v8 }
 0x779   :  { %v3464_v16 = vmul.f32 %v3456_v13, %v3192_v7  ;;  %v3185_v35 = vsel %vm3177_vm14, 1.0, %v4039_v18  ;;  %v3164_v41 = vmul.f32 0.5, %v7181_v28  ;;  %v3467_v52 = vadd.f32 1.0, %v3459_v60 }
 0x77a   :  { %v3477_v50 = vmul.f32 %v3469_v39, %v3165_v31  ;;  %v3457_v21 = vmul.f32 %v3449_v0, %v3185_v35  ;;  %v3163_v59 = vmul.f32 0.5, %v7167_v45  ;;  %v3466_v20 = vadd.f32 1.0, %v3458_v43  ;;  %v3496_v45 = vpop.permute.xlu2 %3495 }
 0x77b   :  { %v3472_v46 = vadd.f32 1.0, %v3464_v16  ;;  %v3476_v1 = vmul.f32 %v3468_v61, %v3164_v41  ;;  %v3162_v26 = vmul.f32 0.5, %v7159_v29  ;;  %v3161_v23 = vmul.f32 0.5, %v7157_v47  ;;  %v3663_v29 = vld [vmem:[%s7504_s10 + $0x8] sm:$0xff]  ;;  %s3556_s10 = sshll.u32 %s4040_s0, 4  ;;  %s3557_s10 = int_to_ptr.vmem [resolvable:$true] %s3556_s10 }
 0x77c   :  { %v3487_v14 = vpack.c.bf16 %v3478_v37, %v3477_v50  ;;  %v3475_v42 = vmul.f32 %v3467_v52, %v3163_v59  ;;  %v3465_v56 = vadd.f32 1.0, %v3457_v21 }
 0x77d   :  { %v3480_v22 = vmul.f32 %v3472_v46, %v3168_v30  ;;  %v3474_v40 = vmul.f32 %v3466_v20, %v3162_v26 }
 0x77e   :  { %v3486_v2 = vpack.c.bf16 %v3476_v1, %v3475_v42  ;;  %v3473_v28 = vmul.f32 %v3465_v56, %v3161_v23 }
 0x77f   :  { %v3488_v32 = vpack.c.bf16 %v3480_v22, %v3479_v62 }
 0x780   :  { %v3485_v27 = vpack.c.bf16 %v3474_v40, %v3473_v28 }
 0x781   :  { %3533 = vmatpush.bf16.msra.mxu3 %v3488_v32 }
 0x782   :  { %v3511_v11 = vpop.permute.xlu2 %3510 }
 0x785   :  { %3534 = vmatpush.bf16.msra.mxu3 %v3487_v14 }
 0x789   :  { %3535 = vmatpush.bf16.msra.mxu3 %v3486_v2 }
 0x78d   :  { %3536 = vmatpush.bf16.msra.mxu3 %v3485_v27 }
 0x790   :  { %3646 = vmatmul.msk.bf16.vlgmr.msra.gmra.mxu3 %vm257_vm1, %v3662_v19 }
 0x7a0   :  { %3647 = vmatmul.msk.bf16.gmra.mxu3 %vm257_vm1, %v3663_v29 }
 0x813   :  { %v3538_v47 = vpop.f32.mrf.mxu3 }
 0x814   :  { %v3539_v9 = vadd.f32 %v3538_v47, %v3496_v45 }
 0x816   :  { %3548 = vst [vmem:[#allocation2] sm:$0xff] %v3539_v9 }
 0x81b   :  { %v3540_v3 = vpop.f32.mrf.mxu3 }
 0x81c   :  { %v3541_v18 = vadd.f32 %v3540_v3, %v3501_v48 }
 0x81e   :  { %3549 = vst [vmem:[#allocation2 + $0x8] sm:$0xff] %v3541_v18 }
 0x823   :  { %v3543_v44 = vpop.f32.mrf.mxu3 }
 0x824   :  { %v3544_v5 = vadd.f32 %v3543_v44, %v3506_v36 }
 0x826   :  { %3550 = vst [vmem:[#allocation2 + $0x10] sm:$0xff] %v3544_v5 }
 0x82b   :  { %v3545_v33 = vpop.f32.mrf.mxu3 }
 0x82c   :  { %v3546_v15 = vadd.f32 %v3545_v33, %v3511_v11 }
 0x82e   :  { %3551 = vst [vmem:[#allocation2 + $0x18] sm:$0xff] %v3546_v15 }
 0x82f   :  { %3564 = dma.vmem_to_hbm [thread:$0]  %s3557_s10, 512, %s3559_s20, [#allocation3], %s4041_s2, %s4041_s2, %s3993_s29  }
 0x830   :  { %3975 = dma.done.wait [#allocation3], 512  }
 0x831   :  { %3976 = vsyncadd [#allocation3], 4294966784 }
 0x832   :  { %3569 = vsyncpa [#allocation3], 1 }

</bundles_post_ra>
